<compile_context>
chip_gen: v5e
topology: v5e:2x2
jax: 0.10.0
libtpu: 0.0.40
codegen_flags: <defaults>
</compile_context>

<pallas_src>
import functools
from math import sqrt

import jax
import jax.numpy as jnp
from jax.experimental import pallas as pl
from jax.experimental.pallas import tpu as pltpu


def _round_up(a, b):
    return (a + b - 1) // b * b


def _vmem_config():
    """Returns (per-call tile budget bytes, vmem_limit_bytes), generation-aware."""
    cap = None
    try:
        cap = getattr(pltpu.get_tpu_info(), "vmem_capacity_bytes", None)
    except Exception:
        cap = None
    if cap is None or cap <= 64 * 1024 * 1024:
        # v7x-class (64 MiB / TC) or unknown: leave headroom for Mosaic scratch.
        return 26 * 1024 * 1024, 52 * 1024 * 1024
    # v5e / v6e: 128 MiB physical VMEM.
    return 56 * 1024 * 1024, 100 * 1024 * 1024


def _siren_kernel(x_ref, w_ref, b_ref, o_ref, *, matmul_dtype):
    # Cast x to the MXU dtype in-kernel (x arrives as f32 straight from HBM).
    x = x_ref[...].astype(matmul_dtype)
    acc = jnp.dot(x, w_ref[...], preferred_element_type=jnp.float32)
    # Bias add + sin in f32 (SIREN is phase sensitive); store in out dtype.
    o_ref[...] = jnp.sin(acc + b_ref[...]).astype(o_ref.dtype)


def prepare_siren_params(weight, bias, *, w0=30.0, matmul_dtype=jnp.bfloat16):
    """One-time parameter prep: fold w0, transpose, cast, lane-pad dim_out.

    weight: (dim_out, dim_in); bias: (dim_out,).
    Returns (w_t, b_row, dim_out) with w_t: (dim_in, dim_out_p) in matmul_dtype
    and b_row: (1, dim_out_p) f32, where dim_out_p = round_up(dim_out, 128).
    """
    dim_out, _ = weight.shape
    w_t = (w0 * weight).T.astype(matmul_dtype)            # (dim_in, dim_out)
    b_row = (w0 * bias).astype(jnp.float32).reshape(1, dim_out)
    dim_out_p = _round_up(dim_out, 128)
    if dim_out_p != dim_out:                              # lane-dense output store
        w_t = jnp.pad(w_t, ((0, 0), (0, dim_out_p - dim_out)))
        b_row = jnp.pad(b_row, ((0, 0), (0, dim_out_p - dim_out)))
    return w_t, b_row, dim_out


def siren_apply(x, w_t, b_row, *, tile_m=1024, out_dtype=None,
                matmul_dtype=jnp.bfloat16):
    """sin(x @ w_t + b_row) with prepared (w0-folded, lane-padded) parameters.

    x: (N, dim_in) f32. Returns (N, dim_out_p) in out_dtype (default x.dtype),
    where dim_out_p is the padded width of w_t. Pipelines chaining SIREN layers
    should consume the padded width directly rather than slicing it off.
    """
    N, dim_in = x.shape
    dim_out_p = w_t.shape[1]
    out_dtype = x.dtype if out_dtype is None else out_dtype
    w_bpe = jnp.dtype(matmul_dtype).itemsize
    out_bpe = jnp.dtype(out_dtype).itemsize

    budget, vmem_limit = _vmem_config()

    # ---- tile selection ----------------------------------------------------
    # At least two M tiles when possible so both v7x TensorCores get work.
    if N <= tile_m:
        tm = _round_up(max(pl.cdiv(N, 2), 8), 8)
    else:
        tm = tile_m
    tm = min(tm, _round_up(N, 8))
    tn = dim_out_p

    def fits(t_m, t_n):
        resident_w = t_n == dim_out_p          # whole W in VMEM, single copy
        w_bufs = 1 if resident_w else 2
        need = (2 * t_m * dim_in * 4           # f32 x tiles (double buffered)
                + 2 * t_m * t_n * out_bpe      # out tiles (double buffered)
                + w_bufs * dim_in * t_n * w_bpe
                + w_bufs * t_n * 4)
        return need <= budget

    # Prefer tiling dim_out (shrinks W and the output tile) over collapsing tm.
    while not fits(tm, tn) and tn > 256:
        tn = max(256, _round_up(tn // 2, 128))
    while not fits(tm, tn) and tm > 256:
        tm = max(256, _round_up(tm // 2, 8))
    while not fits(tm, tn) and tn > 128:
        tn = 128
    while not fits(tm, tn) and tm > 8:
        tm = max(8, _round_up(tm // 2, 8))

    m_tiles = pl.cdiv(N, tm)                   # masked edge block, no N padding
    n_tiles = dim_out_p // tn

    if n_tiles == 1:
        # Fully-resident W^T / bias: single VMEM copy, no double buffering.
        w_spec = pl.BlockSpec(memory_space=pltpu.MemorySpace.VMEM)
        b_spec = pl.BlockSpec(memory_space=pltpu.MemorySpace.VMEM)
    else:
        w_spec = pl.BlockSpec((dim_in, tn), lambda i, j: (0, j))
        b_spec = pl.BlockSpec((1, tn), lambda i, j: (0, j))

    cost = pl.CostEstimate(
        flops=2 * N * dim_in * dim_out_p,
        transcendentals=N * dim_out_p,         # advisory; sin is VPU work on TPU
        bytes_accessed=(N * dim_in * 4
                        + m_tiles * dim_in * dim_out_p * w_bpe
                        + N * dim_out_p * out_bpe),
    )

    return pl.pallas_call(
        functools.partial(_siren_kernel, matmul_dtype=matmul_dtype),
        out_shape=jax.ShapeDtypeStruct((N, dim_out_p), out_dtype),
        grid_spec=pltpu.PrefetchScalarGridSpec(
            num_scalar_prefetch=0,
            grid=(m_tiles, n_tiles),
            in_specs=[
                pl.BlockSpec((tm, dim_in), lambda i, j: (i, 0)),   # x tile (f32)
                w_spec,
                b_spec,
            ],
            out_specs=pl.BlockSpec((tm, tn), lambda i, j: (i, j)),
        ),
        compiler_params=pltpu.CompilerParams(
            dimension_semantics=("parallel", "parallel"),
            vmem_limit_bytes=vmem_limit,
        ),
        cost_estimate=cost,
    )(x, w_t, b_row)


def siren_layer(x, weight, bias, *, w0=30.0, tile_m=1024, out_dtype=None,
                matmul_dtype=jnp.bfloat16, trim_output=True):
    """Drop-in SirenLayer forward: sin(w0 * (x @ weight.T + bias)).

    Note: trim_output=True strips the lane padding (an extra XLA copy when
    dim_out < 128); chained SIREN layers should use prepare_siren_params() once
    plus siren_apply() and consume the padded width directly.
    """
    w_t, b_row, dim_out = prepare_siren_params(weight, bias, w0=w0,
                                               matmul_dtype=matmul_dtype)
    out = siren_apply(x, w_t, b_row, tile_m=tile_m, out_dtype=out_dtype,
                      matmul_dtype=matmul_dtype)
    return out[:, :dim_out] if trim_output else out


def init_siren_params(key, dim_in, dim_out, w0=30.0, c=6.0, is_first=False):
    w_std = (1.0 / dim_in) if is_first else (sqrt(c / dim_in) / w0)
    kw, kb = jax.random.split(key)
    weight = jax.random.uniform(kw, (dim_out, dim_in), jnp.float32,
                                minval=-w_std, maxval=w_std)
    bias = jax.random.uniform(kb, (dim_out,), jnp.float32,
                              minval=-w_std, maxval=w_std)
    return weight, bias


if __name__ == "__main__":
    key = jax.random.PRNGKey(0)
    kx, kp = jax.random.split(key)

    # SIREN consumes flattened coordinates: (num_points, dim_in). N is not a
    # multiple of the tile and dim_out < 128, exercising the masked edge block
    # and the lane-padded output path.
    N, dim_in, dim_out = 300, 32, 64
    w0 = 30.0

    x = jax.random.normal(kx, (N, dim_in), jnp.float32)
    weight, bias = init_siren_params(kp, dim_in, dim_out, w0=w0, c=6.0,
                                     is_first=False)

    # Preferred path: prepare parameters once (hoisted out of the per-call
    # path), then apply; the padded (N, 128) output is what a fused next layer
    # would consume.
    w_t, b_row, _ = prepare_siren_params(weight, bias, w0=w0)
    out_padded = jax.block_until_ready(siren_apply(x, w_t, b_row))
    assert out_padded.shape == (N, 128)
    out = out_padded[:, :dim_out]

    # Drop-in wrapper path (trims padding to match the PyTorch module's shape).
    out2 = jax.block_until_ready(siren_layer(x, weight, bias, w0=w0))
    assert out2.shape == (N, dim_out)
    assert jnp.array_equal(out, out2)

    # Reference using the same bf16 matmul inputs as the kernel (tight check).
    ref_bf16 = jnp.sin(
        jnp.dot(x.astype(jnp.bfloat16), (w0 * weight).T.astype(jnp.bfloat16),
                preferred_element_type=jnp.float32) + w0 * bias)
    assert jnp.allclose(out, ref_bf16, atol=1e-4, rtol=0), "mismatch vs bf16 ref"

    # Full-precision module semantics (loose check: bf16 cast of x/W only).
    ref_f32 = jnp.sin(w0 * (x @ weight.T + bias))
    assert jnp.allclose(out, ref_f32, atol=5e-2, rtol=0), "mismatch vs f32 ref"

    print("KERNEL_OK")
</pallas_src>

<mosaic_0001>
module attributes {stable_mosaic.version = 11 : i64} {
  func.func @_siren_kernel(%arg0: i32, %arg1: i32, %arg2: memref<152x32xf32, #tpu.memory_space<vmem>>, %arg3: memref<32x128xbf16, #tpu.memory_space<vmem>>, %arg4: memref<1x128xf32, #tpu.memory_space<vmem>>, %arg5: memref<152x128xf32, #tpu.memory_space<vmem>>) attributes {dimension_semantics = [#tpu.dimension_semantics<parallel>, #tpu.dimension_semantics<parallel>], iteration_bounds = array<i64: 2, 1>, scalar_prefetch = 0 : i64, scratch_operands = 0 : i64, tpu.core_type = #tpu.core_type<tc>, window_params = [{transform_indices = @transform_0, window_bounds = array<i64: 152, 32>}, {pipeline_mode = #tpu.pipeline_mode<synchronous>, transform_indices = @transform_1, window_bounds = array<i64: 32, 128>}, {pipeline_mode = #tpu.pipeline_mode<synchronous>, transform_indices = @transform_2, window_bounds = array<i64: 1, 128>}, {transform_indices = @transform_3, window_bounds = array<i64: 152, 128>}]} {
    %c0 = arith.constant 0 : index
    %c0_0 = arith.constant 0 : index
    %0 = vector.load %arg2[%c0, %c0_0] : memref<152x32xf32, #tpu.memory_space<vmem>>, vector<152x32xf32>
    %1 = arith.truncf %0 : vector<152x32xf32> to vector<152x32xbf16>
    %c0_1 = arith.constant 0 : index
    %c0_2 = arith.constant 0 : index
    %2 = vector.load %arg3[%c0_1, %c0_2] : memref<32x128xbf16, #tpu.memory_space<vmem>>, vector<32x128xbf16>
    %cst = arith.constant dense<0.000000e+00> : vector<152x128xf32>
    %3 = tpu.matmul %1, %2, %cst {dimension_numbers = #tpu.dot_dimension_numbers<[1], [0], [0], [1], [0, 0, 1, 1], [], []>} : vector<152x32xbf16>, vector<32x128xbf16>, vector<152x128xf32> -> vector<152x128xf32>
    %c0_3 = arith.constant 0 : index
    %c0_4 = arith.constant 0 : index
    %4 = vector.load %arg4[%c0_3, %c0_4] : memref<1x128xf32, #tpu.memory_space<vmem>>, vector<1x128xf32>
    %5 = vector.broadcast %4 : vector<1x128xf32> to vector<152x128xf32>
    %6 = arith.addf %3, %5 : vector<152x128xf32>
    %7 = math.sin %6 : vector<152x128xf32>
    %c0_5 = arith.constant 0 : index
    %c0_6 = arith.constant 0 : index
    %8 = vector.load %arg5[%c0_5, %c0_6] : memref<152x128xf32, #tpu.memory_space<vmem>>, vector<152x128xf32>
    tpu.vector_store %arg5[%c0_5, %c0_6], %7 {strides = array<i32>} : memref<152x128xf32, #tpu.memory_space<vmem>>, vector<152x128xf32>,
    return
  }
  func.func @transform_0(%arg0: i32, %arg1: i32) -> (i32, i32) {
    %c0_i32 = arith.constant 0 : i32
    %c0_i32_0 = arith.constant 0 : i32
    return %arg0, %c0_i32 : i32, i32
  }
  func.func @transform_1(%arg0: i32, %arg1: i32) -> (i32, i32) {
    %c0_i32 = arith.constant 0 : i32
    %c0_i32_0 = arith.constant 0 : i32
    %c0_i32_1 = arith.constant 0 : i32
    return %c0_i32, %c0_i32_0 : i32, i32
  }
  func.func @transform_2(%arg0: i32, %arg1: i32) -> (i32, i32) {
    %c0_i32 = arith.constant 0 : i32
    %c0_i32_0 = arith.constant 0 : i32
    %c0_i32_1 = arith.constant 0 : i32
    return %c0_i32, %c0_i32_0 : i32, i32
  }
  func.func @transform_3(%arg0: i32, %arg1: i32) -> (i32, i32) {
    %c0_i32 = arith.constant 0 : i32
    return %arg0, %arg1 : i32, i32
  }
}

</mosaic_0001>

<bundles_post_ra>
// kernel: tpu_custom_call.1
= control target key start
LH: loop header
LB: loop body
LE: loop exit
PB: predicated region body
PF: predicated region fallthrough
CT: control target
= control target key end

     0   :  { %8 = vsyncpa [#allocation3], 0  ;;  %s5976_s0 = inlined_call_operand.vmem [shape: f32[300,32], index: 0, kind: input, shape index: {}]   ;;  %s5977_s1 = inlined_call_operand.vmem [shape: bf16[32,128], index: 1, kind: input, shape index: {}]   ;;  %s5978_s2 = inlined_call_operand.vmem [shape: f32[1,128], index: 2, kind: input, shape index: {}]   ;;  %s5979_s3 = inlined_call_operand.hbm [shape: f32[300,128], index: 3, kind: output, shape index: {}]  }
   0x1   :  { %10 = vsyncpa [#allocation3 + $0x1], 0  ;;  %s3648_s12 = smov 0   ;;  %s3650_s13 = smov 0  }
   0x2   :  { %s3652_s14 = smov 0   ;;  %s3654_s15 = smov 0  }
   0x3   :  { %s3656_s16 = smov 0   ;;  %s3658_s17 = smov 0  }
   0x4 LB: > { %s3378_s18 = sadd.s32 4294967295, %s3617_s17   ;;  %s3379_s19 = sadd.s32 4294967294, %s3617_s17   ;;  %s3617_s17 = sphi %s3658_s17, %s16_s17   ;;  %s3613_s16 = sphi %s3656_s16, %s6022_s16   ;;  %s3609_s15 = sphi %s3654_s15, %s6021_s15   ;;  %s3605_s14 = sphi %s3652_s14, %s6020_s14   ;;  %s3601_s13 = sphi %s3650_s13, %s6019_s13   ;;  %s3597_s12 = sphi %s3648_s12, %s6018_s12  }
   0x5   : > { %s28_s20 = sadd.s32 1, %s3613_s16  ;;  %s105_s21 = sadd.s32 1, %s3605_s14 }
   0x6   : > { %p30_p0 = scmp.ge.s32.totalorder %s28_s20, 2  ;;  %p115_p1 = scmp.ne.s32.totalorder %s3605_s14, %s3601_s13 }
   0x7   : > { %p116_p2 = scmp.eq.s32.totalorder %s3378_s18, 1  ;;  %p121_p3 = scmp.ne.s32.totalorder %s3601_s13, %s3597_s12 }
   0x8   : > { %s6024_s20 = smov (%p30_p0, %s28_s20), 0  ;;  %p122_p5 = scmp.eq.s32.totalorder %s3379_s19, 1 }
   0x9   : > { %p3688_p4 = por %p116_p2, %p115_p1  ;;  %s100_s23 = ssub.s32 %s3613_s16, %s6024_s20 }
   0xa   : > { %p3382_p6 = scmp.ge.s32.totalorder %s3617_s17, 1  ;;  %p103_p7 = scmp.eq.s32.totalorder %s100_s23, 0 }
   0xb   : > { %p3695_p8 = por %p122_p5, %p121_p3  ;;  %p155_p9 = scmp.lt.s32.totalorder %s3617_s17, 3 }
   0xc   : > { %s3701_s25 = scalar_select %p103_p7, %s3605_s14, %s105_s21  }
   0xd   : > { %p156_p10 = pnand %p3382_p6, %p155_p9 }
   0xe   : > { %s179_s26 = smul.u32 (!%p156_p10), 19, %s3609_s15  ;;  %s176_s10 = sand.u32 (!%p156_p10), 1, %s3601_s13  }
   0xf   : > { %159 = sbr.rel (%p156_p10) target bundleno = 912 (0x390), region = 32 }
  0x10   : > { %p180_p11 = scmp.lt.s32.totalorder (!%p156_p10), %s179_s26, 37  ;;  %s4014_s11 = smul.u32 (!%p156_p10), 152, %s176_s10 }
  0x11   : > { %s3464_s27 = smul.u32 (!%p156_p10), 152, %s3609_s15  ;;  %s3290_s15 = scalar_lea.sflag (!%p156_p10), [#allocation3], %s176_s10 }
  0x12   : > { %s4036_s18 = scalar_lea.vmem (!%p156_p10), [#allocation2], %s4014_s11  ;;  %s3559_s11 = scalar_lea.hbm (!%p156_p10), %s5979_s3, 304 }
  0x13   : > { %s3302_s30 = scalar_lea.hbm (!%p156_p10), %s5979_s3, %s3464_s27 }
  0x14   : > { %v3463_v0 = vld [vmem:[%s5977_s1 + $0x8] sm:$0xff]  ;;  %v3462_v1 = vld [vmem:[%s5977_s1] sm:$0xff]  ;;  %s6026_s26 = smov (!%p180_p11, %s179_s26), 37  ;;  %vm236_vm0 = vcmask 261120   ;;  %v3619_v49 = vmov 683565275  }
  0x15   : > { %273 = vmatpush.bf16.msra.mxu0 %v3463_v0  ;;  %3465 = vmatpush.bf16.msra.mxu1 %v3463_v0  ;;  %s3383_s4 = sshll.u32 %s6026_s26, 3  ;;  %v3747_v31 = vld [vmem:[%s5978_s2] ss:$0 sm:$0xff]  ;;  %v3620_v51 = vmov 2475754826   ;;  %s3305_s5 = sshll.u32 %s3302_s30, 4  ;;  %s3306_s5 = int_to_ptr.hbm [resolvable:$true] %s3305_s5 }
  0x16   : > { %3466 = vmatpush.bf16.msra.mxu2 %v3463_v0  ;;  %3467 = vmatpush.bf16.msra.mxu3 %v3463_v0  ;;  %s3713_s7 = scalar_lea.vmem %s5976_s0, %s3383_s4  ;;  %v3621_v55 = vmov 2131351028   ;;  %v3622_v58 = vmov 2102212464   ;;  %v3623_v61 = vmov 920167782  }
  0x17   : > { %v187_v2 = vld [vmem:[%s3713_s7] sm:$0xff]  ;;  %v188_v3 = vld [vmem:[%s3713_s7 + $0x8] sm:$0xff]  ;;  %v193_v5 = vld [vmem:[%s3713_s7 + $0x30] sm:$0xff]  ;;  %v3624_v0 = vmov 1326507024   ;;  %s3303_s4 = sshll.u32 %s4036_s18, 4  ;;  %s3304_s4 = int_to_ptr.vmem [resolvable:$true] %s3303_s4 }
  0x18   : > { %v206_v4 = vpack.c.bf16 %v188_v3, %v187_v2  ;;  %v194_v6 = vld [vmem:[%s3713_s7 + $0x38] sm:$0xff]  ;;  %v199_v8 = vld [vmem:[%s3713_s7 + $0x60] sm:$0xff]  ;;  %v200_v9 = vld [vmem:[%s3713_s7 + $0x68] sm:$0xff]  ;;  %s3553_s6 = sshra.s32 %s3306_s5, 4  ;;  %s3554_s6 = int_to_ptr.hbm [resolvable:$true] %s3553_s6 }
  0x19   : > { %274 = vmatpush.bf16.msra.mxu0 %v3462_v1  ;;  %3468 = vmatpush.bf16.msra.mxu1 %v3462_v1  ;;  %v209_v7 = vpack.c.bf16 %v194_v6, %v193_v5  ;;  %v201_v10 = vld [vmem:[%s3713_s7 + $0x70] sm:$0xff]  ;;  %v202_v11 = vld [vmem:[%s3713_s7 + $0x78] sm:$0xff]  ;;  %v212_v12 = vpack.c.bf16 %v200_v9, %v199_v8  ;;  %v195_v16 = vld [vmem:[%s3713_s7 + $0x40] sm:$0xff]  ;;  %p3560_p1 = scmp.lt.s32.totalorder %s3554_s6, %s5979_s3 }
  0x1a   : > { %3469 = vmatpush.bf16.msra.mxu2 %v3462_v1  ;;  %3470 = vmatpush.bf16.msra.mxu3 %v3462_v1  ;;  %v213_v13 = vpack.c.bf16 %v202_v11, %v201_v10  ;;  %v189_v14 = vld [vmem:[%s3713_s7 + $0x10] sm:$0xff]  ;;  %v190_v15 = vld [vmem:[%s3713_s7 + $0x18] sm:$0xff]  ;;  %v196_v17 = vld [vmem:[%s3713_s7 + $0x48] sm:$0xff] }
  0x1b   : > { %v207_v18 = vpack.c.bf16 %v190_v15, %v189_v14  ;;  %v203_v19 = vld [vmem:[%s3713_s7 + $0x80] sm:$0xff]  ;;  %v204_v20 = vld [vmem:[%s3713_s7 + $0x88] sm:$0xff]  ;;  %v210_v21 = vpack.c.bf16 %v196_v17, %v195_v16  ;;  %v197_v25 = vld [vmem:[%s3713_s7 + $0x50] sm:$0xff] }
  0x1c   : > { %3392 = vmatmul.msk.bf16.vlgmr.msra.gmra.mxu0 %vm236_vm0, %v206_v4  ;;  %3395 = vmatmul.msk.bf16.vlgmr.msra.gmra.mxu1 %vm236_vm0, %v209_v7  ;;  %v214_v22 = vpack.c.bf16 %v204_v20, %v203_v19  ;;  %v191_v23 = vld [vmem:[%s3713_s7 + $0x20] sm:$0xff]  ;;  %v192_v24 = vld [vmem:[%s3713_s7 + $0x28] sm:$0xff]  ;;  %v198_v26 = vld [vmem:[%s3713_s7 + $0x58] sm:$0xff] }
  0x1d   : > { %3398 = vmatmul.msk.bf16.vlgmr.msra.gmra.mxu2 %vm236_vm0, %v212_v12  ;;  %3399 = vmatmul.msk.bf16.vlgmr.msra.gmra.mxu3 %vm236_vm0, %v213_v13  ;;  %v208_v27 = vpack.c.bf16 %v192_v24, %v191_v23  ;;  %v205_v28 = vld [vmem:[%s3713_s7 + $0x90] sm:$0xff]  ;;  %v211_v29 = vpack.c.bf16 %v198_v26, %v197_v25  ;;  %s3555_s7 = scalar_lea.hbm %s3554_s6, 152 }
  0x1e   : > { %v215_v30 = vpack.c.bf16 %v205_v28, %v205_v28  ;;  %p3556_p12 = scmp.ne.s32.totalorder %s3554_s6, %s3555_s7  ;;  %p3561_p2 = scmp.lt.s32.totalorder %s3559_s11, %s3555_s7 }
  0x20   : > { %p3557_p13 = pnand %p3556_p12, %p3688_p4  ;;  %p3562_p3 = por %p3561_p2, %p3560_p1 }
  0x22   : > { %p3558_p0 = pneg %p3557_p13 }
  0x24   : > { %p3563_p5 = pnand %p3562_p3, %p3558_p0 }
  0x2c   : > { %3393 = vmatmul.msk.bf16.gmra.mxu0 %vm236_vm0, %v207_v18  ;;  %3396 = vmatmul.msk.bf16.gmra.mxu1 %vm236_vm0, %v210_v21 }
  0x2d   : > { %3400 = vmatmul.msk.bf16.gmra.mxu3 %vm236_vm0, %v214_v22 }
  0x3c   : > { %3394 = vmatmul.msk.bf16.gmra.mxu0 %vm236_vm0, %v208_v27  ;;  %3397 = vmatmul.msk.bf16.gmra.mxu1 %vm236_vm0, %v211_v29 }
  0x3d   : > { %3401 = vmatmul.msk.bf16.gmra.mxu3 %vm236_vm0, %v215_v30 }
  0x99   : > { %v276_v32 = vpop.f32.mrf.mxu0 }
  0x9a   : > { %v3750_v33 = vadd.f32 %v3747_v31, %v276_v32 }
  0x9c   : > { %v328_v34 = vand.u32 2139095040, %v3750_v33  ;;  %v325_v37 = vand.u32 2147483647, %v3750_v33  ;;  %vm327_vm0 = vcmp.lt.s32.totalorder %v3750_v33, 0 }
  0x9e   : > { %v329_v35 = vshrl.u32 %v328_v34, 23  ;;  %v332_v43 = vand.u32 8388607, %v325_v37 }
  0xa0   : > { %v3402_v36 = vadd.s32 4294967169, %v329_v35  ;;  %v311_v40 = vpop.f32.mrf.mxu3  ;;  %v333_v48 = vor.u32 8388608, %v332_v43 }
  0xa1   : > { %v278_v38 = vpop.f32.mrf.mxu0  ;;  %v3758_v42 = vadd.f32 %v3747_v31, %v311_v40 }
  0xa2   : > { %v335_v39 = vadd.s32 1, %v3402_v36  ;;  %v3755_v41 = vadd.f32 %v3747_v31, %v278_v38  ;;  %v3782_v10 = vshll.u32 %v333_v48, 8 }
  0xa4   : > { %vm336_vm1 = vcmp.gt.s32.totalorder %v335_v39, 0  ;;  %v483_v53 = vand.u32 2139095040, %v3755_v41  ;;  %v480_v20 = vand.u32 2147483647, %v3755_v41  ;;  %v374_v21 = vand.u32 65535, %v3782_v10 }
  0xa5   : > { %v337_v44 = vsel %vm336_vm1, %v335_v39, 0  ;;  %v375_v22 = vshrl.u32 %v3782_v10, 16 }
  0xa6   : > { %v339_v45 = vand.u32 31, %v337_v44  ;;  %v3762_v46 = vshrl.u32 %v337_v44, 5  ;;  %v484_v11 = vshrl.u32 %v483_v53, 23  ;;  %v3809_v36 = vand.u32 8388607, %v480_v20 }
  0xa8   : > { %v340_v47 = vsub.s32 32, %v339_v45  ;;  %v342_v50 = vshll.u32 %v3619_v49, %v339_v45  ;;  %v345_v52 = vshll.u32 %v3620_v51, %v339_v45  ;;  %v348_v57 = vshll.u32 %v3621_v55, %v339_v45  ;;  %v313_v2 = vpop.f32.mrf.mxu3 }
  0xa9   : > { %v351_v59 = vshll.u32 %v3622_v58, %v339_v45  ;;  %v354_v63 = vshll.u32 %v3623_v61, %v339_v45  ;;  %vm357_vm2 = vcmp.lt.s32.totalorder %v3762_v46, 1  ;;  %v3777_v5 = vadd.f32 %v3747_v31, %v313_v2 }
  0xaa   : > { %v343_v54 = vshrl.u32 %v3620_v51, %v340_v47  ;;  %v346_v56 = vshrl.u32 %v3621_v55, %v340_v47  ;;  %v349_v60 = vshrl.u32 %v3622_v58, %v340_v47  ;;  %v352_v62 = vshrl.u32 %v3623_v61, %v340_v47 }
  0xab   : > { %v355_v1 = vshrl.u32 %v3624_v0, %v340_v47  ;;  %vm360_vm3 = vcmp.lt.s32.totalorder %v3762_v46, 4  ;;  %vm359_vm4 = vcmp.lt.s32.totalorder %v3762_v46, 3  ;;  %vm358_vm5 = vcmp.lt.s32.totalorder %v3762_v46, 2 }
  0xac   : > { %v344_v3 = vor.u32 %v343_v54, %v342_v50  ;;  %v347_v4 = vor.u32 %v346_v56, %v345_v52  ;;  %v350_v6 = vor.u32 %v349_v60, %v348_v57  ;;  %v353_v7 = vor.u32 %v352_v62, %v351_v59 }
  0xad   : > { %v356_v8 = vor.u32 %v355_v1, %v354_v63  ;;  %v3405_v17 = vadd.s32 4294967169, %v484_v11  ;;  %v341_v28 = vshrl.u32 %v3619_v49, %v340_v47  ;;  %v3625_v54 = vmov 0  }
  0xae   : > { %v365_v9 = vsel %vm357_vm2, %v344_v3, %v347_v4  ;;  %v366_v12 = vsel %vm360_vm3, %v353_v7, 920167782  ;;  %v369_v13 = vsel %vm357_vm2, %v347_v4, %v350_v6  ;;  %v362_v39 = vsel %vm360_vm3, %v350_v6, 2102212464 }
  0xaf   : > { %v370_v14 = vsel %vm360_vm3, %v356_v8, 1326507024  ;;  %v367_v15 = vsel %vm359_vm4, %v350_v6, %v366_v12  ;;  %v490_v32 = vadd.s32 1, %v3405_v17  ;;  %v361_v38 = vsel %vm357_vm2, %v341_v28, %v344_v3 }
  0xb0   : > { %v371_v16 = vsel %vm359_vm4, %v353_v7, %v370_v14  ;;  %v368_v18 = vsel %vm358_vm5, %v365_v9, %v367_v15  ;;  %v316_v27 = vpop.f32.mrf.mxu3  ;;  %v363_v53 = vsel %vm359_vm4, %v347_v4, %v362_v39  ;;  %v488_v4 = vor.u32 8388608, %v3809_v36 }
  0xb1   : > { %v372_v19 = vsel %vm358_vm5, %v369_v13, %v371_v16  ;;  %v398_v25 = vand.u32 65535, %v368_v18  ;;  %v399_v26 = vshrl.u32 %v368_v18, 16  ;;  %v3805_v34 = vadd.f32 %v3747_v31, %v316_v27 }
  0xb2   : > { %v376_v23 = vand.u32 65535, %v372_v19  ;;  %v377_v24 = vshrl.u32 %v372_v19, 16  ;;  %vm491_vm7 = vcmp.gt.s32.totalorder %v490_v32, 0  ;;  %vm3891_vm3 = vcmp.le.f32.partialorder %v325_v37, 0.7853982 }
  0xb3   : > { %v401_v35 = vmul.u32 %v399_v26, %v374_v21  ;;  %v400_v45 = vmul.u32 %v398_v25, %v374_v21  ;;  %v402_v47 = vmul.u32 %v398_v25, %v375_v22  ;;  %v403_v57 = vmul.u32 %v399_v26, %v375_v22 }
  0xb4   : > { %v379_v29 = vmul.u32 %v377_v24, %v374_v21  ;;  %v380_v30 = vmul.u32 %v376_v23, %v375_v22  ;;  %v378_v40 = vmul.u32 %v376_v23, %v374_v21  ;;  %v381_v44 = vmul.u32 %v377_v24, %v375_v22 }
  0xb5   : > { %v404_v48 = vshll.u32 %v401_v35, 16  ;;  %v406_v60 = vshll.u32 %v402_v47, 16  ;;  %v492_v3 = vsel %vm491_vm7, %v490_v32, 0  ;;  %v405_v13 = vshrl.u32 %v401_v35, 16 }
  0xb6   : > { %v382_v43 = vshll.u32 %v379_v29, 16  ;;  %v384_v50 = vshll.u32 %v380_v30, 16  ;;  %v383_v7 = vshrl.u32 %v379_v29, 16  ;;  %v494_v9 = vand.u32 31, %v492_v3 }
  0xb7   : > { %vm408_vm8 = vc.u32 %v400_v45, %v404_v48  ;;  %v410_v1 = vadd.s32 %v404_v48, %v400_v45  ;;  %v385_v12 = vshrl.u32 %v380_v30, 16  ;;  %v407_v15 = vshrl.u32 %v402_v47, 16 }
  0xb8   : > { %vm386_vm6 = vc.u32 %v378_v40, %v382_v43  ;;  %v388_v52 = vadd.s32 %v382_v43, %v378_v40  ;;  %v409_v62 = vsel %vm408_vm8, 1, %v3625_v54  ;;  %v318_v6 = vpop.f32.mrf.mxu3  ;;  %v495_v17 = vsub.s32 32, %v494_v9 }
  0xb9   : > { %v387_v56 = vsel %vm386_vm6, 1, %v3625_v54  ;;  %v411_v2 = vadd.s32 %v409_v62, %v403_v57  ;;  %v3822_v11 = vadd.f32 %v3747_v31, %v318_v6  ;;  %vm412_vm10 = vc.u32 %v410_v1, %v406_v60  ;;  %v281_v62 = vpop.f32.mrf.mxu0 }
  0xba   : > { %v389_v59 = vadd.s32 %v387_v56, %v381_v44  ;;  %vm390_vm9 = vc.u32 %v388_v52, %v384_v50  ;;  %v413_v16 = vsel %vm412_vm10, 1, %v3625_v54  ;;  %v3825_v19 = vshrl.u32 %v492_v3, 5 }
  0xbb   : > { %v391_v63 = vsel %vm390_vm9, 1, %v3625_v54  ;;  %v415_v18 = vadd.s32 %v413_v16, %v411_v2  ;;  %v497_v21 = vshll.u32 %v3619_v49, %v494_v9  ;;  %v500_v22 = vshll.u32 %v3620_v51, %v494_v9 }
  0xbc   : > { %v393_v8 = vadd.s32 %v391_v63, %v389_v59  ;;  %v498_v24 = vshrl.u32 %v3620_v51, %v495_v17  ;;  %v501_v25 = vshrl.u32 %v3621_v55, %v495_v17  ;;  %v503_v26 = vshll.u32 %v3621_v55, %v494_v9 }
  0xbd   : > { %v416_v27 = vadd.s32 %v415_v18, %v405_v13  ;;  %v504_v28 = vshrl.u32 %v3622_v58, %v495_v17  ;;  %v506_v29 = vshll.u32 %v3622_v58, %v494_v9  ;;  %v507_v30 = vshrl.u32 %v3623_v61, %v495_v17 }
  0xbe   : > { %v394_v14 = vadd.s32 %v393_v8, %v383_v7  ;;  %v364_v32 = vsel %vm358_vm5, %v361_v38, %v363_v53  ;;  %v3839_v35 = vadd.s32 %v410_v1, %v406_v60  ;;  %v3841_v36 = vor.u32 %v498_v24, %v497_v21 }
  0xbf   : > { %v417_v39 = vadd.s32 %v416_v27, %v407_v15  ;;  %v3843_v40 = vor.u32 %v501_v25, %v500_v22  ;;  %v505_v43 = vor.u32 %v504_v28, %v503_v26  ;;  %v508_v44 = vor.u32 %v507_v30, %v506_v29 }
  0xc0   : > { %v3829_v23 = vadd.s32 %v394_v14, %v385_v12  ;;  %v321_v45 = vpop.f32.mrf.mxu3  ;;  %v509_v47 = vshll.u32 %v3623_v61, %v494_v9  ;;  %v510_v48 = vshrl.u32 %v3624_v0, %v495_v17  ;;  %vm512_vm12 = vcmp.lt.s32.totalorder %v3825_v19, 1 }
  0xc1   : > { %v3850_v46 = vadd.f32 %v3747_v31, %v321_v45  ;;  %v421_v38 = vadd.s32 1, %v417_v39  ;;  %v3853_v50 = vshll.u32 %v488_v4, 8  ;;  %v418_v52 = vmul.u32 %v3782_v10, %v364_v32 }
  0xc2   : > { %vm420_vm11 = vc.u32 %v3829_v23, %v3839_v35  ;;  %v511_v53 = vor.u32 %v510_v48, %v509_v47  ;;  %vm515_vm13 = vcmp.lt.s32.totalorder %v3825_v19, 4  ;;  %v520_v56 = vsel %vm512_vm12, %v3841_v36, %v3843_v40 }
  0xc3   : > { %v422_v57 = vsel %vm420_vm11, %v421_v38, %v417_v39  ;;  %vm514_vm14 = vcmp.lt.s32.totalorder %v3825_v19, 3  ;;  %v521_v59 = vsel %vm515_vm13, %v508_v44, 920167782  ;;  %v524_v60 = vsel %vm512_vm12, %v3843_v40, %v505_v43 }
  0xc4   : > { %v423_v10 = vadd.s32 %v422_v57, %v418_v52  ;;  %vm513_vm15 = vcmp.lt.s32.totalorder %v3825_v19, 2  ;;  %v522_v63 = vsel %vm514_vm14, %v505_v43, %v521_v59  ;;  %v525_v1 = vsel %vm515_vm13, %v511_v53, 1326507024  ;;  %v283_v57 = vpop.f32.mrf.mxu0 }
  0xc5   : > { %v523_v2 = vsel %vm513_vm15, %v520_v56, %v522_v63  ;;  %v526_v3 = vsel %vm514_vm14, %v508_v44, %v525_v1  ;;  %v529_v6 = vand.u32 65535, %v3853_v50  ;;  %v3880_v12 = vadd.f32 %v3747_v31, %v281_v62 }
  0xc6   : > { %v424_v7 = vadd.s32 536870912, %v423_v10  ;;  %v527_v8 = vsel %vm513_vm15, %v524_v60, %v526_v3  ;;  %v553_v4 = vand.u32 65535, %v523_v2  ;;  %v554_v9 = vshrl.u32 %v523_v2, 16 }
  0xc7   : > { %v530_v13 = vshrl.u32 %v3853_v50, 16  ;;  %v531_v14 = vand.u32 65535, %v527_v8  ;;  %v532_v15 = vshrl.u32 %v527_v8, 16  ;;  %v496_v26 = vshrl.u32 %v3619_v49, %v495_v17 }
  0xc8   : > { %v323_v16 = vpop.f32.mrf.mxu3  ;;  %v425_v18 = vshrl.u32 %v424_v7, 30  ;;  %v556_v21 = vmul.u32 %v554_v9, %v529_v6  ;;  %v517_v27 = vsel %vm515_vm13, %v505_v43, 2102212464  ;;  %v635_v39 = vand.u32 2147483647, %v3880_v12 }
  0xc9   : > { %v534_v22 = vmul.u32 %v532_v15, %v529_v6  ;;  %v535_v24 = vmul.u32 %v531_v14, %v530_v13  ;;  %v557_v28 = vmul.u32 %v553_v4, %v530_v13  ;;  %v533_v29 = vmul.u32 %v531_v14, %v529_v6 }
  0xca   : > { %v426_v25 = vshll.u32 %v425_v18, 30  ;;  %v559_v32 = vshll.u32 %v556_v21, 16  ;;  %v449_v45 = vsub.s32 4, %v425_v18  ;;  %v536_v47 = vmul.u32 %v532_v15, %v530_v13 }
  0xcb   : > { %v537_v30 = vshll.u32 %v534_v22, 16  ;;  %v555_v48 = vmul.u32 %v553_v4, %v529_v6  ;;  %v539_v38 = vshll.u32 %v535_v24, 16  ;;  %v558_v53 = vmul.u32 %v554_v9, %v530_v13 }
  0xcc   : > { %v427_v44 = vsub.s32 %v423_v10, %v426_v25  ;;  %v561_v56 = vshll.u32 %v557_v28, 16  ;;  %v538_v63 = vshrl.u32 %v534_v22, 16  ;;  %v3898_v8 = vadd.f32 %v3747_v31, %v283_v57 }
  0xcd   : > { %vm541_vm1 = vc.u32 %v533_v29, %v537_v30  ;;  %v543_v52 = vadd.s32 %v537_v30, %v533_v29  ;;  %vm563_vm5 = vc.u32 %v555_v48, %v559_v32  ;;  %v565_v62 = vadd.s32 %v559_v32, %v555_v48 }
  0xce   : > { %vm428_vm2 = vcmp.lt.s32.totalorder %v427_v44, 0  ;;  %v429_v17 = vsub.s32 0, %v427_v44  ;;  %v542_v43 = vsel %vm541_vm1, 1, %v3625_v54  ;;  %v564_v2 = vsel %vm563_vm5, 1, %v3625_v54 }
  0xcf   : > { %v544_v60 = vadd.s32 %v542_v43, %v536_v47  ;;  %vm545_vm4 = vc.u32 %v543_v52, %v539_v38  ;;  %v566_v7 = vadd.s32 %v564_v2, %v558_v53  ;;  %vm567_vm6 = vc.u32 %v565_v62, %v561_v56 }
  0xd0   : > { %v430_v10 = vsel %vm428_vm2, %v429_v17, %v427_v44  ;;  %v546_v1 = vsel %vm545_vm4, 1, %v3625_v54  ;;  %v516_v37 = vsel %vm512_vm12, %v496_v26, %v3841_v36  ;;  %v540_v4 = vshrl.u32 %v535_v24, 16 }
  0xd1   : > { %v431_v3 = vclz %v430_v10  ;;  %v548_v6 = vadd.s32 %v546_v1, %v544_v60  ;;  %v568_v9 = vsel %vm567_vm6, 1, %v3625_v54  ;;  %v560_v15 = vshrl.u32 %v556_v21, 16 }
  0xd2   : > { %v570_v16 = vadd.s32 %v568_v9, %v566_v7  ;;  %v450_v22 = vsel %vm327_vm0, %v449_v45, %v425_v18  ;;  %v518_v25 = vsel %vm514_vm14, %v3843_v40, %v517_v27  ;;  %v638_v29 = vand.u32 2139095040, %v3880_v12 }
  0xd3   : > { %v3403_v13 = vadd.s32 4294967294, %v431_v3  ;;  %v549_v14 = vadd.s32 %v548_v6, %v538_v63  ;;  %v642_v30 = vand.u32 8388607, %v635_v39  ;;  %v562_v24 = vshrl.u32 %v557_v28, 16 }
  0xd4   : > { %v571_v26 = vadd.s32 %v570_v16, %v560_v15  ;;  %v419_v21 = vadd.s32 %v3839_v35, %v3829_v23  ;;  %v569_v47 = vadd.s32 %v565_v62, %v561_v56  ;;  %v639_v48 = vshrl.u32 %v638_v29, 23 }
  0xd5   : > { %vm3404_vm7 = vcmp.lt.s32.totalorder %v3403_v13, 0  ;;  %v550_v36 = vadd.s32 %v549_v14, %v540_v4  ;;  %v519_v40 = vsel %vm513_vm15, %v516_v37, %v518_v25  ;;  %v452_v38 = vsel %vm3891_vm3, 0, %v450_v22 }
  0xd6   : > { %v434_v32 = vsel %vm3404_vm7, 0, %v3403_v13  ;;  %v572_v27 = vadd.s32 %v571_v26, %v562_v24  ;;  %v3408_v52 = vadd.s32 4294967169, %v639_v48  ;;  %v643_v53 = vor.u32 8388608, %v642_v30 }
  0xd7   : > { %v435_v18 = vsub.s32 32, %v434_v32  ;;  %v439_v45 = vsub.s32 4294967266, %v434_v32  ;;  %vm575_vm8 = vc.u32 %v550_v36, %v569_v47  ;;  %v436_v28 = vshll.u32 %v427_v44, %v434_v32 }
  0xd8   : > { %v576_v57 = vadd.s32 1, %v572_v27  ;;  %v573_v23 = vmul.u32 %v3853_v50, %v519_v40  ;;  %v645_v35 = vadd.s32 1, %v3408_v52  ;;  %v793_v56 = vand.u32 2139095040, %v3898_v8 }
  0xd9   : > { %v437_v17 = vshrl.u32 %v419_v21, %v435_v18  ;;  %v440_v43 = vadd.s32 127, %v439_v45  ;;  %v469_v10 = vadd.s32 3, %v452_v38  ;;  %v3920_v3 = vshll.u32 %v643_v53, 8 }
  0xda   : > { %v577_v19 = vsel %vm575_vm8, %v576_v57, %v572_v27  ;;  %vm646_vm9 = vcmp.gt.s32.totalorder %v645_v35, 0  ;;  %v790_v7 = vand.u32 2147483647, %v3898_v8  ;;  %v794_v37 = vshrl.u32 %v793_v56, 23 }
  0xdb   : > { %v438_v60 = vor.u32 %v437_v17, %v436_v28  ;;  %v441_v62 = vshll.u32 %v440_v43, 23  ;;  %v578_v63 = vadd.s32 %v577_v19, %v573_v23  ;;  %v647_v2 = vsel %vm646_vm9, %v645_v35, 0 }
  0xdc   : > { %v649_v44 = vand.u32 31, %v647_v2  ;;  %v3923_v9 = vand.u32 3, %v469_v10  ;;  %vm482_vm10 = vcmp.lt.s32.totalorder %v3755_v41, 0  ;;  %vm3928_vm11 = vcmp.le.f32.partialorder %v480_v20, 0.7853982 }
  0xdd   : > { %v442_v1 = vor.u32 4788187, %v441_v62  ;;  %v579_v6 = vadd.s32 536870912, %v578_v63  ;;  %v445_v50 = vcvt.s32.f32 %v438_v60  ;;  %v3932_v22 = vadd.s32 %v569_v47, %v550_v36 }
  0xde   : > { %v650_v14 = vsub.s32 32, %v649_v44  ;;  %v3935_v25 = vand.u32 65535, %v3920_v3  ;;  %v3938_v29 = vshrl.u32 %v3920_v3, 16  ;;  %v3940_v24 = vshrl.u32 %v647_v2, 5 }
  0xdf   : > { %v443_v4 = vand.u32 2147483647, %v442_v1  ;;  %v580_v13 = vshrl.u32 %v579_v6, 30  ;;  %v3411_v26 = vadd.s32 4294967169, %v794_v37  ;;  %v3944_v21 = vand.u32 8388607, %v790_v7 }
  0xe0   : > { %v652_v48 = vshll.u32 %v3619_v49, %v649_v44  ;;  %v653_v36 = vshrl.u32 %v3620_v51, %v650_v14  ;;  %v656_v18 = vshrl.u32 %v3621_v55, %v650_v14  ;;  %v662_v45 = vshrl.u32 %v3623_v61, %v650_v14 }
  0xe1   : > { %v446_v15 = vmul.f32 %v445_v50, %v443_v4  ;;  %v581_v30 = vshll.u32 %v580_v13, 30  ;;  %v604_v32 = vsub.s32 4, %v580_v13  ;;  %v665_v40 = vshrl.u32 %v3624_v0, %v650_v14 }
  0xe2   : > { %v655_v38 = vshll.u32 %v3620_v51, %v649_v44  ;;  %v659_v52 = vshrl.u32 %v3622_v58, %v650_v14  ;;  %v661_v53 = vshll.u32 %v3622_v58, %v649_v44  ;;  %v664_v43 = vshll.u32 %v3623_v61, %v649_v44 }
  0xe3   : > { %v447_v20 = vxor.u32 2147483648, %v446_v15  ;;  %v3948_v47 = vsub.s32 %v578_v63, %v581_v30  ;;  %v605_v23 = vsel %vm482_vm10, %v604_v32, %v580_v13  ;;  %v654_v35 = vor.u32 %v653_v36, %v652_v48 }
  0xe4   : > { %v658_v56 = vshll.u32 %v3621_v55, %v649_v44  ;;  %v657_v59 = vor.u32 %v656_v18, %v655_v38  ;;  %v663_v62 = vor.u32 %v662_v45, %v661_v53  ;;  %v666_v19 = vor.u32 %v665_v40, %v664_v43 }
  0xe5   : > { %v448_v27 = vsel %vm327_vm0, %v447_v20, %v446_v15  ;;  %vm583_vm12 = vcmp.lt.s32.totalorder %v3948_v47, 0  ;;  %v584_v17 = vsub.s32 0, %v3948_v47  ;;  %v607_v6 = vsel %vm3928_vm11, 0, %v605_v23 }
  0xe6   : > { %v3961_v28 = vsel %vm3891_vm3, %v3750_v33, %v448_v27  ;;  %v660_v2 = vor.u32 %v659_v52, %v658_v56  ;;  %v651_v37 = vshrl.u32 %v3619_v49, %v650_v14  ;;  %vm667_vm13 = vcmp.lt.s32.totalorder %v3940_v24, 1 }
  0xe7   : > { %v453_v57 = vmul.f32 %v3961_v28, %v3961_v28  ;;  %v585_v60 = vsel %vm583_vm12, %v584_v17, %v3948_v47  ;;  %v3976_v4 = vadd.s32 1, %v3411_v26  ;;  %vm670_vm14 = vcmp.lt.s32.totalorder %v3940_v24, 4 }
  0xe8   : > { %v586_v1 = vclz %v585_v60  ;;  %vm669_vm15 = vcmp.lt.s32.totalorder %v3940_v24, 3  ;;  %v675_v15 = vsel %vm667_vm13, %v654_v35, %v657_v59  ;;  %v676_v30 = vsel %vm670_vm14, %v663_v62, 920167782 }
  0xe9   : > { %v454_v10 = vmul.f32 -0.001358992, %v453_v57  ;;  %v461_v63 = vmul.f32 -0.00019511016, %v453_v57  ;;  %v680_v14 = vsel %vm670_vm14, %v666_v19, 1326507024  ;;  %v679_v26 = vsel %vm667_vm13, %v657_v59, %v660_v2 }
  0xea   : > { %v3406_v13 = vadd.s32 4294967294, %v586_v1  ;;  %v3988_v36 = vadd.s32 3, %v607_v6  ;;  %v677_v18 = vsel %vm669_vm15, %v660_v2, %v676_v30  ;;  %v681_v45 = vsel %vm669_vm15, %v663_v62, %v680_v14 }
  0xeb   : > { %v455_v50 = vadd.f32 0.041655596, %v454_v10  ;;  %v462_v44 = vadd.f32 0.008332121, %v461_v63  ;;  %vm475_vm1 = vcmp.eq.s32.totalorder %v3923_v9, 2  ;;  %vm668_vm2 = vcmp.lt.s32.totalorder %v3940_v24, 2 }
  0xec   : > { %vm3407_vm0 = vcmp.lt.s32.totalorder %v3406_v13, 0  ;;  %vm472_vm3 = vcmp.eq.s32.totalorder %v3923_v9, 0  ;;  %v678_v17 = vsel %vm668_vm2, %v675_v15, %v677_v18  ;;  %v682_v43 = vsel %vm668_vm2, %v679_v26, %v681_v45 }
  0xed   : > { %v456_v20 = vmul.f32 %v455_v50, %v453_v57  ;;  %v463_v32 = vmul.f32 %v462_v44, %v453_v57  ;;  %v589_v48 = vsel %vm3407_vm0, 0, %v3406_v13  ;;  %vm471_vm4 = vcmp.lt.s32.totalorder %v3923_v9, 2 }
  0xee   : > { %v590_v38 = vsub.s32 32, %v589_v48  ;;  %v591_v52 = vshll.u32 %v3948_v47, %v589_v48  ;;  %v594_v53 = vsub.s32 4294967266, %v589_v48  ;;  %v686_v62 = vand.u32 65535, %v682_v43 }
  0xef   : > { %v457_v40 = vadd.f32 -0.4999988, %v456_v20  ;;  %v464_v27 = vadd.f32 -0.16666654, %v463_v32  ;;  %vm468_vm5 = vweird.f32 %v3750_v33  ;;  %v672_v47 = vsel %vm670_vm14, %v660_v2, 2102212464 }
  0xf0   : > { %v592_v60 = vshrl.u32 %v3932_v22, %v590_v38  ;;  %v595_v19 = vadd.s32 127, %v594_v53  ;;  %v687_v10 = vshrl.u32 %v682_v43, 16  ;;  %v708_v63 = vand.u32 65535, %v678_v17 }
  0xf1   : > { %v458_v23 = vmul.f32 %v457_v40, %v453_v57  ;;  %v465_v56 = vmul.f32 %v464_v27, %v453_v57  ;;  %v709_v44 = vshrl.u32 %v678_v17, 16  ;;  %v671_v13 = vsel %vm667_vm13, %v651_v37, %v654_v35 }
  0xf2   : > { %v593_v50 = vor.u32 %v592_v60, %v591_v52  ;;  %v596_v57 = vshll.u32 %v595_v19, 23  ;;  %v689_v22 = vmul.u32 %v687_v10, %v3935_v25  ;;  %v690_v15 = vmul.u32 %v686_v62, %v3938_v29 }
  0xf3   : > { %v459_v1 = vadd.f32 1.0, %v458_v23  ;;  %v466_v6 = vadd.f32 1.0, %v465_v56  ;;  %v673_v14 = vsel %vm669_vm15, %v657_v59, %v672_v47  ;;  %v688_v20 = vmul.u32 %v686_v62, %v3935_v25 }
  0xf4   : > { %v597_v32 = vor.u32 4788187, %v596_v57  ;;  %v600_v26 = vcvt.s32.f32 %v593_v50  ;;  %v691_v48 = vmul.u32 %v687_v10, %v3938_v29  ;;  %v692_v35 = vshll.u32 %v689_v22, 16 }
  0xf5   : > { %v467_v30 = vmul.f32 %v466_v6, %v3961_v28  ;;  %v476_v2 = vxor.u32 2147483648, %v459_v1  ;;  %v694_v18 = vshll.u32 %v690_v15, 16  ;;  %v710_v45 = vmul.u32 %v708_v63, %v3935_v25 }
  0xf6   : > { %v711_v40 = vmul.u32 %v709_v44, %v3935_v25  ;;  %v598_v27 = vand.u32 2147483647, %v597_v32  ;;  %vm696_vm6 = vc.u32 %v688_v20, %v692_v35  ;;  %v698_v38 = vadd.s32 %v692_v35, %v688_v20 }
  0xf7   : > { %v473_v37 = vxor.u32 2147483648, %v467_v30  ;;  %v477_v28 = vsel %vm475_vm1, %v476_v2, %v467_v30  ;;  %v697_v52 = vsel %vm696_vm6, 1, %v3625_v54  ;;  %v712_v53 = vmul.u32 %v708_v63, %v3938_v29 }
  0xf8   : > { %v714_v17 = vshll.u32 %v711_v40, 16  ;;  %v601_v23 = vmul.f32 %v600_v26, %v598_v27  ;;  %v699_v25 = vadd.s32 %v697_v52, %v691_v48  ;;  %vm700_vm7 = vc.u32 %v698_v38, %v694_v18 }
  0xf9   : > { %v474_v59 = vsel %vm472_vm3, %v459_v1, %v473_v37  ;;  %v693_v60 = vshrl.u32 %v689_v22, 16  ;;  %v695_v62 = vshrl.u32 %v690_v15, 16  ;;  %v701_v19 = vsel %vm700_vm7, 1, %v3625_v54 }
  0xfa   : > { %v478_v43 = vsel %vm471_vm4, %v474_v59, %v477_v28  ;;  %v602_v47 = vxor.u32 2147483648, %v601_v23  ;;  %v703_v10 = vadd.s32 %v701_v19, %v699_v25  ;;  %v713_v1 = vmul.u32 %v709_v44, %v3938_v29 }
  0xfb   : > { %v479_v56 = vsel %vm468_vm5, nan, %v478_v43  ;;  %vm718_vm8 = vc.u32 %v710_v45, %v714_v17  ;;  %v716_v9 = vshll.u32 %v712_v53, 16  ;;  %v720_v6 = vadd.s32 %v714_v17, %v710_v45 }
  0xfc   : > { %3270 = vst [vmem:[%s4036_s18] sm:$0xff] %v479_v56  ;;  %v719_v63 = vsel %vm718_vm8, 1, %v3625_v54  ;;  %vm801_vm9 = vcmp.gt.s32.totalorder %v3976_v4, 0  ;;  %v603_v33 = vsel %vm482_vm10, %v602_v47, %v601_v23  ;;  %v704_v50 = vadd.s32 %v703_v10, %v693_v60 }
  0xfd   : > { %v721_v57 = vadd.s32 %v719_v63, %v713_v1  ;;  %v802_v22 = vsel %vm801_vm9, %v3976_v4, 0  ;;  %v606_v29 = vsel %vm3928_vm11, %v3755_v41, %v603_v33  ;;  %v674_v44 = vsel %vm668_vm2, %v671_v13, %v673_v14 }
  0xfe   : > { %vm722_vm12 = vc.u32 %v720_v6, %v716_v9  ;;  %v798_v15 = vor.u32 8388608, %v3944_v21  ;;  %v608_v30 = vmul.f32 %v606_v29, %v606_v29  ;;  %v4050_v2 = vadd.s32 %v704_v50, %v695_v62  ;;  %v286_v62 = vpop.f32.mrf.mxu0 }
  0xff   : > { %v723_v20 = vsel %vm722_vm12, 1, %v3625_v54  ;;  %v804_v32 = vand.u32 31, %v802_v22  ;;  %v4054_v26 = vand.u32 3, %v3988_v36  ;;  %v715_v4 = vshrl.u32 %v711_v40, 16 }
 0x100   : > { %v4056_v48 = vadd.s32 %v720_v6, %v716_v9  ;;  %v725_v16 = vadd.s32 %v723_v20, %v721_v57  ;;  %v609_v35 = vmul.f32 -0.001358992, %v608_v30  ;;  %v616_v37 = vmul.f32 -0.00019511016, %v608_v30 }
 0x101   : > { %v717_v24 = vshrl.u32 %v712_v53, 16  ;;  %v728_v13 = vmul.u32 %v3920_v3, %v674_v44  ;;  %v4061_v21 = vshrl.u32 %v802_v22, 5  ;;  %v4063_v18 = vsub.s32 32, %v804_v32 }
 0x102   : > { %v726_v14 = vadd.s32 %v725_v16, %v715_v4  ;;  %vm730_vm10 = vc.u32 %v4050_v2, %v4056_v48  ;;  %v610_v45 = vadd.f32 0.041655596, %v609_v35  ;;  %v617_v36 = vadd.f32 0.008332121, %v616_v37 }
 0x103   : > { %v807_v40 = vshll.u32 %v3619_v49, %v804_v32  ;;  %v810_v28 = vshll.u32 %v3620_v51, %v804_v32  ;;  %v808_v38 = vshrl.u32 %v3620_v51, %v4063_v18  ;;  %v811_v3 = vshrl.u32 %v3621_v55, %v4063_v18 }
 0x104   : > { %v727_v27 = vadd.s32 %v726_v14, %v717_v24  ;;  %v816_v59 = vshll.u32 %v3622_v58, %v804_v32  ;;  %v611_v52 = vmul.f32 %v610_v45, %v608_v30  ;;  %v618_v53 = vmul.f32 %v617_v36, %v608_v30 }
 0x105   : > { %v814_v17 = vshrl.u32 %v3622_v58, %v4063_v18  ;;  %v817_v43 = vshrl.u32 %v3623_v61, %v4063_v18  ;;  %v4076_v25 = vor.u32 %v808_v38, %v807_v40  ;;  %v4078_v56 = vor.u32 %v811_v3, %v810_v28 }
 0x106   : > { %v731_v23 = vadd.s32 1, %v727_v27  ;;  %v813_v60 = vshll.u32 %v3621_v55, %v804_v32  ;;  %v612_v19 = vadd.f32 -0.4999988, %v611_v52  ;;  %v619_v47 = vadd.f32 -0.16666654, %v618_v53  ;;  %v288_v52 = vpop.f32.mrf.mxu0 }
 0x107   : > { %v818_v10 = vor.u32 %v817_v43, %v816_v59  ;;  %vm822_vm11 = vcmp.lt.s32.totalorder %v4061_v21, 1  ;;  %v819_v63 = vshll.u32 %v3623_v61, %v804_v32  ;;  %v820_v6 = vshrl.u32 %v3624_v0, %v4063_v18 }
 0x108   : > { %v732_v1 = vsel %vm730_vm10, %v731_v23, %v727_v27  ;;  %v815_v9 = vor.u32 %v814_v17, %v813_v60  ;;  %v613_v33 = vmul.f32 %v612_v19, %v608_v30  ;;  %v620_v50 = vmul.f32 %v619_v47, %v608_v30 }
 0x109   : > { %v733_v57 = vadd.s32 %v732_v1, %v728_v13  ;;  %vm825_vm13 = vcmp.lt.s32.totalorder %v4061_v21, 4  ;;  %v821_v22 = vor.u32 %v820_v6, %v819_v63  ;;  %v830_v44 = vsel %vm822_vm11, %v4076_v25, %v4078_v56 }
 0x10a   : > { %v831_v20 = vsel %vm825_vm13, %v818_v10, 920167782  ;;  %v4095_v4 = vshll.u32 %v798_v15, 8  ;;  %v614_v32 = vadd.f32 1.0, %v613_v33  ;;  %v621_v16 = vadd.f32 1.0, %v620_v50 }
 0x10b   : > { %v734_v35 = vadd.s32 536870912, %v733_v57  ;;  %vm824_vm14 = vcmp.lt.s32.totalorder %v4061_v21, 3  ;;  %vm823_vm15 = vcmp.lt.s32.totalorder %v4061_v21, 2  ;;  %v834_v37 = vsel %vm822_vm11, %v4078_v56, %v815_v9 }
 0x10c   : > { %v832_v30 = vsel %vm824_vm14, %v815_v9, %v831_v20  ;;  %v835_v24 = vsel %vm825_vm13, %v821_v22, 1326507024  ;;  %v622_v13 = vmul.f32 %v621_v16, %v606_v29  ;;  %v631_v15 = vxor.u32 2147483648, %v614_v32 }
 0x10d   : > { %v4106_v14 = vshrl.u32 %v734_v35, 30  ;;  %v833_v45 = vsel %vm823_vm15, %v830_v44, %v832_v30  ;;  %vm623_vm0 = vweird.f32 %v3755_v41  ;;  %vm626_vm1 = vcmp.lt.s32.totalorder %v4054_v26, 2 }
 0x10e   : > { %v836_v36 = vsel %vm824_vm14, %v818_v10, %v835_v24  ;;  %v864_v40 = vshrl.u32 %v833_v45, 16  ;;  %v628_v28 = vxor.u32 2147483648, %v622_v13  ;;  %vm630_vm2 = vcmp.eq.s32.totalorder %v4054_v26, 2 }
 0x10f   : > { %v736_v27 = vshll.u32 %v4106_v14, 30  ;;  %v839_v29 = vand.u32 65535, %v4095_v4  ;;  %vm627_vm3 = vcmp.eq.s32.totalorder %v4054_v26, 0  ;;  %v632_v38 = vsel %vm630_vm2, %v631_v15, %v622_v13 }
 0x110   : > { %v837_v3 = vsel %vm823_vm15, %v834_v37, %v836_v36  ;;  %v863_v59 = vand.u32 65535, %v833_v45  ;;  %v629_v53 = vsel %vm627_vm3, %v614_v32, %v628_v28  ;;  %v4121_v60 = vadd.f32 %v3747_v31, %v286_v62 }
 0x111   : > { %v737_v17 = vsub.s32 %v733_v57, %v736_v27  ;;  %v841_v43 = vand.u32 65535, %v837_v3  ;;  %v866_v23 = vmul.u32 %v864_v40, %v839_v29  ;;  %v633_v19 = vsel %vm626_vm1, %v629_v53, %v632_v38 }
 0x112   : > { %v840_v47 = vshrl.u32 %v4095_v4, 16  ;;  %v842_v10 = vshrl.u32 %v837_v3, 16  ;;  %v634_v1 = vsel %vm623_vm0, nan, %v633_v19  ;;  %v806_v6 = vshrl.u32 %v3619_v49, %v4063_v18 }
 0x113   : > { %vm738_vm4 = vcmp.lt.s32.totalorder %v737_v17, 0  ;;  %v739_v63 = vsub.s32 0, %v737_v17  ;;  %v4131_v33 = vadd.f32 %v3747_v31, %v288_v52  ;;  %v729_v62 = vadd.s32 %v4056_v48, %v4050_v2  ;;  %3271 = vst [vmem:[%s4036_s18 + $0x8] sm:$0xff] %v634_v1 }
 0x114   : > { %v844_v50 = vmul.u32 %v842_v10, %v839_v29  ;;  %v845_v26 = vmul.u32 %v841_v43, %v840_v47  ;;  %v826_v41 = vsel %vm822_vm11, %v806_v6, %v4076_v25  ;;  %v867_v22 = vmul.u32 %v863_v59, %v840_v47 }
 0x115   : > { %v740_v57 = vsel %vm738_vm4, %v739_v63, %v737_v17  ;;  %v869_v44 = vshll.u32 %v866_v23, 16  ;;  %v827_v18 = vsel %vm825_vm13, %v815_v9, 2102212464  ;;  %v843_v32 = vmul.u32 %v841_v43, %v839_v29 }
 0x116   : > { %v741_v20 = vclz %v740_v57  ;;  %v847_v31 = vshll.u32 %v844_v50, 16  ;;  %v759_v16 = vsub.s32 4, %v4106_v14  ;;  %v846_v35 = vmul.u32 %v842_v10, %v840_v47 }
 0x117   : > { %v865_v2 = vmul.u32 %v863_v59, %v839_v29  ;;  %v868_v48 = vmul.u32 %v864_v40, %v840_v47  ;;  %v849_v37 = vshll.u32 %v845_v26, 16  ;;  %v871_v25 = vshll.u32 %v867_v22, 16 }
 0x118   : > { %v3409_v30 = vadd.s32 4294967294, %v741_v20  ;;  %vm851_vm5 = vc.u32 %v843_v32, %v847_v31  ;;  %v853_v24 = vadd.s32 %v847_v31, %v843_v32  ;;  %v848_v38 = vshrl.u32 %v844_v50, 16 }
 0x119   : > { %v852_v13 = vsel %vm851_vm5, 1, %v3625_v54  ;;  %vm873_vm6 = vc.u32 %v865_v2, %v869_v44  ;;  %v875_v15 = vadd.s32 %v869_v44, %v865_v2  ;;  %v850_v52 = vshrl.u32 %v845_v26, 16 }
 0x11a   : > { %vm3410_vm7 = vcmp.lt.s32.totalorder %v3409_v30, 0  ;;  %v854_v45 = vadd.s32 %v852_v13, %v846_v35  ;;  %vm855_vm8 = vc.u32 %v853_v24, %v849_v37  ;;  %v874_v9 = vsel %vm873_vm6, 1, %v3625_v54 }
 0x11b   : > { %v744_v36 = vsel %vm3410_vm7, 0, %v3409_v30  ;;  %v856_v28 = vsel %vm855_vm8, 1, %v3625_v54  ;;  %v876_v27 = vadd.s32 %v874_v9, %v868_v48  ;;  %vm877_vm9 = vc.u32 %v875_v15, %v871_v25 }
 0x11c   : > { %v745_v40 = vsub.s32 32, %v744_v36  ;;  %v749_v29 = vsub.s32 4294967266, %v744_v36  ;;  %v858_v3 = vadd.s32 %v856_v28, %v854_v45  ;;  %v746_v59 = vshll.u32 %v737_v17, %v744_v36 }
 0x11d   : > { %v870_v53 = vshrl.u32 %v866_v23, 16  ;;  %v878_v43 = vsel %vm877_vm9, 1, %v3625_v54  ;;  %v828_v63 = vsel %vm824_vm14, %v4078_v56, %v827_v18  ;;  %v872_v6 = vshrl.u32 %v867_v22, 16 }
 0x11e   : > { %v747_v19 = vshrl.u32 %v729_v62, %v745_v40  ;;  %v750_v47 = vadd.s32 127, %v749_v29  ;;  %v859_v10 = vadd.s32 %v858_v3, %v848_v38  ;;  %v880_v1 = vadd.s32 %v878_v43, %v876_v27 }
 0x11f   : > { %v945_v57 = vand.u32 2147483647, %v4121_v60  ;;  %v948_v44 = vand.u32 2139095040, %v4121_v60  ;;  %vm637_vm12 = vcmp.lt.s32.totalorder %v3880_v12, 0  ;;  %v879_v23 = vadd.s32 %v875_v15, %v871_v25 }
 0x120   : > { %v748_v50 = vor.u32 %v747_v19, %v746_v59  ;;  %v751_v20 = vshll.u32 %v750_v47, 23  ;;  %v860_v17 = vadd.s32 %v859_v10, %v850_v52  ;;  %v881_v26 = vadd.s32 %v880_v1, %v870_v53 }
 0x121   : > { %v949_v62 = vshrl.u32 %v948_v44, 23  ;;  %v952_v32 = vand.u32 8388607, %v945_v57  ;;  %v760_v56 = vsel %vm637_vm12, %v759_v16, %v4106_v14  ;;  %v829_v22 = vsel %vm823_vm15, %v826_v41, %v828_v63 }
 0x122   : > { %v752_v31 = vor.u32 4788187, %v751_v20  ;;  %v882_v18 = vadd.s32 %v881_v26, %v872_v6  ;;  %vm4161_vm10 = vcmp.le.f32.partialorder %v635_v39, 0.7853982  ;;  %vm885_vm11 = vc.u32 %v860_v17, %v879_v23 }
 0x123   : > { %v3414_v2 = vadd.s32 4294967169, %v949_v62  ;;  %v755_v30 = vcvt.s32.f32 %v748_v50  ;;  %v1103_v24 = vand.u32 2139095040, %v4131_v33  ;;  %v762_v14 = vsel %vm4161_vm10, 0, %v760_v56 }
 0x124   : > { %v753_v48 = vand.u32 2147483647, %v752_v31  ;;  %v886_v37 = vadd.s32 1, %v882_v18  ;;  %v883_v21 = vmul.u32 %v4095_v4, %v829_v22  ;;  %v953_v41 = vor.u32 8388608, %v952_v32 }
 0x125   : > { %v955_v16 = vadd.s32 1, %v3414_v2  ;;  %v1104_v15 = vshrl.u32 %v1103_v24, 23  ;;  %v779_v9 = vadd.s32 3, %v762_v14  ;;  %v1100_v29 = vand.u32 2147483647, %v4131_v33 }
 0x126   : > { %v756_v13 = vmul.f32 %v755_v30, %v753_v48  ;;  %v887_v25 = vsel %vm885_vm11, %v886_v37, %v882_v18  ;;  %v4169_v40 = vshll.u32 %v953_v41, 8  ;;  %vm792_vm14 = vcmp.lt.s32.totalorder %v3898_v8, 0 }
 0x127   : > { %v888_v39 = vadd.s32 %v887_v25, %v883_v21  ;;  %vm956_vm13 = vcmp.gt.s32.totalorder %v955_v16, 0  ;;  %v3417_v59 = vadd.s32 4294967169, %v1104_v15  ;;  %v4181_v53 = vand.u32 3, %v779_v9 }
 0x128   : > { %v757_v45 = vxor.u32 2147483648, %v756_v13  ;;  %v957_v36 = vsel %vm956_vm13, %v955_v16, 0  ;;  %v4184_v19 = vadd.s32 %v879_v23, %v860_v17  ;;  %v4187_v10 = vand.u32 65535, %v4169_v40 }
 0x129   : > { %v889_v28 = vadd.s32 536870912, %v888_v39  ;;  %v959_v27 = vand.u32 31, %v957_v36  ;;  %v4191_v1 = vand.u32 8388607, %v1100_v29  ;;  %vm4195_vm15 = vcmp.le.f32.partialorder %v790_v7, 0.7853982 }
 0x12a   : > { %v758_v38 = vsel %vm637_vm12, %v757_v45, %v756_v13  ;;  %v4199_v50 = vshrl.u32 %v957_v36, 5  ;;  %v4202_v20 = vshrl.u32 %v4169_v40, 16  ;;  %v4208_v62 = vadd.s32 1, %v3417_v59 }
 0x12b   : > { %v4177_v4 = vsel %vm4161_vm10, %v3880_v12, %v758_v38  ;;  %v890_v3 = vshrl.u32 %v889_v28, 30  ;;  %v960_v43 = vsub.s32 32, %v959_v27  ;;  %v962_v26 = vshll.u32 %v3619_v49, %v959_v27 }
 0x12c   : > { %v763_v52 = vmul.f32 %v4177_v4, %v4177_v4  ;;  %v965_v23 = vshll.u32 %v3620_v51, %v959_v27  ;;  %v968_v30 = vshll.u32 %v3621_v55, %v959_v27  ;;  %v971_v14 = vshll.u32 %v3622_v58, %v959_v27 }
 0x12d   : > { %v891_v47 = vshll.u32 %v890_v3, 30  ;;  %v914_v56 = vsub.s32 4, %v890_v3  ;;  %v963_v7 = vshrl.u32 %v3620_v51, %v960_v43  ;;  %v966_v18 = vshrl.u32 %v3621_v55, %v960_v43 }
 0x12e   : > { %v764_v63 = vmul.f32 -0.001358992, %v763_v52  ;;  %v771_v6 = vmul.f32 -0.00019511016, %v763_v52  ;;  %v972_v35 = vshrl.u32 %v3623_v61, %v960_v43  ;;  %v969_v37 = vshrl.u32 %v3622_v58, %v960_v43 }
 0x12f   : > { %v4204_v17 = vsub.s32 %v888_v39, %v891_v47  ;;  %v974_v21 = vshll.u32 %v3623_v61, %v959_v27  ;;  %v975_v41 = vshrl.u32 %v3624_v0, %v960_v43  ;;  %v915_v39 = vsel %vm792_vm14, %v914_v56, %v890_v3 }
 0x130   : > { %v765_v32 = vadd.f32 0.041655596, %v764_v63  ;;  %v772_v31 = vadd.f32 0.008332121, %v771_v6  ;;  %vm782_vm1 = vcmp.eq.s32.totalorder %v4181_v53, 0  ;;  %vm785_vm2 = vcmp.eq.s32.totalorder %v4181_v53, 2 }
 0x131   : > { %vm893_vm0 = vcmp.lt.s32.totalorder %v4204_v17, 0  ;;  %v894_v22 = vsub.s32 0, %v4204_v17  ;;  %v964_v15 = vor.u32 %v963_v7, %v962_v26  ;;  %v4225_v45 = vor.u32 %v966_v18, %v965_v23 }
 0x132   : > { %v766_v2 = vmul.f32 %v765_v32, %v763_v52  ;;  %v773_v48 = vmul.f32 %v772_v31, %v763_v52  ;;  %v973_v9 = vor.u32 %v972_v35, %v971_v14  ;;  %v976_v36 = vor.u32 %v975_v41, %v974_v21 }
 0x133   : > { %v895_v24 = vsel %vm893_vm0, %v894_v22, %v4204_v17  ;;  %vm781_vm3 = vcmp.lt.s32.totalorder %v4181_v53, 2  ;;  %v970_v59 = vor.u32 %v969_v37, %v968_v30  ;;  %vm778_vm4 = vweird.f32 %v3880_v12 }
 0x134   : > { %v767_v16 = vadd.f32 -0.4999988, %v766_v2  ;;  %v774_v13 = vadd.f32 -0.16666654, %v773_v48  ;;  %v896_v25 = vclz %v895_v24  ;;  %v917_v3 = vsel %vm4195_vm15, 0, %v915_v39 }
 0x135   : > { %v961_v47 = vshrl.u32 %v3619_v49, %v960_v43  ;;  %vm977_vm5 = vcmp.lt.s32.totalorder %v4199_v50, 1  ;;  %vm979_vm6 = vcmp.lt.s32.totalorder %v4199_v50, 3  ;;  %vm980_vm8 = vcmp.lt.s32.totalorder %v4199_v50, 4 }
 0x136   : > { %v768_v28 = vmul.f32 %v767_v16, %v763_v52  ;;  %v775_v38 = vmul.f32 %v774_v13, %v763_v52  ;;  %v3412_v27 = vadd.s32 4294967294, %v896_v25  ;;  %v985_v26 = vsel %vm977_vm5, %v964_v15, %v4225_v45 }
 0x137   : > { %v986_v23 = vsel %vm980_vm8, %v973_v9, 920167782  ;;  %v990_v43 = vsel %vm980_vm8, %v976_v36, 1326507024  ;;  %v989_v7 = vsel %vm977_vm5, %v4225_v45, %v970_v59  ;;  %vm978_vm9 = vcmp.lt.s32.totalorder %v4199_v50, 2 }
 0x138   : > { %v769_v63 = vadd.f32 1.0, %v768_v28  ;;  %v776_v6 = vadd.f32 1.0, %v775_v38  ;;  %vm3413_vm7 = vcmp.lt.s32.totalorder %v3412_v27, 0  ;;  %v987_v18 = vsel %vm979_vm6, %v970_v59, %v986_v23 }
 0x139   : > { %v899_v52 = vsel %vm3413_vm7, 0, %v3412_v27  ;;  %v991_v35 = vsel %vm979_vm6, %v973_v9, %v990_v43  ;;  %v988_v30 = vsel %vm978_vm9, %v985_v26, %v987_v18  ;;  %v934_v28 = vadd.s32 3, %v917_v3 }
 0x13a   : > { %v777_v32 = vmul.f32 %v776_v6, %v4177_v4  ;;  %v786_v31 = vxor.u32 2147483648, %v769_v63  ;;  %v900_v56 = vsub.s32 32, %v899_v52  ;;  %v904_v22 = vsub.s32 4294967266, %v899_v52 }
 0x13b   : > { %v901_v48 = vshll.u32 %v4204_v17, %v899_v52  ;;  %v992_v24 = vsel %vm978_vm9, %v989_v7, %v991_v35  ;;  %v1018_v14 = vand.u32 65535, %v988_v30  ;;  %v1019_v21 = vshrl.u32 %v988_v30, 16 }
 0x13c   : > { %v783_v2 = vxor.u32 2147483648, %v777_v32  ;;  %v902_v4 = vshrl.u32 %v4184_v19, %v900_v56  ;;  %v905_v37 = vadd.s32 127, %v904_v22  ;;  %v787_v16 = vsel %vm785_vm2, %v786_v31, %v777_v32 }
 0x13d   : > { %v996_v13 = vand.u32 65535, %v992_v24  ;;  %v997_v17 = vshrl.u32 %v992_v24, 16  ;;  %v1021_v9 = vmul.u32 %v1019_v21, %v4187_v10  ;;  %v981_v38 = vsel %vm977_vm5, %v961_v47, %v964_v15 }
 0x13e   : > { %v784_v41 = vsel %vm782_vm1, %v769_v63, %v783_v2  ;;  %v903_v25 = vor.u32 %v902_v4, %v901_v48  ;;  %v906_v39 = vshll.u32 %v905_v37, 23  ;;  %v982_v6 = vsel %vm980_vm8, %v970_v59, 2102212464 }
 0x13f   : > { %v788_v19 = vsel %vm781_vm3, %v784_v41, %v787_v16  ;;  %v999_v27 = vmul.u32 %v997_v17, %v4187_v10  ;;  %v1000_v53 = vmul.u32 %v996_v13, %v4202_v20  ;;  %v1022_v52 = vmul.u32 %v1018_v14, %v4202_v20 }
 0x140   : > { %v789_v36 = vsel %vm778_vm4, nan, %v788_v19  ;;  %v907_v63 = vor.u32 4788187, %v906_v39  ;;  %v998_v26 = vmul.u32 %v996_v13, %v4187_v10  ;;  %v1020_v12 = vmul.u32 %v1018_v14, %v4187_v10  ;;  %v291_v14 = vpop.f32.mrf.mxu1 }
 0x141   : > { %3272 = vst [vmem:[%s4036_s18 + $0x10] sm:$0xff] %v789_v36  ;;  %v1002_v23 = vshll.u32 %v999_v27, 16  ;;  %v1024_v3 = vshll.u32 %v1021_v9, 16  ;;  %v910_v32 = vcvt.s32.f32 %v903_v25  ;;  %v1001_v15 = vmul.u32 %v997_v17, %v4202_v20 }
 0x142   : > { %v908_v43 = vand.u32 2147483647, %v907_v63  ;;  %v1023_v47 = vmul.u32 %v1019_v21, %v4202_v20  ;;  %v1004_v31 = vshll.u32 %v1000_v53, 16  ;;  %v1026_v56 = vshll.u32 %v1022_v52, 16 }
 0x143   : > { %vm1006_vm12 = vc.u32 %v998_v26, %v1002_v23  ;;  %v1008_v59 = vadd.s32 %v1002_v23, %v998_v26  ;;  %vm1028_vm10 = vc.u32 %v1020_v12, %v1024_v3  ;;  %v1030_v18 = vadd.s32 %v1024_v3, %v1020_v12 }
 0x144   : > { %v911_v7 = vmul.f32 %v910_v32, %v908_v43  ;;  %v1007_v22 = vsel %vm1006_vm12, 1, %v3625_v54  ;;  %v983_v10 = vsel %vm979_vm6, %v4225_v45, %v982_v6  ;;  %v1029_v2 = vsel %vm1028_vm10, 1, %v3625_v54 }
 0x145   : > { %v1009_v35 = vadd.s32 %v1007_v22, %v1001_v15  ;;  %vm1010_vm11 = vc.u32 %v1008_v59, %v1004_v31  ;;  %v1031_v4 = vadd.s32 %v1029_v2, %v1023_v47  ;;  %vm1032_vm13 = vc.u32 %v1030_v18, %v1026_v56 }
 0x146   : > { %v912_v48 = vxor.u32 2147483648, %v911_v7  ;;  %v1011_v20 = vsel %vm1010_vm11, 1, %v3625_v54  ;;  %v1003_v30 = vshrl.u32 %v999_v27, 16  ;;  %v1033_v24 = vsel %vm1032_vm13, 1, %v3625_v54 }
 0x147   : > { %v1013_v37 = vadd.s32 %v1011_v20, %v1009_v35  ;;  %vm1111_vm0 = vcmp.gt.s32.totalorder %v4208_v62, 0  ;;  %v1025_v45 = vshrl.u32 %v1021_v9, 16  ;;  %v1035_v41 = vadd.s32 %v1033_v24, %v1031_v4 }
 0x148   : > { %v913_v21 = vsel %vm792_vm14, %v912_v48, %v911_v7  ;;  %v1112_v16 = vsel %vm1111_vm0, %v4208_v62, 0  ;;  %v1005_v17 = vshrl.u32 %v1000_v53, 16  ;;  %v984_v36 = vsel %vm978_vm9, %v981_v38, %v983_v10  ;;  %v4301_v62 = vld [vmem:[%s5978_s2] ss:$0 sm:$0xff] }
 0x149   : > { %v4292_v13 = vsel %vm4195_vm15, %v3898_v8, %v913_v21  ;;  %v1014_v19 = vadd.s32 %v1013_v37, %v1003_v30  ;;  %v1114_v25 = vand.u32 31, %v1112_v16  ;;  %v1027_v27 = vshrl.u32 %v1022_v52, 16 }
 0x14a   : > { %v918_v39 = vmul.f32 %v4292_v13, %v4292_v13  ;;  %v1036_v63 = vadd.s32 %v1035_v41, %v1025_v45  ;;  %v4304_v44 = vadd.f32 %v4301_v62, %v291_v14  ;;  %v4308_v6 = vadd.s32 %v1030_v18, %v1026_v56 }
 0x14b   : > { %v4306_v9 = vadd.s32 %v1014_v19, %v1005_v17  ;;  %v4310_v53 = vsub.s32 32, %v1114_v25  ;;  %v1108_v38 = vor.u32 8388608, %v4191_v1  ;;  %v4313_v52 = vand.u32 3, %v934_v28 }
 0x14c   : > { %v919_v26 = vmul.f32 -0.001358992, %v918_v39  ;;  %v926_v23 = vmul.f32 -0.00019511016, %v918_v39  ;;  %v1037_v50 = vadd.s32 %v1036_v63, %v1027_v27  ;;  %v1038_v12 = vmul.u32 %v4169_v40, %v984_v36 }
 0x14d   : > { %vm1040_vm14 = vc.u32 %v4306_v9, %v4308_v6  ;;  %v4318_v3 = vshrl.u32 %v1112_v16, 5  ;;  %v1118_v47 = vshrl.u32 %v3620_v51, %v4310_v53  ;;  %v1121_v31 = vshrl.u32 %v3621_v55, %v4310_v53 }
 0x14e   : > { %v920_v43 = vadd.f32 0.041655596, %v919_v26  ;;  %v927_v32 = vadd.f32 0.008332121, %v926_v23  ;;  %v1041_v15 = vadd.s32 1, %v1037_v50  ;;  %v1124_v1 = vshrl.u32 %v3622_v58, %v4310_v53 }
 0x14f   : > { %v1126_v28 = vshll.u32 %v3622_v58, %v1114_v25  ;;  %v1127_v40 = vshrl.u32 %v3623_v61, %v4310_v53  ;;  %v1117_v22 = vshll.u32 %v3619_v49, %v1114_v25  ;;  %v1120_v10 = vshll.u32 %v3620_v51, %v1114_v25 }
 0x150   : > { %v921_v59 = vmul.f32 %v920_v43, %v918_v39  ;;  %v928_v56 = vmul.f32 %v927_v32, %v918_v39  ;;  %v1042_v7 = vsel %vm1040_vm14, %v1041_v15, %v1037_v50  ;;  %v1123_v35 = vshll.u32 %v3621_v55, %v1114_v25 }
 0x151   : > { %v1043_v18 = vadd.s32 %v1042_v7, %v1038_v12  ;;  %v1128_v2 = vor.u32 %v1127_v40, %v1126_v28  ;;  %v1129_v4 = vshll.u32 %v3623_v61, %v1114_v25  ;;  %v1130_v30 = vshrl.u32 %v3624_v0, %v4310_v53 }
 0x152   : > { %v922_v48 = vadd.f32 -0.4999988, %v921_v59  ;;  %v929_v20 = vadd.f32 -0.16666654, %v928_v56  ;;  %v4335_v24 = vor.u32 %v1118_v47, %v1117_v22  ;;  %v4337_v14 = vor.u32 %v1121_v31, %v1120_v10 }
 0x153   : > { %v1044_v37 = vadd.s32 536870912, %v1043_v18  ;;  %v4339_v21 = vor.u32 %v1124_v1, %v1123_v35  ;;  %v1131_v16 = vor.u32 %v1130_v30, %v1129_v4  ;;  %vm1135_vm15 = vcmp.lt.s32.totalorder %v4318_v3, 4 }
 0x154   : > { %v923_v45 = vmul.f32 %v922_v48, %v918_v39  ;;  %v930_v41 = vmul.f32 %v929_v20, %v918_v39  ;;  %vm933_vm1 = vweird.f32 %v3898_v8  ;;  %vm936_vm2 = vcmp.lt.s32.totalorder %v4313_v52, 2 }
 0x155   : > { %v1045_v17 = vshrl.u32 %v1044_v37, 30  ;;  %v1141_v19 = vsel %vm1135_vm15, %v1128_v2, 920167782  ;;  %v4346_v25 = vshll.u32 %v1108_v38, 8  ;;  %vm1132_vm3 = vcmp.lt.s32.totalorder %v4318_v3, 1 }
 0x156   : > { %v924_v36 = vadd.f32 1.0, %v923_v45  ;;  %v931_v27 = vadd.f32 1.0, %v930_v41  ;;  %vm1134_vm4 = vcmp.lt.s32.totalorder %v4318_v3, 3  ;;  %vm937_vm5 = vcmp.eq.s32.totalorder %v4313_v52, 0 }
 0x157   : > { %v1046_v39 = vshll.u32 %v1045_v17, 30  ;;  %v1140_v63 = vsel %vm1132_vm3, %v4335_v24, %v4337_v14  ;;  %v1142_v26 = vsel %vm1134_vm4, %v4339_v21, %v1141_v19  ;;  %v1144_v38 = vsel %vm1132_vm3, %v4337_v14, %v4339_v21 }
 0x158   : > { %v932_v23 = vmul.f32 %v931_v27, %v4292_v13  ;;  %v941_v50 = vxor.u32 2147483648, %v924_v36  ;;  %v1145_v12 = vsel %vm1135_vm15, %v1131_v16, 1326507024  ;;  %vm940_vm6 = vcmp.eq.s32.totalorder %v4313_v52, 2 }
 0x159   : > { %v1047_v43 = vsub.s32 %v1043_v18, %v1046_v39  ;;  %vm1133_vm7 = vcmp.lt.s32.totalorder %v4318_v3, 2  ;;  %v1146_v32 = vsel %vm1134_vm4, %v1128_v2, %v1145_v12  ;;  %v1149_v31 = vand.u32 65535, %v4346_v25 }
 0x15a   : > { %v938_v15 = vxor.u32 2147483648, %v932_v23  ;;  %v1143_v13 = vsel %vm1133_vm7, %v1140_v63, %v1142_v26  ;;  %v1147_v47 = vsel %vm1133_vm7, %v1144_v38, %v1146_v32  ;;  %v1150_v28 = vshrl.u32 %v4346_v25, 16 }
 0x15b   : > { %vm1048_vm8 = vcmp.lt.s32.totalorder %v1047_v43, 0  ;;  %v1049_v1 = vsub.s32 0, %v1047_v43  ;;  %v1151_v40 = vand.u32 65535, %v1147_v47  ;;  %v942_v56 = vsel %vm940_vm6, %v941_v50, %v932_v23 }
 0x15c   : > { %v939_v59 = vsel %vm937_vm5, %v924_v36, %v938_v15  ;;  %v1069_v7 = vsub.s32 4, %v1045_v17  ;;  %v1152_v22 = vshrl.u32 %v1147_v47, 16  ;;  %v1173_v35 = vand.u32 65535, %v1143_v13 }
 0x15d   : > { %v943_v18 = vsel %vm936_vm2, %v939_v59, %v942_v56  ;;  %v1050_v10 = vsel %vm1048_vm8, %v1049_v1, %v1047_v43  ;;  %v1174_v2 = vshrl.u32 %v1143_v13, 16  ;;  %v1155_v30 = vmul.u32 %v1151_v40, %v1150_v28 }
 0x15e   : > { %v944_v48 = vsel %vm933_vm1, nan, %v943_v18  ;;  %v1051_v20 = vclz %v1050_v10  ;;  %v1154_v4 = vmul.u32 %v1152_v22, %v1149_v31  ;;  %vm947_vm9 = vcmp.lt.s32.totalorder %v4121_v60, 0 }
 0x15f   : > { %v1255_v37 = vand.u32 2147483647, %v4304_v44  ;;  %v1258_v45 = vand.u32 2139095040, %v4304_v44  ;;  %3273 = vst [vmem:[%s4036_s18 + $0x18] sm:$0xff] %v944_v48  ;;  %vm4387_vm12 = vcmp.le.f32.partialorder %v945_v57, 0.7853982  ;;  %v1039_v8 = vadd.s32 %v4308_v6, %v4306_v9 }
 0x160   : > { %v3415_v41 = vadd.s32 4294967294, %v1051_v20  ;;  %v1153_v16 = vmul.u32 %v1151_v40, %v1149_v31  ;;  %v1157_v19 = vshll.u32 %v1154_v4, 16  ;;  %v1070_v36 = vsel %vm947_vm9, %v1069_v7, %v1045_v17 }
 0x161   : > { %v1156_v27 = vmul.u32 %v1152_v22, %v1150_v28  ;;  %v1175_v39 = vmul.u32 %v1173_v35, %v1149_v31  ;;  %v1176_v63 = vmul.u32 %v1174_v2, %v1149_v31  ;;  %v1159_v26 = vshll.u32 %v1155_v30, 16 }
 0x162   : > { %vm3416_vm10 = vcmp.lt.s32.totalorder %v3415_v41, 0  ;;  %vm1161_vm11 = vc.u32 %v1153_v16, %v1157_v19  ;;  %v1163_v23 = vadd.s32 %v1157_v19, %v1153_v16  ;;  %v1177_v38 = vmul.u32 %v1173_v35, %v1150_v28 }
 0x163   : > { %v1054_v57 = vsel %vm3416_vm10, 0, %v3415_v41  ;;  %v1162_v50 = vsel %vm1161_vm11, 1, %v3625_v54  ;;  %v1179_v12 = vshll.u32 %v1176_v63, 16  ;;  %v1158_v6 = vshrl.u32 %v1154_v4, 16 }
 0x164   : > { %v1055_v32 = vsub.s32 32, %v1054_v57  ;;  %v1059_v9 = vsub.s32 4294967266, %v1054_v57  ;;  %v1164_v15 = vadd.s32 %v1162_v50, %v1156_v27  ;;  %v1056_v13 = vshll.u32 %v1047_v43, %v1054_v57 }
 0x165   : > { %vm1165_vm13 = vc.u32 %v1163_v23, %v1159_v26  ;;  %v1178_v47 = vmul.u32 %v1174_v2, %v1150_v28  ;;  %vm1183_vm0 = vc.u32 %v1175_v39, %v1179_v12  ;;  %v1181_v56 = vshll.u32 %v1177_v38, 16 }
 0x166   : > { %v1057_v17 = vshrl.u32 %v1039_v8, %v1055_v32  ;;  %v1060_v1 = vadd.s32 127, %v1059_v9  ;;  %v1166_v31 = vsel %vm1165_vm13, 1, %v3625_v54  ;;  %v1184_v40 = vsel %vm1183_vm0, 1, %v3625_v54 }
 0x167   : > { %v1168_v59 = vadd.s32 %v1166_v31, %v1164_v15  ;;  %v1185_v7 = vadd.s32 %v1179_v12, %v1175_v39  ;;  %v1186_v22 = vadd.s32 %v1184_v40, %v1178_v47  ;;  %v1137_v35 = vsel %vm1135_vm15, %v4339_v21, 2102212464 }
 0x168   : > { %v1058_v18 = vor.u32 %v1057_v17, %v1056_v13  ;;  %v1061_v10 = vshll.u32 %v1060_v1, 23  ;;  %v1259_v43 = vshrl.u32 %v1258_v45, 23  ;;  %v1072_v28 = vsel %vm4387_vm12, 0, %v1070_v36  ;;  %v293_v36 = vpop.f32.mrf.mxu1 }
 0x169   : > { %v1116_v2 = vshrl.u32 %v3619_v49, %v4310_v53  ;;  %v1169_v48 = vadd.s32 %v1168_v59, %v1158_v6  ;;  %vm1187_vm14 = vc.u32 %v1185_v7, %v1181_v56  ;;  %v1160_v4 = vshrl.u32 %v1155_v30, 16 }
 0x16a   : > { %v1062_v20 = vor.u32 4788187, %v1061_v10  ;;  %v1188_v8 = vsel %vm1187_vm14, 1, %v3625_v54  ;;  %v3420_v41 = vadd.s32 4294967169, %v1259_v43  ;;  %v1138_v21 = vsel %vm1134_vm4, %v4337_v14, %v1137_v35 }
 0x16b   : > { %v1136_v16 = vsel %vm1132_vm3, %v1116_v2, %v4335_v24  ;;  %v1180_v45 = vshrl.u32 %v1176_v63, 16  ;;  %v1190_v19 = vadd.s32 %v1188_v8, %v1186_v22  ;;  %v1065_v53 = vcvt.s32.f32 %v1058_v18 }
 0x16c   : > { %v1063_v27 = vand.u32 2147483647, %v1062_v20  ;;  %v1170_v39 = vadd.s32 %v1169_v48, %v1160_v4  ;;  %v1265_v26 = vadd.s32 1, %v3420_v41  ;;  %v1089_v23 = vadd.s32 3, %v1072_v28 }
 0x16d   : > { %v1182_v30 = vshrl.u32 %v1177_v38, 16  ;;  %v1191_v57 = vadd.s32 %v1190_v19, %v1180_v45  ;;  %v1189_v12 = vadd.s32 %v1185_v7, %v1181_v56  ;;  %v1262_v32 = vand.u32 8388607, %v1255_v37 }
 0x16e   : > { %v1066_v50 = vmul.f32 %v1065_v53, %v1063_v27  ;;  %vm1266_vm15 = vcmp.gt.s32.totalorder %v1265_v26, 0  ;;  %v4415_v24 = vadd.f32 %v4301_v62, %v293_v36  ;;  %v1139_v14 = vsel %vm1133_vm7, %v1136_v16, %v1138_v21 }
 0x16f   : > { %v1192_v63 = vadd.s32 %v1191_v57, %v1182_v30  ;;  %v1267_v9 = vsel %vm1266_vm15, %v1265_v26, 0  ;;  %vm1195_vm1 = vc.u32 %v1170_v39, %v1189_v12  ;;  %v4419_v13 = vand.u32 3, %v1089_v23 }
 0x170   : > { %v1067_v6 = vxor.u32 2147483648, %v1066_v50  ;;  %v1269_v15 = vand.u32 31, %v1267_v9  ;;  %v1193_v17 = vmul.u32 %v4346_v25, %v1139_v14  ;;  %v1263_v1 = vor.u32 8388608, %v1262_v32 }
 0x171   : > { %v1196_v38 = vadd.s32 1, %v1192_v63  ;;  %v1410_v59 = vand.u32 2147483647, %v4415_v24  ;;  %v1413_v56 = vand.u32 2139095040, %v4415_v24  ;;  %v4435_v18 = vshrl.u32 %v1267_v9, 5 }
 0x172   : > { %v1068_v47 = vsel %vm947_vm9, %v1067_v6, %v1066_v50  ;;  %v4424_v31 = vsub.s32 32, %v1269_v15  ;;  %v1281_v25 = vshll.u32 %v3622_v58, %v1269_v15  ;;  %v1272_v20 = vshll.u32 %v3619_v49, %v1269_v15 }
 0x173   : > { %v4429_v3 = vsel %vm4387_vm12, %v4121_v60, %v1068_v47  ;;  %v1197_v40 = vsel %vm1195_vm1, %v1196_v38, %v1192_v63  ;;  %v1275_v4 = vshll.u32 %v3620_v51, %v1269_v15  ;;  %v1278_v8 = vshll.u32 %v3621_v55, %v1269_v15 }
 0x174   : > { %v1073_v7 = vmul.f32 %v4429_v3, %v4429_v3  ;;  %v1198_v22 = vadd.s32 %v1197_v40, %v1193_v17  ;;  %v1273_v10 = vshrl.u32 %v3620_v51, %v4424_v31  ;;  %v1276_v52 = vshrl.u32 %v3621_v55, %v4424_v31 }
 0x175   : > { %v1279_v35 = vshrl.u32 %v3622_v58, %v4424_v31  ;;  %v1282_v43 = vshrl.u32 %v3623_v61, %v4424_v31  ;;  %v1285_v16 = vshrl.u32 %v3624_v0, %v4424_v31  ;;  %v4451_v19 = vadd.s32 %v1189_v12, %v1170_v39 }
 0x176   : > { %v1074_v28 = vmul.f32 -0.001358992, %v1073_v7  ;;  %v1081_v2 = vmul.f32 -0.00019511016, %v1073_v7  ;;  %v1199_v48 = vadd.s32 536870912, %v1198_v22  ;;  %v4453_v27 = vor.u32 %v1273_v10, %v1272_v20 }
 0x177   : > { %v1283_v41 = vor.u32 %v1282_v43, %v1281_v25  ;;  %v4455_v53 = vor.u32 %v1276_v52, %v1275_v4  ;;  %v1280_v26 = vor.u32 %v1279_v35, %v1278_v8  ;;  %v1284_v23 = vshll.u32 %v3623_v61, %v1269_v15 }
 0x178   : > { %v1075_v21 = vadd.f32 0.041655596, %v1074_v28  ;;  %v1082_v45 = vadd.f32 0.008332121, %v1081_v2  ;;  %v1200_v36 = vshrl.u32 %v1199_v48, 30  ;;  %vm1290_vm2 = vcmp.lt.s32.totalorder %v4435_v18, 4 }
 0x179   : > { %vm1102_vm3 = vcmp.lt.s32.totalorder %v4131_v33, 0  ;;  %v1286_v32 = vor.u32 %v1285_v16, %v1284_v23  ;;  %vm1287_vm4 = vcmp.lt.s32.totalorder %v4435_v18, 1  ;;  %v1296_v39 = vsel %vm1290_vm2, %v1283_v41, 920167782 }
 0x17a   : > { %v1076_v30 = vmul.f32 %v1075_v21, %v1073_v7  ;;  %v1083_v57 = vmul.f32 %v1082_v45, %v1073_v7  ;;  %v1201_v50 = vshll.u32 %v1200_v36, 30  ;;  %v4463_v12 = vshll.u32 %v1263_v1, 8 }
 0x17b   : > { %vm1095_vm5 = vcmp.eq.s32.totalorder %v4419_v13, 2  ;;  %vm1289_vm6 = vcmp.lt.s32.totalorder %v4435_v18, 3  ;;  %vm1092_vm7 = vcmp.eq.s32.totalorder %v4419_v13, 0  ;;  %v1295_v6 = vsel %vm1287_vm4, %v4453_v27, %v4455_v53 }
 0x17c   : > { %v1077_v14 = vadd.f32 -0.4999988, %v1076_v30  ;;  %v1084_v63 = vadd.f32 -0.16666654, %v1083_v57  ;;  %v4466_v9 = vsub.s32 %v1198_v22, %v1201_v50  ;;  %v1297_v15 = vsel %vm1289_vm6, %v1280_v26, %v1296_v39 }
 0x17d   : > { %v1299_v38 = vsel %vm1287_vm4, %v4455_v53, %v1280_v26  ;;  %v1414_v47 = vshrl.u32 %v1413_v56, 23  ;;  %vm1091_vm8 = vcmp.lt.s32.totalorder %v4419_v13, 2  ;;  %vm1088_vm12 = vweird.f32 %v4121_v60 }
 0x17e   : > { %v1078_v17 = vmul.f32 %v1077_v14, %v1073_v7  ;;  %v1085_v1 = vmul.f32 %v1084_v63, %v1073_v7  ;;  %vm1203_vm9 = vcmp.lt.s32.totalorder %v4466_v9, 0  ;;  %v1204_v40 = vsub.s32 0, %v4466_v9 }
 0x17f   : > { %v1224_v22 = vsub.s32 4, %v1200_v36  ;;  %vm1288_vm10 = vcmp.lt.s32.totalorder %v4435_v18, 2  ;;  %v1300_v25 = vsel %vm1290_vm2, %v1286_v32, 1326507024  ;;  %v1304_v10 = vand.u32 65535, %v4463_v12 }
 0x180   : > { %v1079_v52 = vadd.f32 1.0, %v1078_v17  ;;  %v1086_v56 = vadd.f32 1.0, %v1085_v1  ;;  %v1205_v7 = vsel %vm1203_vm9, %v1204_v40, %v4466_v9  ;;  %v1301_v35 = vsel %vm1289_vm6, %v1283_v41, %v1300_v25 }
 0x181   : > { %v1206_v43 = vclz %v1205_v7  ;;  %v1298_v28 = vsel %vm1288_vm10, %v1295_v6, %v1297_v15  ;;  %v1302_v2 = vsel %vm1288_vm10, %v1299_v38, %v1301_v35  ;;  %v1305_v48 = vshrl.u32 %v4463_v12, 16 }
 0x182   : > { %v1087_v20 = vmul.f32 %v1086_v56, %v4429_v3  ;;  %v1096_v4 = vxor.u32 2147483648, %v1079_v52  ;;  %vm4498_vm11 = vcmp.le.f32.partialorder %v1100_v29, 0.7853982  ;;  %v1306_v16 = vand.u32 65535, %v1302_v2 }
 0x183   : > { %v1307_v41 = vshrl.u32 %v1302_v2, 16  ;;  %v3418_v21 = vadd.s32 4294967294, %v1206_v43  ;;  %v1271_v45 = vshrl.u32 %v3619_v49, %v4424_v31  ;;  %v1292_v23 = vsel %vm1290_vm2, %v1280_v26, 2102212464 }
 0x184   : > { %v3423_v30 = vadd.s32 4294967169, %v1414_v47  ;;  %v1093_v57 = vxor.u32 2147483648, %v1087_v20  ;;  %v1225_v3 = vsel %vm1102_vm3, %v1224_v22, %v1200_v36  ;;  %v1328_v32 = vand.u32 65535, %v1298_v28 }
 0x185   : > { %v1309_v50 = vmul.u32 %v1307_v41, %v1304_v10  ;;  %v1097_v29 = vsel %vm1095_vm5, %v1096_v4, %v1087_v20  ;;  %vm3419_vm13 = vcmp.lt.s32.totalorder %v3418_v21, 0  ;;  %v1308_v39 = vmul.u32 %v1306_v16, %v1304_v10 }
 0x186   : > { %v1310_v14 = vmul.u32 %v1306_v16, %v1305_v48  ;;  %v1094_v63 = vsel %vm1092_vm7, %v1079_v52, %v1093_v57  ;;  %v1209_v31 = vsel %vm3419_vm13, 0, %v3418_v21  ;;  %v1329_v26 = vshrl.u32 %v1298_v28, 16 }
 0x187   : > { %v1312_v6 = vshll.u32 %v1309_v50, 16  ;;  %v1098_v15 = vsel %vm1091_vm8, %v1094_v63, %v1097_v29  ;;  %v1210_v38 = vsub.s32 32, %v1209_v31  ;;  %v1214_v36 = vsub.s32 4294967266, %v1209_v31 }
 0x188   : > { %v1311_v47 = vmul.u32 %v1307_v41, %v1305_v48  ;;  %v1099_v17 = vsel %vm1088_vm12, nan, %v1098_v15  ;;  %v1211_v1 = vshll.u32 %v4466_v9, %v1209_v31  ;;  %v1314_v40 = vshll.u32 %v1310_v14, 16 }
 0x189   : > { %vm1316_vm0 = vc.u32 %v1308_v39, %v1312_v6  ;;  %v1212_v22 = vshrl.u32 %v4451_v19, %v1210_v38  ;;  %v1215_v25 = vadd.s32 127, %v1214_v36  ;;  %v1318_v56 = vadd.s32 %v1312_v6, %v1308_v39  ;;  %3274 = vst [vmem:[%s4036_s18 + $0x20] sm:$0xff] %v1099_v17 }
 0x18a   : > { %v1317_v52 = vsel %vm1316_vm0, 1, %v3625_v54  ;;  %v1291_v13 = vsel %vm1287_vm4, %v1271_v45, %v4453_v27  ;;  %v1331_v35 = vmul.u32 %v1329_v26, %v1304_v10  ;;  %v1332_v43 = vmul.u32 %v1328_v32, %v1305_v48 }
 0x18b   : > { %v1319_v7 = vadd.s32 %v1317_v52, %v1311_v47  ;;  %v1213_v60 = vor.u32 %v1212_v22, %v1211_v1  ;;  %v1216_v28 = vshll.u32 %v1215_v25, 23  ;;  %v1227_v9 = vsel %vm4498_vm11, 0, %v1225_v3 }
 0x18c   : > { %vm1320_vm14 = vc.u32 %v1318_v56, %v1314_v40  ;;  %v1293_v19 = vsel %vm1289_vm6, %v4455_v53, %v1292_v23  ;;  %v1330_v20 = vmul.u32 %v1328_v32, %v1304_v10  ;;  %v1334_v4 = vshll.u32 %v1331_v35, 16 }
 0x18d   : > { %v1321_v2 = vsel %vm1320_vm14, 1, %v3625_v54  ;;  %v1217_v16 = vor.u32 4788187, %v1216_v28  ;;  %v1313_v41 = vshrl.u32 %v1309_v50, 16  ;;  %v1333_v21 = vmul.u32 %v1329_v26, %v1305_v48 }
 0x18e   : > { %v1323_v27 = vadd.s32 %v1321_v2, %v1319_v7  ;;  %v1220_v45 = vcvt.s32.f32 %v1213_v60  ;;  %v1336_v57 = vshll.u32 %v1332_v43, 16  ;;  %vm1338_vm15 = vc.u32 %v1330_v20, %v1334_v4 }
 0x18f   : > { %v1340_v29 = vadd.s32 %v1334_v4, %v1330_v20  ;;  %v1218_v39 = vand.u32 2147483647, %v1217_v16  ;;  %v1339_v3 = vsel %vm1338_vm15, 1, %v3625_v54  ;;  %v1420_v31 = vadd.s32 1, %v3423_v30 }
 0x190   : > { %v1324_v63 = vadd.s32 %v1323_v27, %v1313_v41  ;;  %v1244_v6 = vadd.s32 3, %v1227_v9  ;;  %v1341_v15 = vadd.s32 %v1339_v3, %v1333_v21  ;;  %v4532_v53 = vand.u32 8388607, %v1410_v59 }
 0x191   : > { %vm1342_vm1 = vc.u32 %v1340_v29, %v1336_v57  ;;  %v1221_v10 = vmul.f32 %v1220_v45, %v1218_v39  ;;  %v1315_v23 = vshrl.u32 %v1310_v14, 16  ;;  %vm1421_vm2 = vcmp.gt.s32.totalorder %v1420_v31, 0 }
 0x192   : > { %v1343_v48 = vsel %vm1342_vm1, 1, %v3625_v54  ;;  %v1294_v50 = vsel %vm1288_vm10, %v1291_v13, %v1293_v19  ;;  %v1335_v32 = vshrl.u32 %v1331_v35, 16  ;;  %v1422_v38 = vsel %vm1421_vm2, %v1420_v31, 0 }
 0x193   : > { %v1345_v26 = vadd.s32 %v1343_v48, %v1341_v15  ;;  %v1222_v36 = vxor.u32 2147483648, %v1221_v10  ;;  %v4537_v30 = vadd.s32 %v1324_v63, %v1315_v23  ;;  %v1337_v47 = vshrl.u32 %v1332_v43, 16 }
 0x194   : > { %v1424_v1 = vand.u32 31, %v1422_v38  ;;  %v4541_v22 = vand.u32 3, %v1244_v6  ;;  %v4543_v14 = vadd.s32 %v1340_v29, %v1336_v57  ;;  %v1348_v25 = vmul.u32 %v4463_v12, %v1294_v50  ;;  %v296_v6 = vpop.f32.mrf.mxu1 }
 0x195   : > { %v1346_v17 = vadd.s32 %v1345_v26, %v1335_v32  ;;  %v1223_v40 = vsel %vm1102_vm3, %v1222_v36, %v1221_v10  ;;  %v1418_v56 = vor.u32 8388608, %v4532_v53  ;;  %v4554_v35 = vshrl.u32 %v1422_v38, 5 }
 0x196   : > { %v1226_v18 = vsel %vm4498_vm11, %v4131_v33, %v1223_v40  ;;  %v4550_v13 = vsub.s32 32, %v1424_v1  ;;  %vm1350_vm4 = vc.u32 %v4537_v30, %v4543_v14  ;;  %v1427_v43 = vshll.u32 %v3619_v49, %v1424_v1 }
 0x197   : > { %v1347_v52 = vadd.s32 %v1346_v17, %v1337_v47  ;;  %v1228_v7 = vmul.f32 %v1226_v18, %v1226_v18  ;;  %v1430_v8 = vshll.u32 %v3620_v51, %v1424_v1  ;;  %v1433_v41 = vshll.u32 %v3621_v55, %v1424_v1 }
 0x198   : > { %v1428_v12 = vshrl.u32 %v3620_v51, %v4550_v13  ;;  %v1431_v28 = vshrl.u32 %v3621_v55, %v4550_v13  ;;  %v1434_v2 = vshrl.u32 %v3622_v58, %v4550_v13  ;;  %v1437_v20 = vshrl.u32 %v3623_v61, %v4550_v13 }
 0x199   : > { %v1351_v60 = vadd.s32 1, %v1347_v52  ;;  %v1229_v9 = vmul.f32 -0.001358992, %v1228_v7  ;;  %v1236_v19 = vmul.f32 -0.00019511016, %v1228_v7  ;;  %v1436_v27 = vshll.u32 %v3622_v58, %v1424_v1 }
 0x19a   : > { %v4566_v16 = vor.u32 %v1428_v12, %v1427_v43  ;;  %v4570_v29 = vor.u32 %v1431_v28, %v1430_v8  ;;  %v1435_v39 = vor.u32 %v1434_v2, %v1433_v41  ;;  %v1439_v3 = vshll.u32 %v3623_v61, %v1424_v1 }
 0x19b   : > { %v1352_v4 = vsel %vm1350_vm4, %v1351_v60, %v1347_v52  ;;  %v1230_v21 = vadd.f32 0.041655596, %v1229_v9  ;;  %v1237_v45 = vadd.f32 0.008332121, %v1236_v19  ;;  %v1438_v63 = vor.u32 %v1437_v20, %v1436_v27 }
 0x19c   : > { %v1353_v57 = vadd.s32 %v1352_v4, %v1348_v25  ;;  %v1440_v31 = vshrl.u32 %v3624_v0, %v4550_v13  ;;  %vm1445_vm3 = vcmp.lt.s32.totalorder %v4554_v35, 4  ;;  %vm1442_vm5 = vcmp.lt.s32.totalorder %v4554_v35, 1 }
 0x19d   : > { %v1231_v15 = vmul.f32 %v1230_v21, %v1228_v7  ;;  %v1238_v53 = vmul.f32 %v1237_v45, %v1228_v7  ;;  %vm1444_vm6 = vcmp.lt.s32.totalorder %v4554_v35, 3  ;;  %v1451_v48 = vsel %vm1445_vm3, %v1438_v63, 920167782 }
 0x19e   : > { %v1354_v10 = vadd.s32 536870912, %v1353_v57  ;;  %v1441_v23 = vor.u32 %v1440_v31, %v1439_v3  ;;  %v1450_v38 = vsel %vm1442_vm5, %v4566_v16, %v4570_v29  ;;  %v4587_v36 = vadd.f32 %v4301_v62, %v296_v6 }
 0x19f   : > { %v1232_v50 = vadd.f32 -0.4999988, %v1231_v15  ;;  %v1239_v32 = vadd.f32 -0.16666654, %v1238_v53  ;;  %vm1443_vm7 = vcmp.lt.s32.totalorder %v4554_v35, 2  ;;  %v1452_v47 = vsel %vm1444_vm6, %v1435_v39, %v1451_v48 }
 0x1a0   : > { %v4580_v26 = vshrl.u32 %v1354_v10, 30  ;;  %v1455_v17 = vsel %vm1445_vm3, %v1441_v23, 1326507024  ;;  %v1454_v52 = vsel %vm1442_vm5, %v4570_v29, %v1435_v39  ;;  %vm1243_vm8 = vweird.f32 %v4131_v33 }
 0x1a1   : > { %v1233_v1 = vmul.f32 %v1232_v50, %v1228_v7  ;;  %v1240_v40 = vmul.f32 %v1239_v32, %v1228_v7  ;;  %v1453_v43 = vsel %vm1443_vm7, %v1450_v38, %v1452_v47  ;;  %v1456_v60 = vsel %vm1444_vm6, %v1438_v63, %v1455_v17 }
 0x1a2   : > { %v1356_v25 = vshll.u32 %v4580_v26, 30  ;;  %v4603_v12 = vshll.u32 %v1418_v56, 8  ;;  %vm1246_vm9 = vcmp.lt.s32.totalorder %v4541_v22, 2  ;;  %vm1247_vm12 = vcmp.eq.s32.totalorder %v4541_v22, 0 }
 0x1a3   : > { %v1234_v8 = vadd.f32 1.0, %v1233_v1  ;;  %v1241_v28 = vadd.f32 1.0, %v1240_v40  ;;  %vm1250_vm10 = vcmp.eq.s32.totalorder %v4541_v22, 2  ;;  %v1457_v9 = vsel %vm1443_vm7, %v1454_v52, %v1456_v60 }
 0x1a4   : > { %v1357_v7 = vsub.s32 %v1353_v57, %v1356_v25  ;;  %v1484_v19 = vshrl.u32 %v1453_v43, 16  ;;  %v1459_v56 = vand.u32 65535, %v4603_v12  ;;  %v1460_v41 = vshrl.u32 %v4603_v12, 16 }
 0x1a5   : > { %v1242_v2 = vmul.f32 %v1241_v28, %v1226_v18  ;;  %v1251_v20 = vxor.u32 2147483648, %v1234_v8  ;;  %v1461_v27 = vand.u32 65535, %v1457_v9  ;;  %v1462_v21 = vshrl.u32 %v1457_v9, 16 }
 0x1a6   : > { %vm1358_vm11 = vcmp.lt.s32.totalorder %v1357_v7, 0  ;;  %v1359_v4 = vsub.s32 0, %v1357_v7  ;;  %v1349_v57 = vadd.s32 %v4543_v14, %v4537_v30  ;;  %v1483_v3 = vand.u32 65535, %v1453_v43 }
 0x1a7   : > { %v1248_v45 = vxor.u32 2147483648, %v1242_v2  ;;  %v1426_v6 = vshrl.u32 %v3619_v49, %v4550_v13  ;;  %v1464_v18 = vmul.u32 %v1462_v21, %v1459_v56  ;;  %v1565_v15 = vand.u32 2147483647, %v4587_v36 }
 0x1a8   : > { %v1360_v63 = vsel %vm1358_vm11, %v1359_v4, %v1357_v7  ;;  %v1252_v10 = vsel %vm1250_vm10, %v1251_v20, %v1242_v2  ;;  %vm1257_vm13 = vcmp.lt.s32.totalorder %v4304_v44, 0  ;;  %v1465_v23 = vmul.u32 %v1461_v27, %v1460_v41 }
 0x1a9   : > { %v1361_v31 = vclz %v1360_v63  ;;  %v1249_v53 = vsel %vm1247_vm12, %v1234_v8, %v1248_v45  ;;  %v1486_v30 = vmul.u32 %v1484_v19, %v1459_v56  ;;  %v1379_v13 = vsub.s32 4, %v4580_v26 }
 0x1aa   : > { %v1253_v14 = vsel %vm1246_vm9, %v1249_v53, %v1252_v10  ;;  %v1447_v50 = vsel %vm1445_vm3, %v1435_v39, 2102212464  ;;  %v1463_v38 = vmul.u32 %v1461_v27, %v1459_v56  ;;  %v1467_v47 = vshll.u32 %v1464_v18, 16 }
 0x1ab   : > { %v3421_v48 = vadd.s32 4294967294, %v1361_v31  ;;  %v1254_v32 = vsel %vm1243_vm8, nan, %v1253_v14  ;;  %v1485_v17 = vmul.u32 %v1483_v3, %v1459_v56  ;;  %v1466_v1 = vmul.u32 %v1462_v21, %v1460_v41 }
 0x1ac   : > { %v1469_v40 = vshll.u32 %v1465_v23, 16  ;;  %v1487_v25 = vmul.u32 %v1483_v3, %v1460_v41  ;;  %3275 = vst [vmem:[%s4036_s18 + $0x28] sm:$0xff] %v1254_v32  ;;  %vm1471_vm14 = vc.u32 %v1463_v38, %v1467_v47  ;;  %v1473_v22 = vadd.s32 %v1467_v47, %v1463_v38 }
 0x1ad   : > { %vm3422_vm0 = vcmp.lt.s32.totalorder %v3421_v48, 0  ;;  %v1489_v43 = vshll.u32 %v1486_v30, 16  ;;  %vm4632_vm15 = vcmp.le.f32.partialorder %v1255_v37, 0.7853982  ;;  %v1468_v8 = vshrl.u32 %v1464_v18, 16 }
 0x1ae   : > { %v1364_v52 = vsel %vm3422_vm0, 0, %v3421_v48  ;;  %v1472_v28 = vsel %vm1471_vm14, 1, %v3625_v54  ;;  %vm1475_vm1 = vc.u32 %v1473_v22, %v1469_v40  ;;  %v1488_v20 = vmul.u32 %v1484_v19, %v1460_v41 }
 0x1af   : > { %v1365_v33 = vsub.s32 32, %v1364_v52  ;;  %v1369_v39 = vsub.s32 4294967266, %v1364_v52  ;;  %v1366_v9 = vshll.u32 %v1357_v7, %v1364_v52  ;;  %v1474_v2 = vadd.s32 %v1472_v28, %v1466_v1 }
 0x1b0   : > { %v1476_v27 = vsel %vm1475_vm1, 1, %v3625_v54  ;;  %v1491_v21 = vshll.u32 %v1487_v25, 16  ;;  %vm1493_vm2 = vc.u32 %v1485_v17, %v1489_v43  ;;  %v1495_v37 = vadd.s32 %v1489_v43, %v1485_v17 }
 0x1b1   : > { %v1367_v4 = vshrl.u32 %v1349_v57, %v1365_v33  ;;  %v1370_v56 = vadd.s32 127, %v1369_v39  ;;  %v1478_v45 = vadd.s32 %v1476_v27, %v1474_v2  ;;  %v1568_v63 = vand.u32 2139095040, %v4587_v36  ;;  %v298_v33 = vpop.f32.mrf.mxu1 }
 0x1b2   : > { %v1380_v18 = vsel %vm1257_vm13, %v1379_v13, %v4580_v26  ;;  %v1494_v7 = vsel %vm1493_vm2, 1, %v3625_v54  ;;  %vm1497_vm4 = vc.u32 %v1495_v37, %v1491_v21  ;;  %v1572_v41 = vand.u32 8388607, %v1565_v15 }
 0x1b3   : > { %v1368_v3 = vor.u32 %v1367_v4, %v1366_v9  ;;  %v1371_v31 = vshll.u32 %v1370_v56, 23  ;;  %v1479_v53 = vadd.s32 %v1478_v45, %v1468_v8  ;;  %v1496_v19 = vadd.s32 %v1494_v7, %v1488_v20 }
 0x1b4   : > { %v1470_v10 = vshrl.u32 %v1465_v23, 16  ;;  %v1498_v14 = vsel %vm1497_vm4, 1, %v3625_v54  ;;  %v1569_v48 = vshrl.u32 %v1568_v63, 23  ;;  %v1446_v32 = vsel %vm1442_vm5, %v1426_v6, %v4566_v16 }
 0x1b5   : > { %v1372_v57 = vor.u32 4788187, %v1371_v31  ;;  %v1448_v26 = vsel %vm1444_vm6, %v4570_v29, %v1447_v50  ;;  %v1490_v13 = vshrl.u32 %v1486_v30, 16  ;;  %v1500_v38 = vadd.s32 %v1498_v14, %v1496_v19 }
 0x1b6   : > { %v1375_v17 = vcvt.s32.f32 %v1368_v3  ;;  %v1480_v1 = vadd.s32 %v1479_v53, %v1470_v10  ;;  %v3426_v40 = vadd.s32 4294967169, %v1569_v48  ;;  %v1382_v23 = vsel %vm4632_vm15, 0, %v1380_v18 }
 0x1b7   : > { %v1373_v47 = vand.u32 2147483647, %v1372_v57  ;;  %v1492_v52 = vshrl.u32 %v1487_v25, 16  ;;  %v1501_v22 = vadd.s32 %v1500_v38, %v1490_v13  ;;  %v1573_v43 = vor.u32 8388608, %v1572_v41 }
 0x1b8   : > { %v1499_v8 = vadd.s32 %v1495_v37, %v1491_v21  ;;  %v1575_v16 = vadd.s32 1, %v3426_v40  ;;  %v1449_v6 = vsel %vm1443_vm7, %v1446_v32, %v1448_v26  ;;  %v1399_v50 = vadd.s32 3, %v1382_v23 }
 0x1b9   : > { %v1376_v39 = vmul.f32 %v1375_v17, %v1373_v47  ;;  %v1502_v29 = vadd.s32 %v1501_v22, %v1492_v52  ;;  %v4657_v28 = vadd.f32 %v4301_v62, %v298_v33  ;;  %v4659_v25 = vshll.u32 %v1573_v43, 8 }
 0x1ba   : > { %vm1505_vm3 = vc.u32 %v1480_v1, %v1499_v8  ;;  %vm1576_vm5 = vcmp.gt.s32.totalorder %v1575_v16, 0  ;;  %v1503_v4 = vmul.u32 %v4603_v12, %v1449_v6  ;;  %v4671_v21 = vand.u32 3, %v1399_v50 }
 0x1bb   : > { %v1377_v30 = vxor.u32 2147483648, %v1376_v39  ;;  %v1506_v9 = vadd.s32 1, %v1502_v29  ;;  %v1577_v2 = vsel %vm1576_vm5, %v1575_v16, 0  ;;  %v4675_v63 = vadd.s32 %v1499_v8, %v1480_v1 }
 0x1bc   : > { %v1579_v56 = vand.u32 31, %v1577_v2  ;;  %v4678_v3 = vand.u32 65535, %v4659_v25  ;;  %v1720_v12 = vand.u32 2147483647, %v4657_v28  ;;  %v1723_v60 = vand.u32 2139095040, %v4657_v28 }
 0x1bd   : > { %v1378_v20 = vsel %vm1257_vm13, %v1377_v30, %v1376_v39  ;;  %v1507_v27 = vsel %vm1505_vm3, %v1506_v9, %v1502_v29  ;;  %v4683_v53 = vshrl.u32 %v4659_v25, 16  ;;  %v4685_v19 = vshrl.u32 %v1577_v2, 5 }
 0x1be   : > { %v4667_v35 = vsel %vm4632_vm15, %v4304_v44, %v1378_v20  ;;  %v1508_v45 = vadd.s32 %v1507_v27, %v1503_v4  ;;  %v4673_v37 = vsub.s32 32, %v1579_v56  ;;  %vm1412_vm6 = vcmp.lt.s32.totalorder %v4415_v24, 0 }
 0x1bf   : > { %v1383_v62 = vmul.f32 %v4667_v35, %v4667_v35  ;;  %v1582_v13 = vshll.u32 %v3619_v49, %v1579_v56  ;;  %v1585_v38 = vshll.u32 %v3620_v51, %v1579_v56  ;;  %v1591_v47 = vshll.u32 %v3622_v58, %v1579_v56 }
 0x1c0   : > { %v1509_v7 = vadd.s32 536870912, %v1508_v45  ;;  %v1583_v41 = vshrl.u32 %v3620_v51, %v4673_v37  ;;  %v1586_v57 = vshrl.u32 %v3621_v55, %v4673_v37  ;;  %v1592_v10 = vshrl.u32 %v3623_v61, %v4673_v37 }
 0x1c1   : > { %v1384_v31 = vmul.f32 -0.001358992, %v1383_v62  ;;  %v1391_v18 = vmul.f32 -0.00019511016, %v1383_v62  ;;  %v1589_v26 = vshrl.u32 %v3622_v58, %v4673_v37  ;;  %v1595_v17 = vshrl.u32 %v3624_v0, %v4673_v37 }
 0x1c2   : > { %v1510_v32 = vshrl.u32 %v1509_v7, 30  ;;  %v1588_v52 = vshll.u32 %v3621_v55, %v1579_v56  ;;  %vm4704_vm7 = vcmp.le.f32.partialorder %v1410_v59, 0.7853982  ;;  %v1584_v43 = vor.u32 %v1583_v41, %v1582_v13 }
 0x1c3   : > { %v1385_v14 = vadd.f32 0.041655596, %v1384_v31  ;;  %v1392_v48 = vadd.f32 0.008332121, %v1391_v18  ;;  %v4708_v33 = vor.u32 %v1586_v57, %v1585_v38  ;;  %v1593_v39 = vor.u32 %v1592_v10, %v1591_v47 }
 0x1c4   : > { %v1511_v23 = vshll.u32 %v1510_v32, 30  ;;  %v1594_v8 = vshll.u32 %v3623_v61, %v1579_v56  ;;  %vm1405_vm8 = vcmp.eq.s32.totalorder %v4671_v21, 2  ;;  %v1590_v30 = vor.u32 %v1589_v26, %v1588_v52 }
 0x1c5   : > { %v1386_v1 = vmul.f32 %v1385_v14, %v1383_v62  ;;  %v1393_v40 = vmul.f32 %v1392_v48, %v1383_v62  ;;  %vm1402_vm9 = vcmp.eq.s32.totalorder %v4671_v21, 0  ;;  %v1534_v50 = vsub.s32 4, %v1510_v32 }
 0x1c6   : > { %v4712_v29 = vsub.s32 %v1508_v45, %v1511_v23  ;;  %v1596_v59 = vor.u32 %v1595_v17, %v1594_v8  ;;  %vm1597_vm12 = vcmp.lt.s32.totalorder %v4685_v19, 1  ;;  %vm1600_vm10 = vcmp.lt.s32.totalorder %v4685_v19, 4 }
 0x1c7   : > { %v1387_v16 = vadd.f32 -0.4999988, %v1386_v1  ;;  %v1394_v6 = vadd.f32 -0.16666654, %v1393_v40  ;;  %vm1401_vm11 = vcmp.lt.s32.totalorder %v4671_v21, 2  ;;  %vm1398_vm0 = vweird.f32 %v4304_v44 }
 0x1c8   : > { %vm1513_vm13 = vcmp.lt.s32.totalorder %v4712_v29, 0  ;;  %v1514_v20 = vsub.s32 0, %v4712_v29  ;;  %vm1598_vm14 = vcmp.lt.s32.totalorder %v4685_v19, 2  ;;  %v1605_v4 = vsel %vm1597_vm12, %v1584_v43, %v4708_v33 }
 0x1c9   : > { %v1388_v9 = vmul.f32 %v1387_v16, %v1383_v62  ;;  %v1395_v2 = vmul.f32 %v1394_v6, %v1383_v62  ;;  %v1606_v56 = vsel %vm1600_vm10, %v1593_v39, 920167782  ;;  %v1724_v27 = vshrl.u32 %v1723_v60, 23 }
 0x1ca   : > { %v1515_v31 = vsel %vm1513_vm13, %v1514_v20, %v4712_v29  ;;  %vm1599_vm15 = vcmp.lt.s32.totalorder %v4685_v19, 3  ;;  %v4731_v7 = vsel %vm1412_vm6, %v1534_v50, %v1510_v32  ;;  %v1609_v57 = vsel %vm1597_vm12, %v4708_v33, %v1590_v30 }
 0x1cb   : > { %v1389_v45 = vadd.f32 1.0, %v1388_v9  ;;  %v1396_v62 = vadd.f32 1.0, %v1395_v2  ;;  %v1516_v18 = vclz %v1515_v31  ;;  %v1607_v41 = vsel %vm1599_vm15, %v1590_v30, %v1606_v56 }
 0x1cc   : > { %v1608_v14 = vsel %vm1598_vm14, %v1605_v4, %v1607_v41  ;;  %v1610_v48 = vsel %vm1600_vm10, %v1596_v59, 1326507024  ;;  %v1581_v32 = vshrl.u32 %v3619_v49, %v4673_v37  ;;  %v3429_v13 = vadd.s32 4294967169, %v1724_v27 }
 0x1cd   : > { %v1397_v60 = vmul.f32 %v1396_v62, %v4667_v35  ;;  %v1406_v10 = vxor.u32 2147483648, %v1389_v45  ;;  %v3424_v26 = vadd.s32 4294967294, %v1516_v18  ;;  %v4747_v38 = vand.u32 8388607, %v1720_v12 }
 0x1ce   : > { %v1537_v35 = vsel %vm4704_vm7, 0, %v4731_v7  ;;  %v1602_v17 = vsel %vm1600_vm10, %v1590_v30, 2102212464  ;;  %v1611_v1 = vsel %vm1599_vm15, %v1593_v39, %v1610_v48  ;;  %v1638_v23 = vand.u32 65535, %v1608_v14 }
 0x1cf   : > { %v1403_v47 = vxor.u32 2147483648, %v1397_v60  ;;  %v1407_v40 = vsel %vm1405_vm8, %v1406_v10, %v1397_v60  ;;  %vm3425_vm1 = vcmp.lt.s32.totalorder %v3424_v26, 0  ;;  %v1612_v37 = vsel %vm1598_vm14, %v1609_v57, %v1611_v1 }
 0x1d0   : > { %v1519_v8 = vsel %vm3425_vm1, 0, %v3424_v26  ;;  %v1616_v16 = vand.u32 65535, %v1612_v37  ;;  %v1617_v6 = vshrl.u32 %v1612_v37, 16  ;;  %v1639_v59 = vshrl.u32 %v1608_v14, 16 }
 0x1d1   : > { %v1404_v52 = vsel %vm1402_vm9, %v1389_v45, %v1403_v47  ;;  %v1520_v50 = vsub.s32 32, %v1519_v8  ;;  %v1524_v39 = vsub.s32 4294967266, %v1519_v8  ;;  %v1601_v2 = vsel %vm1597_vm12, %v1581_v32, %v1584_v43 }
 0x1d2   : > { %v1408_v30 = vsel %vm1401_vm11, %v1404_v52, %v1407_v40  ;;  %v1619_v20 = vmul.u32 %v1617_v6, %v4678_v3  ;;  %v1620_v4 = vmul.u32 %v1616_v16, %v4683_v53  ;;  %v1521_v56 = vshll.u32 %v4712_v29, %v1519_v8 }
 0x1d3   : > { %v1409_v9 = vsel %vm1398_vm0, nan, %v1408_v30  ;;  %v1522_v27 = vshrl.u32 %v4675_v63, %v1520_v50  ;;  %v1525_v45 = vadd.s32 127, %v1524_v39  ;;  %v1603_v21 = vsel %vm1599_vm15, %v4708_v33, %v1602_v17 }
 0x1d4   : > { %3276 = vst [vmem:[%s4036_s18 + $0x30] sm:$0xff] %v1409_v9  ;;  %v1618_v44 = vmul.u32 %v1616_v16, %v4678_v3  ;;  %v1621_v62 = vmul.u32 %v1617_v6, %v4683_v53  ;;  %v1622_v31 = vshll.u32 %v1619_v20, 16  ;;  %v1640_v43 = vmul.u32 %v1638_v23, %v4678_v3 }
 0x1d5   : > { %v1523_v18 = vor.u32 %v1522_v27, %v1521_v56  ;;  %v1526_v41 = vshll.u32 %v1525_v45, 23  ;;  %v1641_v57 = vmul.u32 %v1639_v59, %v4678_v3  ;;  %v1642_v29 = vmul.u32 %v1638_v23, %v4683_v53 }
 0x1d6   : > { %v1624_v63 = vshll.u32 %v1620_v4, 16  ;;  %vm1626_vm2 = vc.u32 %v1618_v44, %v1622_v31  ;;  %v1628_v60 = vadd.s32 %v1622_v31, %v1618_v44  ;;  %v1730_v10 = vadd.s32 1, %v3429_v13 }
 0x1d7   : > { %v1527_v14 = vor.u32 4788187, %v1526_v41  ;;  %v1623_v33 = vshrl.u32 %v1619_v20, 16  ;;  %v1627_v48 = vsel %vm1626_vm2, 1, %v3625_v54  ;;  %v1644_v26 = vshll.u32 %v1641_v57, 16 }
 0x1d8   : > { %v1530_v32 = vcvt.s32.f32 %v1523_v18  ;;  %v1629_v47 = vadd.s32 %v1627_v48, %v1621_v62  ;;  %vm1630_vm4 = vc.u32 %v1628_v60, %v1624_v63  ;;  %v1643_v17 = vmul.u32 %v1639_v59, %v4683_v53 }
 0x1d9   : > { %v1528_v1 = vand.u32 2147483647, %v1527_v14  ;;  %v1631_v40 = vsel %vm1630_vm4, 1, %v3625_v54  ;;  %v1646_v3 = vshll.u32 %v1642_v29, 16  ;;  %vm1648_vm3 = vc.u32 %v1640_v43, %v1644_v26 }
 0x1da   : > { %v1633_v37 = vadd.s32 %v1631_v40, %v1629_v47  ;;  %v1649_v23 = vsel %vm1648_vm3, 1, %v3625_v54  ;;  %v1650_v52 = vadd.s32 %v1644_v26, %v1640_v43  ;;  %vm1731_vm5 = vcmp.gt.s32.totalorder %v1730_v10, 0 }
 0x1db   : > { %v1531_v13 = vmul.f32 %v1530_v32, %v1528_v1  ;;  %v1604_v8 = vsel %vm1598_vm14, %v1601_v2, %v1603_v21  ;;  %v1651_v16 = vadd.s32 %v1649_v23, %v1643_v17  ;;  %v1732_v6 = vsel %vm1731_vm5, %v1730_v10, 0 }
 0x1dc   : > { %v1625_v30 = vshrl.u32 %v1620_v4, 16  ;;  %v1634_v50 = vadd.s32 %v1633_v37, %v1623_v33  ;;  %vm1652_vm8 = vc.u32 %v1650_v52, %v1646_v3  ;;  %v4787_v53 = vshrl.u32 %v1732_v6, 5 }
 0x1dd   : > { %v1532_v39 = vxor.u32 2147483648, %v1531_v13  ;;  %v1653_v59 = vsel %vm1652_vm8, 1, %v3625_v54  ;;  %v1728_v9 = vor.u32 8388608, %v4747_v38  ;;  %v1734_v20 = vand.u32 31, %v1732_v6 }
 0x1de   : > { %v1554_v56 = vadd.s32 3, %v1537_v35  ;;  %v4795_v19 = vadd.s32 %v1634_v50, %v1625_v30  ;;  %v1645_v2 = vshrl.u32 %v1641_v57, 16  ;;  %v1655_v27 = vadd.s32 %v1653_v59, %v1651_v16 }
 0x1df   : > { %v1533_v4 = vsel %vm1412_vm6, %v1532_v39, %v1531_v13  ;;  %v1647_v45 = vshrl.u32 %v1642_v29, 16  ;;  %v1658_v21 = vmul.u32 %v4659_v25, %v1604_v8  ;;  %v4800_v44 = vsub.s32 32, %v1734_v20 }
 0x1e0   : > { %v1536_v38 = vsel %vm4704_vm7, %v4415_v24, %v1533_v4  ;;  %v4805_v62 = vadd.s32 %v1650_v52, %v1646_v3  ;;  %v1656_v7 = vadd.s32 %v1655_v27, %v1645_v2  ;;  %vm1752_vm9 = vcmp.lt.s32.totalorder %v4787_v53, 1  ;;  %v301_v2 = vpop.f32.mrf.mxu1 }
 0x1e1   : > { %v1538_v35 = vmul.f32 %v1536_v38, %v1536_v38  ;;  %v1737_v31 = vshll.u32 %v3619_v49, %v1734_v20  ;;  %v1738_v43 = vshrl.u32 %v3620_v51, %v4800_v44  ;;  %v1741_v25 = vshrl.u32 %v3621_v55, %v4800_v44 }
 0x1e2   : > { %v1657_v18 = vadd.s32 %v1656_v7, %v1647_v45  ;;  %vm1660_vm6 = vc.u32 %v4795_v19, %v4805_v62  ;;  %v1740_v22 = vshll.u32 %v3620_v51, %v1734_v20  ;;  %v1744_v41 = vshrl.u32 %v3622_v58, %v4800_v44 }
 0x1e3   : > { %v1539_v57 = vmul.f32 -0.001358992, %v1538_v35  ;;  %v1546_v29 = vmul.f32 -0.00019511016, %v1538_v35  ;;  %v1743_v63 = vshll.u32 %v3621_v55, %v1734_v20  ;;  %v1746_v60 = vshll.u32 %v3622_v58, %v1734_v20 }
 0x1e4   : > { %v1661_v10 = vadd.s32 1, %v1657_v18  ;;  %v4820_v14 = vor.u32 %v1738_v43, %v1737_v31  ;;  %v4822_v33 = vor.u32 %v1741_v25, %v1740_v22  ;;  %v1747_v48 = vshrl.u32 %v3623_v61, %v4800_v44  ;;  %v4861_v22 = vld [vmem:[%s5978_s2] ss:$0 sm:$0xff] }
 0x1e5   : > { %v1540_v26 = vadd.f32 0.041655596, %v1539_v57  ;;  %v1547_v32 = vadd.f32 0.008332121, %v1546_v29  ;;  %v1749_v47 = vshll.u32 %v3623_v61, %v1734_v20  ;;  %v1750_v17 = vshrl.u32 %v3624_v0, %v4800_v44 }
 0x1e6   : > { %v1662_v1 = vsel %vm1660_vm6, %v1661_v10, %v1657_v18  ;;  %v4829_v40 = vor.u32 %v1744_v41, %v1743_v63  ;;  %v1748_v3 = vor.u32 %v1747_v48, %v1746_v60  ;;  %vm1755_vm7 = vcmp.lt.s32.totalorder %v4787_v53, 4 }
 0x1e7   : > { %v1541_v37 = vmul.f32 %v1540_v26, %v1538_v35  ;;  %v1548_v23 = vmul.f32 %v1547_v32, %v1538_v35  ;;  %v1663_v52 = vadd.s32 %v1662_v1, %v1658_v21  ;;  %v1751_v13 = vor.u32 %v1750_v17, %v1749_v47 }
 0x1e8   : > { %v1555_v8 = vand.u32 3, %v1554_v56  ;;  %v1760_v16 = vsel %vm1752_vm9, %v4820_v14, %v4822_v33  ;;  %v1761_v6 = vsel %vm1755_vm7, %v1748_v3, 920167782  ;;  %v4838_v30 = vshll.u32 %v1728_v9, 8 }
 0x1e9   : > { %v1542_v50 = vadd.f32 -0.4999988, %v1541_v37  ;;  %v1549_v39 = vadd.f32 -0.16666654, %v1548_v23  ;;  %v1664_v59 = vadd.s32 536870912, %v1663_v52  ;;  %vm1754_vm12 = vcmp.lt.s32.totalorder %v4787_v53, 3 }
 0x1ea   : > { %vm1753_vm10 = vcmp.lt.s32.totalorder %v4787_v53, 2  ;;  %v1762_v20 = vsel %vm1754_vm12, %v4829_v40, %v1761_v6  ;;  %v1764_v56 = vsel %vm1752_vm9, %v4822_v33, %v4829_v40  ;;  %v1765_v9 = vsel %vm1755_vm7, %v1751_v13, 1326507024 }
 0x1eb   : > { %v1543_v27 = vmul.f32 %v1542_v50, %v1538_v35  ;;  %v1550_v4 = vmul.f32 %v1549_v39, %v1538_v35  ;;  %v4851_v45 = vshrl.u32 %v1664_v59, 30  ;;  %v1763_v21 = vsel %vm1753_vm10, %v1760_v16, %v1762_v20 }
 0x1ec   : > { %v1766_v7 = vsel %vm1754_vm12, %v1748_v3, %v1765_v9  ;;  %v1794_v31 = vshrl.u32 %v1763_v21, 16  ;;  %v4864_v35 = vadd.f32 %v4861_v22, %v301_v2  ;;  %vm1553_vm11 = vweird.f32 %v4415_v24 }
 0x1ed   : > { %v1544_v43 = vadd.f32 1.0, %v1543_v27  ;;  %v1551_v25 = vadd.f32 1.0, %v1550_v4  ;;  %v1666_v18 = vshll.u32 %v4851_v45, 30  ;;  %v1767_v41 = vsel %vm1753_vm10, %v1764_v56, %v1766_v7 }
 0x1ee   : > { %v1769_v57 = vand.u32 65535, %v4838_v30  ;;  %vm1556_vm13 = vcmp.lt.s32.totalorder %v1555_v8, 2  ;;  %vm1557_vm0 = vcmp.eq.s32.totalorder %v1555_v8, 0  ;;  %v1771_v10 = vand.u32 65535, %v1767_v41 }
 0x1ef   : > { %v1552_v29 = vmul.f32 %v1551_v25, %v1536_v38  ;;  %v1561_v63 = vxor.u32 2147483648, %v1544_v43  ;;  %v1667_v60 = vsub.s32 %v1663_v52, %v1666_v18  ;;  %v1772_v48 = vshrl.u32 %v1767_v41, 16 }
 0x1f0   : > { %v4870_v26 = vmul.u32 %v1794_v31, %v1769_v57  ;;  %v1770_v17 = vshrl.u32 %v4838_v30, 16  ;;  %vm1560_vm15 = vcmp.eq.s32.totalorder %v1555_v8, 2  ;;  %v1736_v1 = vshrl.u32 %v3619_v49, %v4800_v44 }
 0x1f1   : > { %v1558_v32 = vxor.u32 2147483648, %v1552_v29  ;;  %vm1668_vm14 = vcmp.lt.s32.totalorder %v1667_v60, 0  ;;  %v1669_v47 = vsub.s32 0, %v1667_v60  ;;  %v1774_v3 = vmul.u32 %v1772_v48, %v1769_v57 }
 0x1f2   : > { %v1793_v37 = vand.u32 65535, %v1763_v21  ;;  %v1562_v23 = vsel %vm1560_vm15, %v1561_v63, %v1552_v29  ;;  %v1775_v13 = vmul.u32 %v1771_v10, %v1770_v17  ;;  %v1799_v39 = vshll.u32 %v4870_v26, 16 }
 0x1f3   : > { %v1559_v38 = vsel %vm1557_vm0, %v1544_v43, %v1558_v32  ;;  %v1670_v52 = vsel %vm1668_vm14, %v1669_v47, %v1667_v60  ;;  %v1777_v50 = vshll.u32 %v1774_v3, 16  ;;  %v1659_v20 = vadd.s32 %v4805_v62, %v4795_v19 }
 0x1f4   : > { %v1563_v16 = vsel %vm1556_vm13, %v1559_v38, %v1562_v23  ;;  %v1671_v6 = vclz %v1670_v52  ;;  %v1756_v44 = vsel %vm1752_vm9, %v1736_v1, %v4820_v14  ;;  %v1773_v56 = vmul.u32 %v1771_v10, %v1769_v57 }
 0x1f5   : > { %v1564_v59 = vsel %vm1553_vm11, nan, %v1563_v16  ;;  %v1757_v8 = vsel %vm1755_vm7, %v4829_v40, 2102212464  ;;  %v1795_v2 = vmul.u32 %v1793_v37, %v1769_v57  ;;  %v1797_v27 = vmul.u32 %v1793_v37, %v1770_v17 }
 0x1f6   : > { %v3427_v9 = vadd.s32 4294967294, %v1671_v6  ;;  %3277 = vst [vmem:[%s4036_s18 + $0x38] sm:$0xff] %v1564_v59  ;;  %vm1567_vm1 = vcmp.lt.s32.totalorder %v4587_v36, 0  ;;  %v1776_v24 = vmul.u32 %v1772_v48, %v1770_v17  ;;  %v1779_v4 = vshll.u32 %v1775_v13, 16 }
 0x1f7   : > { %vm1781_vm2 = vc.u32 %v1773_v56, %v1777_v50  ;;  %v1783_v21 = vadd.s32 %v1777_v50, %v1773_v56  ;;  %v1798_v62 = vmul.u32 %v1794_v31, %v1770_v17  ;;  %vm1803_vm3 = vc.u32 %v1795_v2, %v1799_v39  ;;  %v303_v17 = vpop.f32.mrf.mxu1 }
 0x1f8   : > { %vm3428_vm4 = vcmp.lt.s32.totalorder %v3427_v9, 0  ;;  %v1782_v19 = vsel %vm1781_vm2, 1, %v3625_v54  ;;  %v1804_v43 = vsel %vm1803_vm3, 1, %v3625_v54  ;;  %v1778_v18 = vshrl.u32 %v1774_v3, 16 }
 0x1f9   : > { %v1674_v14 = vsel %vm3428_vm4, 0, %v3427_v9  ;;  %v1784_v7 = vadd.s32 %v1782_v19, %v1776_v24  ;;  %vm1785_vm5 = vc.u32 %v1783_v21, %v1779_v4  ;;  %v1801_v29 = vshll.u32 %v1797_v27, 16 }
 0x1fa   : > { %v1675_v40 = vsub.s32 32, %v1674_v14  ;;  %v1679_v25 = vsub.s32 4294967266, %v1674_v14  ;;  %v1786_v41 = vsel %vm1785_vm5, 1, %v3625_v54  ;;  %v1805_v63 = vadd.s32 %v1799_v39, %v1795_v2 }
 0x1fb   : > { %v1788_v57 = vadd.s32 %v1786_v41, %v1784_v7  ;;  %v1806_v10 = vadd.s32 %v1804_v43, %v1798_v62  ;;  %v1676_v48 = vshll.u32 %v1667_v60, %v1674_v14  ;;  %v1689_v31 = vsub.s32 4, %v4851_v45 }
 0x1fc   : > { %v1677_v32 = vshrl.u32 %v1659_v20, %v1675_v40  ;;  %v1680_v47 = vadd.s32 127, %v1679_v25  ;;  %v1758_v1 = vsel %vm1754_vm12, %v4822_v33, %v1757_v8  ;;  %vm1807_vm8 = vc.u32 %v1805_v63, %v1801_v29 }
 0x1fd   : > { %v1789_v37 = vadd.s32 %v1788_v57, %v1778_v18  ;;  %v1878_v3 = vand.u32 2139095040, %v4864_v35  ;;  %v1780_v52 = vshrl.u32 %v1775_v13, 16  ;;  %v1808_v16 = vsel %vm1807_vm8, 1, %v3625_v54 }
 0x1fe   : > { %v1678_v38 = vor.u32 %v1677_v32, %v1676_v48  ;;  %v1681_v23 = vshll.u32 %v1680_v47, 23  ;;  %v1800_v60 = vshrl.u32 %v4870_v26, 16  ;;  %v1810_v6 = vadd.s32 %v1808_v16, %v1806_v10 }
 0x1ff   : > { %v1875_v50 = vand.u32 2147483647, %v4864_v35  ;;  %v1879_v39 = vshrl.u32 %v1878_v3, 23  ;;  %v4901_v59 = vadd.f32 %v4861_v22, %v303_v17  ;;  %v1690_v33 = vsel %vm1567_vm1, %v1689_v31, %v4851_v45 }
 0x200   : > { %v1682_v20 = vor.u32 4788187, %v1681_v23  ;;  %v1790_v56 = vadd.s32 %v1789_v37, %v1780_v52  ;;  %vm4908_vm9 = vcmp.le.f32.partialorder %v1565_v15, 0.7853982  ;;  %v1802_v26 = vshrl.u32 %v1797_v27, 16 }
 0x201   : > { %v1811_v9 = vadd.s32 %v1810_v6, %v1800_v60  ;;  %v3432_v8 = vadd.s32 4294967169, %v1879_v39  ;;  %v1685_v24 = vcvt.s32.f32 %v1678_v38  ;;  %v1759_v4 = vsel %vm1753_vm10, %v1756_v44, %v1758_v1  ;;  %v306_v44 = vpop.f32.mrf.mxu2 }
 0x202   : > { %v1683_v2 = vand.u32 2147483647, %v1682_v20  ;;  %v1809_v21 = vadd.s32 %v1805_v63, %v1801_v29  ;;  %v1692_v19 = vsel %vm4908_vm9, 0, %v1690_v33  ;;  %v1882_v62 = vand.u32 8388607, %v1875_v50 }
 0x203   : > { %v1812_v45 = vadd.s32 %v1811_v9, %v1802_v26  ;;  %v1885_v15 = vadd.s32 1, %v3432_v8  ;;  %v1813_v27 = vmul.u32 %v4838_v30, %v1759_v4  ;;  %v1709_v40 = vadd.s32 3, %v1692_v19 }
 0x204   : > { %v1686_v14 = vmul.f32 %v1685_v24, %v1683_v2  ;;  %vm1815_vm6 = vc.u32 %v1790_v56, %v1809_v21  ;;  %v2030_v53 = vand.u32 2147483647, %v4901_v59  ;;  %v1883_v41 = vor.u32 8388608, %v1882_v62 }
 0x205   : > { %v1816_v7 = vadd.s32 1, %v1812_v45  ;;  %vm1886_vm7 = vcmp.gt.s32.totalorder %v1885_v15, 0  ;;  %v2033_v29 = vand.u32 2139095040, %v4901_v59  ;;  %v4931_v32 = vadd.f32 %v4861_v22, %v306_v44 }
 0x206   : > { %v1687_v43 = vxor.u32 2147483648, %v1686_v14  ;;  %v1887_v25 = vsel %vm1886_vm7, %v1885_v15, 0  ;;  %v4935_v31 = vand.u32 3, %v1709_v40  ;;  %v4937_v1 = vadd.s32 %v1809_v21, %v1790_v56 }
 0x207   : > { %v1817_v18 = vsel %vm1815_vm6, %v1816_v7, %v1812_v45  ;;  %v1889_v57 = vand.u32 31, %v1887_v25  ;;  %v4939_v37 = vshll.u32 %v1883_v41, 8  ;;  %v4941_v3 = vshrl.u32 %v2033_v29, 23 }
 0x208   : > { %v1688_v63 = vsel %vm1567_vm1, %v1687_v43, %v1686_v14  ;;  %v1818_v10 = vadd.s32 %v1817_v18, %v1813_v27  ;;  %v4945_v38 = vand.u32 8388607, %v2030_v53  ;;  %v4949_v6 = vshrl.u32 %v1887_v25, 5 }
 0x209   : > { %v4926_v30 = vsel %vm4908_vm9, %v4587_v36, %v1688_v63  ;;  %v4928_v48 = vsub.s32 32, %v1889_v57  ;;  %vm1722_vm12 = vcmp.lt.s32.totalorder %v4657_v28, 0  ;;  %v1892_v9 = vshll.u32 %v3619_v49, %v1889_v57 }
 0x20a   : > { %v1693_v47 = vmul.f32 %v4926_v30, %v4926_v30  ;;  %v1819_v17 = vadd.s32 536870912, %v1818_v10  ;;  %v1895_v8 = vshll.u32 %v3620_v51, %v1889_v57  ;;  %v1898_v2 = vshll.u32 %v3621_v55, %v1889_v57 }
 0x20b   : > { %v1893_v60 = vshrl.u32 %v3620_v51, %v4928_v48  ;;  %v1896_v39 = vshrl.u32 %v3621_v55, %v4928_v48  ;;  %v1899_v20 = vshrl.u32 %v3622_v58, %v4928_v48  ;;  %v1902_v33 = vshrl.u32 %v3623_v61, %v4928_v48 }
 0x20c   : > { %v1694_v23 = vmul.f32 -0.001358992, %v1693_v47  ;;  %v1701_v52 = vmul.f32 -0.00019511016, %v1693_v47  ;;  %v1820_v16 = vshrl.u32 %v1819_v17, 30  ;;  %v1901_v24 = vshll.u32 %v3622_v58, %v1889_v57 }
 0x20d   : > { %v1905_v4 = vshrl.u32 %v3624_v0, %v4928_v48  ;;  %v4966_v62 = vor.u32 %v1893_v60, %v1892_v9  ;;  %vm4970_vm10 = vcmp.le.f32.partialorder %v1720_v12, 0.7853982  ;;  %v4974_v14 = vor.u32 %v1896_v39, %v1895_v8 }
 0x20e   : > { %v1695_v56 = vadd.f32 0.041655596, %v1694_v23  ;;  %v1702_v13 = vadd.f32 0.008332121, %v1701_v52  ;;  %v1821_v26 = vshll.u32 %v1820_v16, 30  ;;  %v4976_v27 = vor.u32 %v1899_v20, %v1898_v2 }
 0x20f   : > { %v1903_v7 = vor.u32 %v1902_v33, %v1901_v24  ;;  %v1904_v43 = vshll.u32 %v3623_v61, %v1889_v57  ;;  %vm1712_vm13 = vcmp.eq.s32.totalorder %v4935_v31, 0  ;;  %vm1715_vm0 = vcmp.eq.s32.totalorder %v4935_v31, 2 }
 0x210   : > { %v1696_v21 = vmul.f32 %v1695_v56, %v1693_v47  ;;  %v1703_v19 = vmul.f32 %v1702_v13, %v1693_v47  ;;  %v4964_v45 = vsub.s32 %v1818_v10, %v1821_v26  ;;  %v1844_v12 = vsub.s32 4, %v1820_v16 }
 0x211   : > { %v1906_v18 = vor.u32 %v1905_v4, %v1904_v43  ;;  %vm1907_vm14 = vcmp.lt.s32.totalorder %v4949_v6, 1  ;;  %v1924_v41 = vand.u32 65535, %v4939_v37  ;;  %vm1711_vm15 = vcmp.lt.s32.totalorder %v4935_v31, 2 }
 0x212   : > { %v1697_v40 = vadd.f32 -0.4999988, %v1696_v21  ;;  %v1704_v25 = vadd.f32 -0.16666654, %v1703_v19  ;;  %vm1823_vm11 = vcmp.lt.s32.totalorder %v4964_v45, 0  ;;  %v1824_v44 = vsub.s32 0, %v4964_v45 }
 0x213   : > { %vm1910_vm1 = vcmp.lt.s32.totalorder %v4949_v6, 4  ;;  %vm1708_vm2 = vweird.f32 %v4587_v36  ;;  %vm1909_vm4 = vcmp.lt.s32.totalorder %v4949_v6, 3  ;;  %v1915_v17 = vsel %vm1907_vm14, %v4966_v62, %v4974_v14 }
 0x214   : > { %v1698_v29 = vmul.f32 %v1697_v40, %v1693_v47  ;;  %v1705_v63 = vmul.f32 %v1704_v25, %v1693_v47  ;;  %v1825_v57 = vsel %vm1823_vm11, %v1824_v44, %v4964_v45  ;;  %v1916_v23 = vsel %vm1910_vm1, %v1903_v7, 920167782 }
 0x215   : > { %v1826_v10 = vclz %v1825_v57  ;;  %v1917_v60 = vsel %vm1909_vm4, %v4976_v27, %v1916_v23  ;;  %v1925_v39 = vshrl.u32 %v4939_v37, 16  ;;  %v1845_v33 = vsel %vm1722_vm12, %v1844_v12, %v1820_v16 }
 0x216   : > { %v1699_v47 = vadd.f32 1.0, %v1698_v29  ;;  %v1706_v52 = vadd.f32 1.0, %v1705_v63  ;;  %vm1908_vm3 = vcmp.lt.s32.totalorder %v4949_v6, 2  ;;  %v1919_v56 = vsel %vm1907_vm14, %v4974_v14, %v4976_v27 }
 0x217   : > { %v3430_v20 = vadd.s32 4294967294, %v1826_v10  ;;  %v1918_v9 = vsel %vm1908_vm3, %v1915_v17, %v1917_v60  ;;  %v1920_v8 = vsel %vm1910_vm1, %v1906_v18, 1326507024  ;;  %v3435_v24 = vadd.s32 4294967169, %v4941_v3 }
 0x218   : > { %v1707_v13 = vmul.f32 %v1706_v52, %v4926_v30  ;;  %v1716_v26 = vxor.u32 2147483648, %v1699_v47  ;;  %v1921_v16 = vsel %vm1909_vm4, %v1903_v7, %v1920_v8  ;;  %v1949_v2 = vshrl.u32 %v1918_v9, 16 }
 0x219   : > { %vm3431_vm5 = vcmp.lt.s32.totalorder %v3430_v20, 0  ;;  %v1847_v19 = vsel %vm4970_vm10, 0, %v1845_v33  ;;  %v1922_v30 = vsel %vm1908_vm3, %v1919_v56, %v1921_v16  ;;  %v1948_v44 = vand.u32 65535, %v1918_v9 }
 0x21a   : > { %v1713_v4 = vxor.u32 2147483648, %v1707_v13  ;;  %v1829_v21 = vsel %vm3431_vm5, 0, %v3430_v20  ;;  %v1926_v25 = vand.u32 65535, %v1922_v30  ;;  %v1717_v7 = vsel %vm1715_vm0, %v1716_v26, %v1707_v13 }
 0x21b   : > { %v1830_v43 = vsub.s32 32, %v1829_v21  ;;  %v1834_v40 = vsub.s32 4294967266, %v1829_v21  ;;  %v1831_v3 = vshll.u32 %v4964_v45, %v1829_v21  ;;  %v1927_v18 = vshrl.u32 %v1922_v30, 16 }
 0x21c   : > { %v1714_v12 = vsel %vm1712_vm13, %v1699_v47, %v1713_v4  ;;  %v1951_v10 = vmul.u32 %v1949_v2, %v1924_v41  ;;  %v1891_v23 = vshrl.u32 %v3619_v49, %v4928_v48  ;;  %v1930_v52 = vmul.u32 %v1926_v25, %v1925_v39 }
 0x21d   : > { %v1718_v29 = vsel %vm1711_vm15, %v1714_v12, %v1717_v7  ;;  %v1832_v63 = vshrl.u32 %v4937_v1, %v1830_v43  ;;  %v1835_v57 = vadd.s32 127, %v1834_v40  ;;  %v1929_v47 = vmul.u32 %v1927_v18, %v1924_v41 }
 0x21e   : > { %v1719_v17 = vsel %vm1708_vm2, nan, %v1718_v29  ;;  %v1864_v33 = vadd.s32 3, %v1847_v19  ;;  %v1952_v45 = vmul.u32 %v1948_v44, %v1925_v39  ;;  %v1928_v56 = vmul.u32 %v1926_v25, %v1924_v41 }
 0x21f   : > { %v1833_v60 = vor.u32 %v1832_v63, %v1831_v3  ;;  %v1836_v20 = vshll.u32 %v1835_v57, 23  ;;  %3278 = vst [vmem:[%s4036_s18 + $0x40] sm:$0xff] %v1719_v17  ;;  %v1931_v31 = vmul.u32 %v1927_v18, %v1925_v39  ;;  %v1932_v13 = vshll.u32 %v1929_v47, 16 }
 0x220   : > { %v1950_v26 = vmul.u32 %v1948_v44, %v1924_v41  ;;  %v1934_v9 = vshll.u32 %v1930_v52, 16  ;;  %v1953_v8 = vmul.u32 %v1949_v2, %v1925_v39  ;;  %v1954_v16 = vshll.u32 %v1951_v10, 16 }
 0x221   : > { %v1837_v1 = vor.u32 4788187, %v1836_v20  ;;  %v1840_v36 = vcvt.s32.f32 %v1833_v60  ;;  %vm1936_vm8 = vc.u32 %v1928_v56, %v1932_v13  ;;  %v1938_v4 = vadd.s32 %v1932_v13, %v1928_v56 }
 0x222   : > { %v1956_v21 = vshll.u32 %v1952_v45, 16  ;;  %v1937_v30 = vsel %vm1936_vm8, 1, %v3625_v54  ;;  %vm1958_vm9 = vc.u32 %v1950_v26, %v1954_v16  ;;  %v1960_v43 = vadd.s32 %v1954_v16, %v1950_v26 }
 0x223   : > { %v1838_v48 = vand.u32 2147483647, %v1837_v1  ;;  %v1912_v19 = vsel %vm1910_vm1, %v4976_v27, 2102212464  ;;  %v1939_v40 = vadd.s32 %v1937_v30, %v1931_v31  ;;  %vm1940_vm6 = vc.u32 %v1938_v4, %v1934_v9 }
 0x224   : > { %v1959_v41 = vsel %vm1958_vm9, 1, %v3625_v54  ;;  %v1941_v39 = vsel %vm1940_vm6, 1, %v3625_v54  ;;  %vm1962_vm7 = vc.u32 %v1960_v43, %v1956_v21  ;;  %v1933_v44 = vshrl.u32 %v1929_v47, 16 }
 0x225   : > { %v1841_v25 = vmul.f32 %v1840_v36, %v1838_v48  ;;  %v1961_v2 = vadd.s32 %v1959_v41, %v1953_v8  ;;  %v1943_v12 = vadd.s32 %v1941_v39, %v1939_v40  ;;  %v1963_v7 = vsel %vm1962_vm7, 1, %v3625_v54 }
 0x226   : > { %v2040_v3 = vadd.s32 1, %v3435_v24  ;;  %v1911_v29 = vsel %vm1907_vm14, %v1891_v23, %v4966_v62  ;;  %v1955_v27 = vshrl.u32 %v1951_v10, 16  ;;  %v1913_v57 = vsel %vm1909_vm4, %v4974_v14, %v1912_v19 }
 0x227   : > { %v1842_v18 = vxor.u32 2147483648, %v1841_v25  ;;  %v1965_v63 = vadd.s32 %v1963_v7, %v1961_v2  ;;  %v1935_v17 = vshrl.u32 %v1930_v52, 16  ;;  %v1944_v60 = vadd.s32 %v1943_v12, %v1933_v44 }
 0x228   : > { %vm2041_vm11 = vcmp.gt.s32.totalorder %v2040_v3, 0  ;;  %v1957_v20 = vshrl.u32 %v1952_v45, 16  ;;  %v5054_v10 = vadd.s32 %v1960_v43, %v1956_v21  ;;  %v1914_v52 = vsel %vm1908_vm3, %v1911_v29, %v1913_v57 }
 0x229   : > { %v1843_v47 = vsel %vm1722_vm12, %v1842_v18, %v1841_v25  ;;  %v1966_v56 = vadd.s32 %v1965_v63, %v1955_v27  ;;  %v2042_v24 = vsel %vm2041_vm11, %v2040_v3, 0  ;;  %v5052_v62 = vadd.s32 %v1944_v60, %v1935_v17 }
 0x22a   : > { %v5050_v31 = vsel %vm4970_vm10, %v4657_v28, %v1843_v47  ;;  %v2044_v23 = vand.u32 31, %v2042_v24  ;;  %v2038_v45 = vor.u32 8388608, %v4945_v38  ;;  %v2188_v26 = vand.u32 2139095040, %v4931_v32 }
 0x22b   : > { %v1848_v14 = vmul.f32 %v5050_v31, %v5050_v31  ;;  %v1967_v13 = vadd.s32 %v1966_v56, %v1957_v20  ;;  %vm1970_vm12 = vc.u32 %v5052_v62, %v5054_v10  ;;  %v5066_v8 = vand.u32 3, %v1864_v33 }
 0x22c   : > { %v5063_v15 = vsub.s32 32, %v2044_v23  ;;  %v1968_v36 = vmul.u32 %v4939_v37, %v1914_v52  ;;  %v5069_v4 = vshrl.u32 %v2042_v24, 5  ;;  %v2047_v43 = vshll.u32 %v3619_v49, %v2044_v23 }
 0x22d   : > { %v1849_v1 = vmul.f32 -0.001358992, %v1848_v14  ;;  %v1856_v9 = vmul.f32 -0.00019511016, %v1848_v14  ;;  %v1971_v16 = vadd.s32 1, %v1967_v13  ;;  %v2050_v33 = vshll.u32 %v3620_v51, %v2044_v23 }
 0x22e   : > { %v2048_v6 = vshrl.u32 %v3620_v51, %v5063_v15  ;;  %v2051_v21 = vshrl.u32 %v3621_v55, %v5063_v15  ;;  %v2053_v40 = vshll.u32 %v3621_v55, %v2044_v23  ;;  %v2054_v37 = vshrl.u32 %v3622_v58, %v5063_v15 }
 0x22f   : > { %v1850_v38 = vadd.f32 0.041655596, %v1849_v1  ;;  %v1857_v48 = vadd.f32 0.008332121, %v1856_v9  ;;  %v1972_v30 = vsel %vm1970_vm12, %v1971_v16, %v1967_v13  ;;  %v2056_v39 = vshll.u32 %v3622_v58, %v2044_v23 }
 0x230   : > { %v1973_v19 = vadd.s32 %v1972_v30, %v1968_v36  ;;  %v2057_v2 = vshrl.u32 %v3623_v61, %v5063_v15  ;;  %v2049_v12 = vor.u32 %v2048_v6, %v2047_v43  ;;  %v2052_v7 = vor.u32 %v2051_v21, %v2050_v33 }
 0x231   : > { %v1851_v41 = vmul.f32 %v1850_v38, %v1848_v14  ;;  %v1858_v25 = vmul.f32 %v1857_v48, %v1848_v14  ;;  %v2060_v3 = vshrl.u32 %v3624_v0, %v5063_v15  ;;  %v2189_v63 = vshrl.u32 %v2188_v26, 23 }
 0x232   : > { %v1974_v44 = vadd.s32 536870912, %v1973_v19  ;;  %v2058_v27 = vor.u32 %v2057_v2, %v2056_v39  ;;  %vm1867_vm10 = vcmp.eq.s32.totalorder %v5066_v8, 0  ;;  %v2055_v17 = vor.u32 %v2054_v37, %v2053_v40 }
 0x233   : > { %v1852_v18 = vadd.f32 -0.4999988, %v1851_v41  ;;  %v1859_v29 = vadd.f32 -0.16666654, %v1858_v25  ;;  %v2059_v60 = vshll.u32 %v3623_v61, %v2044_v23  ;;  %v5087_v47 = vshll.u32 %v2038_v45, 8 }
 0x234   : > { %v1975_v57 = vshrl.u32 %v1974_v44, 30  ;;  %vm1866_vm13 = vcmp.lt.s32.totalorder %v5066_v8, 2  ;;  %vm1870_vm0 = vcmp.eq.s32.totalorder %v5066_v8, 2  ;;  %vm2062_vm14 = vcmp.lt.s32.totalorder %v5069_v4, 1 }
 0x235   : > { %v1853_v20 = vmul.f32 %v1852_v18, %v1848_v14  ;;  %v1860_v56 = vmul.f32 %v1859_v29, %v1848_v14  ;;  %vm1863_vm15 = vweird.f32 %v4657_v28  ;;  %v2061_v52 = vor.u32 %v2060_v3, %v2059_v60 }
 0x236   : > { %v1976_v24 = vshll.u32 %v1975_v57, 30  ;;  %vm2065_vm1 = vcmp.lt.s32.totalorder %v5069_v4, 4  ;;  %v2070_v13 = vsel %vm2062_vm14, %v2049_v12, %v2052_v7  ;;  %vm2064_vm2 = vcmp.lt.s32.totalorder %v5069_v4, 3 }
 0x237   : > { %v1854_v23 = vadd.f32 1.0, %v1853_v20  ;;  %v1861_v45 = vadd.f32 1.0, %v1860_v56  ;;  %v2071_v14 = vsel %vm2065_vm1, %v2058_v27, 920167782  ;;  %vm1877_vm4 = vcmp.lt.s32.totalorder %v4864_v35, 0 }
 0x238   : > { %v5100_v26 = vsub.s32 %v1973_v19, %v1976_v24  ;;  %vm2063_vm3 = vcmp.lt.s32.totalorder %v5069_v4, 2  ;;  %v2072_v1 = vsel %vm2064_vm2, %v2055_v17, %v2071_v14  ;;  %v2079_v9 = vand.u32 65535, %v5087_v47 }
 0x239   : > { %v1862_v16 = vmul.f32 %v1861_v45, %v5050_v31  ;;  %v1871_v36 = vxor.u32 2147483648, %v1854_v23  ;;  %v2073_v6 = vsel %vm2063_vm3, %v2070_v13, %v2072_v1  ;;  %v2074_v21 = vsel %vm2062_vm14, %v2052_v7, %v2055_v17 }
 0x23a   : > { %vm1978_vm5 = vcmp.lt.s32.totalorder %v5100_v26, 0  ;;  %v1979_v38 = vsub.s32 0, %v5100_v26  ;;  %v2075_v48 = vsel %vm2065_vm1, %v2061_v52, 1326507024  ;;  %v2080_v30 = vshrl.u32 %v5087_v47, 16 }
 0x23b   : > { %v1868_v43 = vxor.u32 2147483648, %v1862_v16  ;;  %v1999_v19 = vsub.s32 4, %v1975_v57  ;;  %v2067_v31 = vsel %vm2065_vm1, %v2055_v17, 2102212464  ;;  %v2076_v33 = vsel %vm2064_vm2, %v2058_v27, %v2075_v48 }
 0x23c   : > { %v1872_v40 = vsel %vm1870_vm0, %v1871_v36, %v1862_v16  ;;  %v1980_v37 = vsel %vm1978_vm5, %v1979_v38, %v5100_v26  ;;  %v2077_v41 = vsel %vm2063_vm3, %v2074_v21, %v2076_v33  ;;  %v2104_v25 = vshrl.u32 %v2073_v6, 16 }
 0x23d   : > { %v1869_v39 = vsel %vm1867_vm10, %v1854_v23, %v1868_v43  ;;  %v1981_v2 = vclz %v1980_v37  ;;  %v2081_v44 = vand.u32 65535, %v2077_v41  ;;  %v2082_v3 = vshrl.u32 %v2077_v41, 16 }
 0x23e   : > { %v1873_v18 = vsel %vm1866_vm13, %v1869_v39, %v1872_v40  ;;  %v2046_v29 = vshrl.u32 %v3619_v49, %v5063_v15  ;;  %v2103_v27 = vand.u32 65535, %v2073_v6  ;;  %v3438_v17 = vadd.s32 4294967169, %v2189_v63 }
 0x23f   : > { %v1874_v60 = vsel %vm1863_vm15, nan, %v1873_v18  ;;  %v1969_v20 = vadd.s32 %v5054_v10, %v5052_v62  ;;  %v3433_v56 = vadd.s32 4294967294, %v1981_v2  ;;  %v2084_v24 = vmul.u32 %v2082_v3, %v2079_v9 }
 0x240   : > { %v2066_v52 = vsel %vm2062_vm14, %v2046_v29, %v2049_v12  ;;  %v2068_v8 = vsel %vm2064_vm2, %v2052_v7, %v2067_v31  ;;  %v2085_v13 = vmul.u32 %v2081_v44, %v2080_v30  ;;  %v2106_v23 = vmul.u32 %v2104_v25, %v2079_v9  ;;  %3279 = vst [vmem:[%s4036_s18 + $0x48] sm:$0xff] %v1874_v60 }
 0x241   : > { %vm3434_vm8 = vcmp.lt.s32.totalorder %v3433_v56, 0  ;;  %v2000_v15 = vsel %vm1877_vm4, %v1999_v19, %v1975_v57  ;;  %v2083_v28 = vmul.u32 %v2081_v44, %v2079_v9  ;;  %v2087_v63 = vshll.u32 %v2084_v24, 16 }
 0x242   : > { %vm5144_vm9 = vcmp.le.f32.partialorder %v1875_v50, 0.7853982  ;;  %v1984_v10 = vsel %vm3434_vm8, 0, %v3433_v56  ;;  %v2086_v12 = vmul.u32 %v2082_v3, %v2080_v30  ;;  %v2105_v45 = vmul.u32 %v2103_v27, %v2079_v9 }
 0x243   : > { %v2107_v14 = vmul.u32 %v2103_v27, %v2080_v30  ;;  %v1985_v7 = vsub.s32 32, %v1984_v10  ;;  %v1989_v1 = vsub.s32 4294967266, %v1984_v10  ;;  %v2089_v16 = vshll.u32 %v2085_v13, 16 }
 0x244   : > { %vm2091_vm6 = vc.u32 %v2083_v28, %v2087_v63  ;;  %v2093_v6 = vadd.s32 %v2087_v63, %v2083_v28  ;;  %v2108_v57 = vmul.u32 %v2104_v25, %v2080_v30  ;;  %v2109_v21 = vshll.u32 %v2106_v23, 16 }
 0x245   : > { %v2092_v36 = vsel %vm2091_vm6, 1, %v3625_v54  ;;  %v1986_v38 = vshll.u32 %v5100_v26, %v1984_v10  ;;  %v1987_v48 = vshrl.u32 %v1969_v20, %v1985_v7  ;;  %v1990_v50 = vadd.s32 127, %v1989_v1  ;;  %v308_v10 = vpop.f32.mrf.mxu2 }
 0x246   : > { %v2094_v43 = vadd.s32 %v2092_v36, %v2086_v12  ;;  %vm2095_vm7 = vc.u32 %v2093_v6, %v2089_v16  ;;  %v2111_v19 = vshll.u32 %v2107_v14, 16  ;;  %vm2113_vm11 = vc.u32 %v2105_v45, %v2109_v21 }
 0x247   : > { %v2115_v31 = vadd.s32 %v2109_v21, %v2105_v45  ;;  %v1988_v9 = vor.u32 %v1987_v48, %v1986_v38  ;;  %v1991_v33 = vshll.u32 %v1990_v50, 23  ;;  %v2096_v40 = vsel %vm2095_vm7, 1, %v3625_v54 }
 0x248   : > { %v2114_v37 = vsel %vm2113_vm11, 1, %v3625_v54  ;;  %v2088_v41 = vshrl.u32 %v2084_v24, 16  ;;  %v2098_v39 = vadd.s32 %v2096_v40, %v2094_v43  ;;  %v2090_v25 = vshrl.u32 %v2085_v13, 16 }
 0x249   : > { %v2116_v2 = vadd.s32 %v2114_v37, %v2108_v57  ;;  %vm2117_vm12 = vc.u32 %v2115_v31, %v2111_v19  ;;  %v1992_v30 = vor.u32 4788187, %v1991_v33  ;;  %v2185_v44 = vand.u32 2147483647, %v4931_v32 }
 0x24a   : > { %v2118_v26 = vsel %vm2117_vm12, 1, %v3625_v54  ;;  %v2099_v3 = vadd.s32 %v2098_v39, %v2088_v41  ;;  %v2110_v18 = vshrl.u32 %v2106_v23, 16  ;;  %v2195_v27 = vadd.s32 1, %v3438_v17 }
 0x24b   : > { %v2120_v29 = vadd.s32 %v2118_v26, %v2116_v2  ;;  %v1993_v60 = vand.u32 2147483647, %v1992_v30  ;;  %v1995_v20 = vcvt.s32.f32 %v1988_v9  ;;  %v2002_v56 = vsel %vm5144_vm9, 0, %v2000_v15 }
 0x24c   : > { %v2069_v24 = vsel %vm2063_vm3, %v2066_v52, %v2068_v8  ;;  %v5158_v28 = vadd.s32 %v2099_v3, %v2090_v25  ;;  %v2112_v63 = vshrl.u32 %v2107_v14, 16  ;;  %vm2196_vm10 = vcmp.gt.s32.totalorder %v2195_v27, 0 }
 0x24d   : > { %v2121_v13 = vadd.s32 %v2120_v29, %v2110_v18  ;;  %v1996_v12 = vmul.f32 %v1995_v20, %v1993_v60  ;;  %v5160_v45 = vadd.s32 %v2115_v31, %v2111_v19  ;;  %v2192_v17 = vand.u32 8388607, %v2185_v44 }
 0x24e   : > { %v2197_v23 = vsel %vm2196_vm10, %v2195_v27, 0  ;;  %v5167_v52 = vadd.f32 %v4861_v22, %v308_v10  ;;  %v2019_v8 = vadd.s32 3, %v2002_v56  ;;  %v2123_v15 = vmul.u32 %v5087_v47, %v2069_v24 }
 0x24f   : > { %v2122_v7 = vadd.s32 %v2121_v13, %v2112_v63  ;;  %v1997_v1 = vxor.u32 2147483648, %v1996_v12  ;;  %vm2125_vm13 = vc.u32 %v5158_v28, %v5160_v45  ;;  %v2199_v4 = vand.u32 31, %v2197_v23 }
 0x250   : > { %v2193_v36 = vor.u32 8388608, %v2192_v17  ;;  %v5178_v47 = vshrl.u32 %v2197_v23, 5  ;;  %v2020_v27 = vand.u32 3, %v2019_v8  ;;  %v2343_v8 = vand.u32 2139095040, %v5167_v52 }
 0x251   : > { %v2126_v14 = vadd.s32 1, %v2122_v7  ;;  %v1998_v16 = vsel %vm1877_vm4, %v1997_v1, %v1996_v12  ;;  %v2200_v6 = vsub.s32 32, %v2199_v4  ;;  %v2205_v57 = vshll.u32 %v3620_v51, %v2199_v4 }
 0x252   : > { %v2001_v21 = vsel %vm5144_vm9, %v4864_v35, %v1998_v16  ;;  %v2208_v48 = vshll.u32 %v3621_v55, %v2199_v4  ;;  %v2211_v22 = vshll.u32 %v3622_v58, %v2199_v4  ;;  %v2202_v19 = vshll.u32 %v3619_v49, %v2199_v4 }
 0x253   : > { %v2127_v38 = vsel %vm2125_vm13, %v2126_v14, %v2122_v7  ;;  %v2003_v50 = vmul.f32 %v2001_v21, %v2001_v21  ;;  %v2206_v31 = vshrl.u32 %v3621_v55, %v2200_v6  ;;  %v2209_v9 = vshrl.u32 %v3622_v58, %v2200_v6 }
 0x254   : > { %v2128_v43 = vadd.s32 %v2127_v38, %v2123_v15  ;;  %v2212_v33 = vshrl.u32 %v3623_v61, %v2200_v6  ;;  %v2214_v62 = vshll.u32 %v3623_v61, %v2199_v4  ;;  %v2203_v39 = vshrl.u32 %v3620_v51, %v2200_v6 }
 0x255   : > { %v2004_v40 = vmul.f32 -0.001358992, %v2003_v50  ;;  %v2011_v37 = vmul.f32 -0.00019511016, %v2003_v50  ;;  %v5186_v2 = vor.u32 %v2206_v31, %v2205_v57  ;;  %v2210_v30 = vor.u32 %v2209_v9, %v2208_v48 }
 0x256   : > { %v2129_v41 = vadd.s32 536870912, %v2128_v43  ;;  %v2213_v25 = vor.u32 %v2212_v33, %v2211_v22  ;;  %v2215_v26 = vshrl.u32 %v3624_v0, %v2200_v6  ;;  %vm2220_vm0 = vcmp.lt.s32.totalorder %v5178_v47, 4 }
 0x257   : > { %v2005_v3 = vadd.f32 0.041655596, %v2004_v40  ;;  %v2012_v18 = vadd.f32 0.008332121, %v2011_v37  ;;  %vm2217_vm14 = vcmp.lt.s32.totalorder %v5178_v47, 1  ;;  %v5193_v20 = vshll.u32 %v2193_v36, 8 }
 0x258   : > { %v5189_v29 = vshrl.u32 %v2129_v41, 30  ;;  %v2216_v60 = vor.u32 %v2215_v26, %v2214_v62  ;;  %vm2219_vm15 = vcmp.lt.s32.totalorder %v5178_v47, 3  ;;  %v2204_v13 = vor.u32 %v2203_v39, %v2202_v19 }
 0x259   : > { %v2006_v56 = vmul.f32 %v2005_v3, %v2003_v50  ;;  %v2013_v24 = vmul.f32 %v2012_v18, %v2003_v50  ;;  %vm2218_vm1 = vcmp.lt.s32.totalorder %v5178_v47, 2  ;;  %v2226_v10 = vsel %vm2220_vm0, %v2213_v25, 920167782 }
 0x25a   : > { %v2131_v63 = vshll.u32 %v5189_v29, 30  ;;  %v2230_v12 = vsel %vm2220_vm0, %v2216_v60, 1326507024  ;;  %v2229_v1 = vsel %vm2217_vm14, %v5186_v2, %v2210_v30  ;;  %vm2022_vm2 = vcmp.eq.s32.totalorder %v2020_v27, 0 }
 0x25b   : > { %v2007_v17 = vadd.f32 -0.4999988, %v2006_v56  ;;  %v2014_v23 = vadd.f32 -0.16666654, %v2013_v24  ;;  %vm2025_vm4 = vcmp.eq.s32.totalorder %v2020_v27, 2  ;;  %v2231_v4 = vsel %vm2219_vm15, %v2213_v25, %v2230_v12 }
 0x25c   : > { %v5202_v7 = vsub.s32 %v2128_v43, %v2131_v63  ;;  %vm2021_vm3 = vcmp.lt.s32.totalorder %v2020_v27, 2  ;;  %vm2018_vm8 = vweird.f32 %v4864_v35  ;;  %v2201_v36 = vshrl.u32 %v3619_v49, %v2200_v6 }
 0x25d   : > { %v2008_v15 = vmul.f32 %v2007_v17, %v2003_v50  ;;  %v2015_v14 = vmul.f32 %v2014_v23, %v2003_v50  ;;  %v2225_v57 = vsel %vm2217_vm14, %v2204_v13, %v5186_v2  ;;  %v2227_v38 = vsel %vm2219_vm15, %v2210_v30, %v2226_v10 }
 0x25e   : > { %vm2133_vm5 = vcmp.lt.s32.totalorder %v5202_v7, 0  ;;  %v2134_v16 = vsub.s32 0, %v5202_v7  ;;  %v2232_v48 = vsel %vm2218_vm1, %v2229_v1, %v2231_v4  ;;  %v2234_v19 = vand.u32 65535, %v5193_v20 }
 0x25f   : > { %v2009_v22 = vadd.f32 1.0, %v2008_v15  ;;  %v2016_v50 = vadd.f32 1.0, %v2015_v14  ;;  %v2235_v9 = vshrl.u32 %v5193_v20, 16  ;;  %v2236_v6 = vand.u32 65535, %v2232_v48 }
 0x260   : > { %v2135_v43 = vsel %vm2133_vm5, %v2134_v16, %v5202_v7  ;;  %v2237_v33 = vshrl.u32 %v2232_v48, 16  ;;  %v2228_v37 = vsel %vm2218_vm1, %v2225_v57, %v2227_v38  ;;  %v2344_v41 = vshrl.u32 %v2343_v8, 23 }
 0x261   : > { %v2136_v31 = vclz %v2135_v43  ;;  %v2017_v62 = vmul.f32 %v2016_v50, %v2001_v21  ;;  %v2026_v40 = vxor.u32 2147483648, %v2009_v22  ;;  %v2124_v39 = vadd.s32 %v5160_v45, %v5158_v28 }
 0x262   : > { %v2221_v26 = vsel %vm2217_vm14, %v2201_v36, %v2204_v13  ;;  %v2222_v3 = vsel %vm2220_vm0, %v2210_v30, 2102212464  ;;  %vm2032_vm9 = vcmp.lt.s32.totalorder %v4901_v59, 0  ;;  %v2238_v60 = vmul.u32 %v2236_v6, %v2234_v19 }
 0x263   : > { %v3436_v25 = vadd.s32 4294967294, %v2136_v31  ;;  %v2023_v18 = vxor.u32 2147483648, %v2017_v62  ;;  %v2239_v21 = vmul.u32 %v2237_v33, %v2234_v19  ;;  %v2258_v56 = vand.u32 65535, %v2228_v37 }
 0x264   : > { %v2027_v24 = vsel %vm2025_vm4, %v2026_v40, %v2017_v62  ;;  %v2240_v63 = vmul.u32 %v2236_v6, %v2235_v9  ;;  %v2259_v10 = vshrl.u32 %v2228_v37, 16  ;;  %v2241_v12 = vmul.u32 %v2237_v33, %v2235_v9 }
 0x265   : > { %vm3437_vm6 = vcmp.lt.s32.totalorder %v3436_v25, 0  ;;  %v2024_v28 = vsel %vm2022_vm2, %v2009_v22, %v2023_v18  ;;  %v2242_v13 = vshll.u32 %v2239_v21, 16  ;;  %v2154_v1 = vsub.s32 4, %v5189_v29 }
 0x266   : > { %v2139_v45 = vsel %vm3437_vm6, 0, %v3436_v25  ;;  %v2028_v17 = vsel %vm2021_vm3, %v2024_v28, %v2027_v24  ;;  %vm5241_vm7 = vcmp.le.f32.partialorder %v2030_v53, 0.7853982  ;;  %v2244_v14 = vshll.u32 %v2240_v63, 16 }
 0x267   : > { %v2140_v30 = vsub.s32 32, %v2139_v45  ;;  %v2144_v23 = vsub.s32 4294967266, %v2139_v45  ;;  %v2029_v4 = vsel %vm2018_vm8, nan, %v2028_v17  ;;  %v2141_v15 = vshll.u32 %v5202_v7, %v2139_v45 }
 0x268   : > { %vm2246_vm11 = vc.u32 %v2238_v60, %v2242_v13  ;;  %v2248_v57 = vadd.s32 %v2242_v13, %v2238_v60  ;;  %3280 = vst [vmem:[%s4036_s18 + $0x50] sm:$0xff] %v2029_v4  ;;  %v2260_v48 = vmul.u32 %v2258_v56, %v2234_v19  ;;  %v2261_v35 = vmul.u32 %v2259_v10, %v2234_v19 }
 0x269   : > { %v2142_v16 = vshrl.u32 %v2124_v39, %v2140_v30  ;;  %v2145_v27 = vadd.s32 127, %v2144_v23  ;;  %v2247_v36 = vsel %vm2246_vm11, 1, %v3625_v54  ;;  %v2262_v22 = vmul.u32 %v2258_v56, %v2235_v9 }
 0x26a   : > { %v2249_v38 = vadd.s32 %v2247_v36, %v2241_v12  ;;  %v2243_v53 = vshrl.u32 %v2239_v21, 16  ;;  %vm2250_vm12 = vc.u32 %v2248_v57, %v2244_v14  ;;  %v2263_v6 = vmul.u32 %v2259_v10, %v2235_v9 }
 0x26b   : > { %v2143_v50 = vor.u32 %v2142_v16, %v2141_v15  ;;  %v2146_v43 = vshll.u32 %v2145_v27, 23  ;;  %v2251_v31 = vsel %vm2250_vm12, 1, %v3625_v54  ;;  %v2264_v7 = vshll.u32 %v2261_v35, 16 }
 0x26c   : > { %v2266_v33 = vshll.u32 %v2262_v22, 16  ;;  %v2155_v40 = vsel %vm2032_vm9, %v2154_v1, %v5189_v29  ;;  %v2223_v37 = vsel %vm2219_vm15, %v5186_v2, %v2222_v3  ;;  %v2253_v19 = vadd.s32 %v2251_v31, %v2249_v38 }
 0x26d   : > { %v2147_v62 = vor.u32 4788187, %v2146_v43  ;;  %v2245_v39 = vshrl.u32 %v2240_v63, 16  ;;  %vm2268_vm10 = vc.u32 %v2260_v48, %v2264_v7  ;;  %v2270_v25 = vadd.s32 %v2264_v7, %v2260_v48 }
 0x26e   : > { %v3441_v18 = vadd.s32 4294967169, %v2344_v41  ;;  %v2150_v21 = vcvt.s32.f32 %v2143_v50  ;;  %v2254_v56 = vadd.s32 %v2253_v19, %v2243_v53  ;;  %v2269_v9 = vsel %vm2268_vm10, 1, %v3625_v54 }
 0x26f   : > { %v2148_v60 = vand.u32 2147483647, %v2147_v62  ;;  %v2265_v24 = vshrl.u32 %v2261_v35, 16  ;;  %v2271_v10 = vadd.s32 %v2269_v9, %v2263_v6  ;;  %vm2272_vm13 = vc.u32 %v2270_v25, %v2266_v33 }
 0x270   : > { %v2350_v28 = vadd.s32 1, %v3441_v18  ;;  %v2157_v29 = vsel %vm5241_vm7, 0, %v2155_v40  ;;  %v2273_v2 = vsel %vm2272_vm13, 1, %v3625_v54  ;;  %v2340_v3 = vand.u32 2147483647, %v5167_v52 }
 0x271   : > { %v2151_v45 = vmul.f32 %v2150_v21, %v2148_v60  ;;  %v2224_v41 = vsel %vm2218_vm1, %v2221_v26, %v2223_v37  ;;  %v2267_v63 = vshrl.u32 %v2262_v22, 16  ;;  %v2275_v12 = vadd.s32 %v2273_v2, %v2271_v10 }
 0x272   : > { %vm2351_vm0 = vcmp.gt.s32.totalorder %v2350_v28, 0  ;;  %v5262_v17 = vadd.s32 %v2254_v56, %v2245_v39  ;;  %v5264_v30 = vadd.s32 %v2270_v25, %v2266_v33  ;;  %v2174_v14 = vadd.s32 3, %v2157_v29 }
 0x273   : > { %v2152_v13 = vxor.u32 2147483648, %v2151_v45  ;;  %v2352_v23 = vsel %vm2351_vm0, %v2350_v28, 0  ;;  %v2276_v1 = vadd.s32 %v2275_v12, %v2265_v24  ;;  %v2278_v16 = vmul.u32 %v5193_v20, %v2224_v41 }
 0x274   : > { %v2354_v4 = vand.u32 31, %v2352_v23  ;;  %v2347_v27 = vand.u32 8388607, %v2340_v3  ;;  %vm2280_vm14 = vc.u32 %v5262_v17, %v5264_v30  ;;  %v5278_v38 = vshrl.u32 %v2352_v23, 5 }
 0x275   : > { %v2153_v15 = vsel %vm2032_vm9, %v2152_v13, %v2151_v45  ;;  %v2277_v26 = vadd.s32 %v2276_v1, %v2267_v63  ;;  %v2175_v19 = vand.u32 3, %v2174_v14  ;;  %vm2173_vm6 = vweird.f32 %v4901_v59 }
 0x276   : > { %v2156_v47 = vsel %vm5241_vm7, %v4901_v59, %v2153_v15  ;;  %v5274_v36 = vsub.s32 32, %v2354_v4  ;;  %v2360_v48 = vshll.u32 %v3620_v51, %v2354_v4  ;;  %v2363_v8 = vshll.u32 %v3621_v55, %v2354_v4 }
 0x277   : > { %v2158_v57 = vmul.f32 %v2156_v47, %v2156_v47  ;;  %v2281_v35 = vadd.s32 1, %v2277_v26  ;;  %v2366_v22 = vshll.u32 %v3622_v58, %v2354_v4  ;;  %v2357_v7 = vshll.u32 %v3619_v49, %v2354_v4 }
 0x278   : > { %v2361_v20 = vshrl.u32 %v3621_v55, %v5274_v36  ;;  %v2364_v53 = vshrl.u32 %v3622_v58, %v5274_v36  ;;  %v2367_v31 = vshrl.u32 %v3623_v61, %v5274_v36  ;;  %v2358_v33 = vshrl.u32 %v3620_v51, %v5274_v36 }
 0x279   : > { %v2159_v50 = vmul.f32 -0.001358992, %v2158_v57  ;;  %v2166_v43 = vmul.f32 -0.00019511016, %v2158_v57  ;;  %v2282_v6 = vsel %vm2280_vm14, %v2281_v35, %v2277_v26  ;;  %v2369_v62 = vshll.u32 %v3623_v61, %v2354_v4 }
 0x27a   : > { %v2283_v39 = vadd.s32 %v2282_v6, %v2278_v16  ;;  %v2348_v25 = vor.u32 8388608, %v2347_v27  ;;  %v5293_v18 = vor.u32 %v2361_v20, %v2360_v48  ;;  %v2368_v60 = vor.u32 %v2367_v31, %v2366_v22 }
 0x27b   : > { %v2160_v40 = vadd.f32 0.041655596, %v2159_v50  ;;  %v2167_v37 = vadd.f32 0.008332121, %v2166_v43  ;;  %v2370_v21 = vshrl.u32 %v3624_v0, %v5274_v36  ;;  %v5297_v10 = vor.u32 %v2364_v53, %v2363_v8 }
 0x27c   : > { %v2284_v24 = vadd.s32 536870912, %v2283_v39  ;;  %v5299_v28 = vor.u32 %v2358_v33, %v2357_v7  ;;  %vm2372_vm15 = vcmp.lt.s32.totalorder %v5278_v38, 1  ;;  %vm2375_vm1 = vcmp.lt.s32.totalorder %v5278_v38, 4 }
 0x27d   : > { %v2161_v56 = vmul.f32 %v2160_v40, %v2158_v57  ;;  %v2168_v9 = vmul.f32 %v2167_v37, %v2158_v57  ;;  %v2371_v45 = vor.u32 %v2370_v21, %v2369_v62  ;;  %vm2374_vm2 = vcmp.lt.s32.totalorder %v5278_v38, 3 }
 0x27e   : > { %v5303_v41 = vshrl.u32 %v2284_v24, 30  ;;  %vm2373_vm4 = vcmp.lt.s32.totalorder %v5278_v38, 2  ;;  %v2381_v63 = vsel %vm2375_vm1, %v2368_v60, 920167782  ;;  %v5311_v13 = vshll.u32 %v2348_v25, 8 }
 0x27f   : > { %v2162_v29 = vadd.f32 -0.4999988, %v2161_v56  ;;  %v2169_v2 = vadd.f32 -0.16666654, %v2168_v9  ;;  %v2385_v12 = vsel %vm2375_vm1, %v2371_v45, 1326507024  ;;  %v2384_v15 = vsel %vm2372_vm15, %v5293_v18, %v5297_v10 }
 0x280   : > { %v2286_v4 = vshll.u32 %v5303_v41, 30  ;;  %v2380_v14 = vsel %vm2372_vm15, %v5299_v28, %v5293_v18  ;;  %v2386_v16 = vsel %vm2374_vm2, %v2368_v60, %v2385_v12  ;;  %vm2176_vm3 = vcmp.lt.s32.totalorder %v2175_v19, 2 }
 0x281   : > { %v2163_v23 = vmul.f32 %v2162_v29, %v2158_v57  ;;  %v2170_v1 = vmul.f32 %v2169_v2, %v2158_v57  ;;  %v2382_v57 = vsel %vm2374_vm2, %v5297_v10, %v2381_v63  ;;  %v2387_v35 = vsel %vm2373_vm4, %v2384_v15, %v2386_v16 }
 0x282   : > { %v2287_v48 = vsub.s32 %v2283_v39, %v2286_v4  ;;  %v2389_v20 = vand.u32 65535, %v5311_v13  ;;  %v2383_v43 = vsel %vm2373_vm4, %v2380_v14, %v2382_v57  ;;  %v2390_v53 = vshrl.u32 %v5311_v13, 16 }
 0x283   : > { %v2164_v26 = vadd.f32 1.0, %v2163_v23  ;;  %v2171_v27 = vadd.f32 1.0, %v2170_v1  ;;  %v2391_v31 = vand.u32 65535, %v2387_v35  ;;  %v2392_v6 = vshrl.u32 %v2387_v35, 16 }
 0x284   : > { %vm2288_vm5 = vcmp.lt.s32.totalorder %v2287_v48, 0  ;;  %v2289_v50 = vsub.s32 0, %v2287_v48  ;;  %vm2177_vm8 = vcmp.eq.s32.totalorder %v2175_v19, 0  ;;  %vm2180_vm9 = vcmp.eq.s32.totalorder %v2175_v19, 2 }
 0x285   : > { %v2172_v8 = vmul.f32 %v2171_v27, %v2156_v47  ;;  %v2181_v22 = vxor.u32 2147483648, %v2164_v26  ;;  %v2394_v37 = vmul.u32 %v2392_v6, %v2389_v20  ;;  %v2413_v39 = vand.u32 65535, %v2383_v43 }
 0x286   : > { %v2290_v33 = vsel %vm2288_vm5, %v2289_v50, %v2287_v48  ;;  %v2393_v47 = vmul.u32 %v2391_v31, %v2389_v20  ;;  %v2395_v60 = vmul.u32 %v2391_v31, %v2390_v53  ;;  %v2414_v21 = vshrl.u32 %v2383_v43, 16 }
 0x287   : > { %v2178_v7 = vxor.u32 2147483648, %v2172_v8  ;;  %v2182_v62 = vsel %vm2180_vm9, %v2181_v22, %v2172_v8  ;;  %v2291_v40 = vclz %v2290_v33  ;;  %v2279_v9 = vadd.s32 %v5264_v30, %v5262_v17 }
 0x288   : > { %v2396_v29 = vmul.u32 %v2392_v6, %v2390_v53  ;;  %v2397_v2 = vshll.u32 %v2394_v37, 16  ;;  %v2498_v63 = vand.u32 2139095040, %v3758_v42  ;;  %v2398_v12 = vshrl.u32 %v2394_v37, 16 }
 0x289   : > { %v2179_v25 = vsel %vm2177_vm8, %v2164_v26, %v2178_v7  ;;  %v3439_v24 = vadd.s32 4294967294, %v2291_v40  ;;  %v2399_v23 = vshll.u32 %v2395_v60, 16  ;;  %v2415_v1 = vmul.u32 %v2413_v39, %v2389_v20 }
 0x28a   : > { %v2183_v56 = vsel %vm2176_vm3, %v2179_v25, %v2182_v62  ;;  %vm2401_vm11 = vc.u32 %v2393_v47, %v2397_v2  ;;  %v2403_v15 = vadd.s32 %v2397_v2, %v2393_v47  ;;  %v2416_v59 = vmul.u32 %v2414_v21, %v2389_v20 }
 0x28b   : > { %v2184_v45 = vsel %vm2173_vm6, nan, %v2183_v56  ;;  %vm3440_vm7 = vcmp.lt.s32.totalorder %v3439_v24, 0  ;;  %v2402_v17 = vsel %vm2401_vm11, 1, %v3625_v54  ;;  %v2417_v26 = vmul.u32 %v2413_v39, %v2390_v53 }
 0x28c   : > { %3281 = vst [vmem:[%s4036_s18 + $0x58] sm:$0xff] %v2184_v45  ;;  %v2294_v4 = vsel %vm3440_vm7, 0, %v3439_v24  ;;  %v2404_v30 = vadd.s32 %v2402_v17, %v2396_v29  ;;  %vm2405_vm12 = vc.u32 %v2403_v15, %v2399_v23  ;;  %v2418_v27 = vmul.u32 %v2414_v21, %v2390_v53 }
 0x28d   : > { %v2295_v19 = vsub.s32 32, %v2294_v4  ;;  %v2296_v14 = vshll.u32 %v2287_v48, %v2294_v4  ;;  %v2299_v16 = vsub.s32 4294967266, %v2294_v4  ;;  %v2406_v8 = vsel %vm2405_vm12, 1, %v3625_v54 }
 0x28e   : > { %v2419_v22 = vshll.u32 %v2416_v59, 16  ;;  %v2356_v50 = vshrl.u32 %v3619_v49, %v5274_v36  ;;  %v2377_v20 = vsel %vm2375_vm1, %v5297_v10, 2102212464  ;;  %v2408_v48 = vadd.s32 %v2406_v8, %v2404_v30 }
 0x28f   : > { %v2297_v57 = vshrl.u32 %v2279_v9, %v2295_v19  ;;  %v2300_v35 = vadd.s32 127, %v2299_v16  ;;  %v2421_v43 = vshll.u32 %v2417_v26, 16  ;;  %v2309_v53 = vsub.s32 4, %v5303_v41 }
 0x290   : > { %vm2423_vm10 = vc.u32 %v2415_v1, %v2419_v22  ;;  %v2425_v7 = vadd.s32 %v2419_v22, %v2415_v1  ;;  %v2409_v33 = vadd.s32 %v2408_v48, %v2398_v12  ;;  %v2499_v40 = vshrl.u32 %v2498_v63, 23 }
 0x291   : > { %v2298_v31 = vor.u32 %v2297_v57, %v2296_v14  ;;  %v2301_v6 = vshll.u32 %v2300_v35, 23  ;;  %v2424_v62 = vsel %vm2423_vm10, 1, %v3625_v54  ;;  %v2420_v39 = vshrl.u32 %v2416_v59, 16 }
 0x292   : > { %v2426_v25 = vadd.s32 %v2424_v62, %v2418_v27  ;;  %vm2427_vm13 = vc.u32 %v2425_v7, %v2421_v43  ;;  %v2400_v36 = vshrl.u32 %v2395_v60, 16  ;;  %v3444_v10 = vadd.s32 4294967169, %v2499_v40 }
 0x293   : > { %v2302_v37 = vor.u32 4788187, %v2301_v6  ;;  %v2428_v47 = vsel %vm2427_vm13, 1, %v3625_v54  ;;  %vm2187_vm0 = vcmp.lt.s32.totalorder %v4931_v32, 0  ;;  %v2305_v56 = vcvt.s32.f32 %v2298_v31 }
 0x294   : > { %v2430_v9 = vadd.s32 %v2428_v47, %v2426_v25  ;;  %v2376_v24 = vsel %vm2372_vm15, %v2356_v50, %v5299_v28  ;;  %v2378_v45 = vsel %vm2374_vm2, %v5293_v18, %v2377_v20  ;;  %v2410_v29 = vadd.s32 %v2409_v33, %v2400_v36 }
 0x295   : > { %v2303_v21 = vand.u32 2147483647, %v2302_v37  ;;  %v2505_v2 = vadd.s32 1, %v3444_v10  ;;  %v2310_v60 = vsel %vm2187_vm0, %v2309_v53, %v5303_v41  ;;  %v2422_v12 = vshrl.u32 %v2417_v26, 16 }
 0x296   : > { %v2431_v23 = vadd.s32 %v2430_v9, %v2420_v39  ;;  %vm5361_vm14 = vcmp.le.f32.partialorder %v2185_v44, 0.7853982  ;;  %v2429_v28 = vadd.s32 %v2425_v7, %v2421_v43  ;;  %v2379_v18 = vsel %vm2373_vm4, %v2376_v24, %v2378_v45 }
 0x297   : > { %v2306_v63 = vmul.f32 %v2305_v56, %v2303_v21  ;;  %vm2506_vm15 = vcmp.gt.s32.totalorder %v2505_v2, 0  ;;  %v2312_v19 = vsel %vm5361_vm14, 0, %v2310_v60  ;;  %v2433_v17 = vmul.u32 %v5311_v13, %v2379_v18 }
 0x298   : > { %v2432_v15 = vadd.s32 %v2431_v23, %v2422_v12  ;;  %v2507_v59 = vsel %vm2506_vm15, %v2505_v2, 0  ;;  %vm2435_vm1 = vc.u32 %v2410_v29, %v2429_v28  ;;  %v2495_v38 = vand.u32 2147483647, %v3758_v42 }
 0x299   : > { %v2307_v4 = vxor.u32 2147483648, %v2306_v63  ;;  %v2509_v41 = vand.u32 31, %v2507_v59  ;;  %v2329_v27 = vadd.s32 3, %v2312_v19  ;;  %v5392_v39 = vshrl.u32 %v2507_v59, 5 }
 0x29a   : > { %v2436_v44 = vadd.s32 1, %v2432_v15  ;;  %v2502_v7 = vand.u32 8388607, %v2495_v38  ;;  %v5400_v45 = vadd.s32 %v2429_v28, %v2410_v29  ;;  %v2653_v1 = vand.u32 2139095040, %v3777_v5 }
 0x29b   : > { %v2308_v14 = vsel %vm2187_vm0, %v2307_v4, %v2306_v63  ;;  %v2510_v30 = vsub.s32 32, %v2509_v41  ;;  %v2512_v35 = vshll.u32 %v3619_v49, %v2509_v41  ;;  %v2515_v50 = vshll.u32 %v3620_v51, %v2509_v41 }
 0x29c   : > { %v5374_v16 = vsel %vm5361_vm14, %v4931_v32, %v2308_v14  ;;  %v2437_v57 = vsel %vm2435_vm1, %v2436_v44, %v2432_v15  ;;  %v2521_v20 = vshll.u32 %v3622_v58, %v2509_v41  ;;  %v2518_v53 = vshll.u32 %v3621_v55, %v2509_v41 }
 0x29d   : > { %v2313_v26 = vmul.f32 %v5374_v16, %v5374_v16  ;;  %v2438_v8 = vadd.s32 %v2437_v57, %v2433_v17  ;;  %v2513_v22 = vshrl.u32 %v3620_v51, %v2510_v30  ;;  %v2516_v13 = vshrl.u32 %v3621_v55, %v2510_v30 }
 0x29e   : > { %v2522_v31 = vshrl.u32 %v3623_v61, %v2510_v30  ;;  %v2519_v33 = vshrl.u32 %v3622_v58, %v2510_v30  ;;  %v5390_v37 = vand.u32 3, %v2329_v27  ;;  %v2524_v47 = vshll.u32 %v3623_v61, %v2509_v41 }
 0x29f   : > { %v2314_v48 = vmul.f32 -0.001358992, %v2313_v26  ;;  %v2321_v43 = vmul.f32 -0.00019511016, %v2313_v26  ;;  %v2439_v6 = vadd.s32 536870912, %v2438_v8  ;;  %v2525_v10 = vshrl.u32 %v3624_v0, %v2510_v30 }
 0x2a0   : > { %v2523_v36 = vor.u32 %v2522_v31, %v2521_v20  ;;  %v2514_v9 = vor.u32 %v2513_v22, %v2512_v35  ;;  %v5398_v24 = vor.u32 %v2516_v13, %v2515_v50  ;;  %v2503_v63 = vor.u32 8388608, %v2502_v7 }
 0x2a1   : > { %v2315_v62 = vadd.f32 0.041655596, %v2314_v48  ;;  %v2322_v40 = vadd.f32 0.008332121, %v2321_v43  ;;  %v5394_v25 = vshrl.u32 %v2439_v6, 30  ;;  %v2520_v60 = vor.u32 %v2519_v33, %v2518_v53 }
 0x2a2   : > { %vm2530_vm2 = vcmp.lt.s32.totalorder %v5392_v39, 4  ;;  %vm2332_vm4 = vcmp.eq.s32.totalorder %v5390_v37, 0  ;;  %vm2335_vm3 = vcmp.eq.s32.totalorder %v5390_v37, 2  ;;  %v2526_v18 = vor.u32 %v2525_v10, %v2524_v47 }
 0x2a3   : > { %v2316_v21 = vmul.f32 %v2315_v62, %v2313_v26  ;;  %v2323_v56 = vmul.f32 %v2322_v40, %v2313_v26  ;;  %v2441_v2 = vshll.u32 %v5394_v25, 30  ;;  %vm2527_vm5 = vcmp.lt.s32.totalorder %v5392_v39, 1 }
 0x2a4   : > { %v2536_v29 = vsel %vm2530_vm2, %v2523_v36, 920167782  ;;  %vm2331_vm8 = vcmp.lt.s32.totalorder %v5390_v37, 2  ;;  %vm2529_vm9 = vcmp.lt.s32.totalorder %v5392_v39, 3  ;;  %v2535_v59 = vsel %vm2527_vm5, %v2514_v9, %v5398_v24 }
 0x2a5   : > { %v2317_v12 = vadd.f32 -0.4999988, %v2316_v21  ;;  %v2324_v23 = vadd.f32 -0.16666654, %v2323_v56  ;;  %v5407_v4 = vsub.s32 %v2438_v8, %v2441_v2  ;;  %vm2328_vm6 = vweird.f32 %v4931_v32 }
 0x2a6   : > { %vm2342_vm7 = vcmp.lt.s32.totalorder %v5167_v52, 0  ;;  %v2537_v41 = vsel %vm2529_vm9, %v2520_v60, %v2536_v29  ;;  %v5423_v14 = vshll.u32 %v2503_v63, 8  ;;  %vm2528_vm12 = vcmp.lt.s32.totalorder %v5392_v39, 2 }
 0x2a7   : > { %v2318_v28 = vmul.f32 %v2317_v12, %v2313_v26  ;;  %v2325_v15 = vmul.f32 %v2324_v23, %v2313_v26  ;;  %vm2443_vm11 = vcmp.lt.s32.totalorder %v5407_v4, 0  ;;  %v2444_v19 = vsub.s32 0, %v5407_v4 }
 0x2a8   : > { %v2539_v26 = vsel %vm2527_vm5, %v5398_v24, %v2520_v60  ;;  %v2511_v57 = vshrl.u32 %v3619_v49, %v2510_v30  ;;  %v2538_v35 = vsel %vm2528_vm12, %v2535_v59, %v2537_v41  ;;  %v2540_v8 = vsel %vm2530_vm2, %v2526_v18, 1326507024 }
 0x2a9   : > { %v2319_v44 = vadd.f32 1.0, %v2318_v28  ;;  %v2326_v17 = vadd.f32 1.0, %v2325_v15  ;;  %v2445_v27 = vsel %vm2443_vm11, %v2444_v19, %v5407_v4  ;;  %v2541_v48 = vsel %vm2529_vm9, %v2523_v36, %v2540_v8 }
 0x2aa   : > { %v2446_v20 = vclz %v2445_v27  ;;  %v2542_v43 = vsel %vm2528_vm12, %v2539_v26, %v2541_v48  ;;  %v2544_v13 = vand.u32 65535, %v5423_v14  ;;  %v2545_v30 = vshrl.u32 %v5423_v14, 16 }
 0x2ab   : > { %v2327_v22 = vmul.f32 %v2326_v17, %v5374_v16  ;;  %v2336_v50 = vxor.u32 2147483648, %v2319_v44  ;;  %v2654_v31 = vshrl.u32 %v2653_v1, 23  ;;  %v2464_v53 = vsub.s32 4, %v5394_v25 }
 0x2ac   : > { %v3442_v7 = vadd.s32 4294967294, %v2446_v20  ;;  %v2546_v33 = vand.u32 65535, %v2542_v43  ;;  %v5445_v16 = vsel %vm2527_vm5, %v2511_v57, %v2514_v9  ;;  %v2532_v62 = vsel %vm2530_vm2, %v2520_v60, 2102212464 }
 0x2ad   : > { %v2333_v6 = vxor.u32 2147483648, %v2327_v22  ;;  %v2547_v40 = vshrl.u32 %v2542_v43, 16  ;;  %v2568_v36 = vand.u32 65535, %v2538_v35  ;;  %v2337_v10 = vsel %vm2335_vm3, %v2336_v50, %v2327_v22 }
 0x2ae   : > { %vm3443_vm10 = vcmp.lt.s32.totalorder %v3442_v7, 0  ;;  %v2569_v21 = vshrl.u32 %v2538_v35, 16  ;;  %vm5457_vm13 = vcmp.le.f32.partialorder %v2340_v3, 0.7853982  ;;  %v2550_v60 = vmul.u32 %v2546_v33, %v2545_v30 }
 0x2af   : > { %v2334_v47 = vsel %vm2332_vm4, %v2319_v44, %v2333_v6  ;;  %v2449_v2 = vsel %vm3443_vm10, 0, %v3442_v7  ;;  %v2549_v63 = vmul.u32 %v2547_v40, %v2544_v13  ;;  %v2465_v18 = vsel %vm2342_vm7, %v2464_v53, %v5394_v25 }
 0x2b0   : > { %v2338_v56 = vsel %vm2331_vm8, %v2334_v47, %v2337_v10  ;;  %v2450_v23 = vsub.s32 32, %v2449_v2  ;;  %v2454_v1 = vsub.s32 4294967266, %v2449_v2  ;;  %v2548_v37 = vmul.u32 %v2546_v33, %v2544_v13 }
 0x2b1   : > { %v2339_v12 = vsel %vm2328_vm6, nan, %v2338_v56  ;;  %v2552_v29 = vshll.u32 %v2549_v63, 16  ;;  %v2570_v28 = vmul.u32 %v2568_v36, %v2544_v13  ;;  %v2572_v15 = vmul.u32 %v2568_v36, %v2545_v30 }
 0x2b2   : > { %3282 = vst [vmem:[%s4036_s18 + $0x60] sm:$0xff] %v2339_v12  ;;  %v2451_v3 = vshll.u32 %v5407_v4, %v2449_v2  ;;  %v2452_v59 = vshrl.u32 %v5400_v45, %v2450_v23  ;;  %v2455_v19 = vadd.s32 127, %v2454_v1  ;;  %v2571_v41 = vmul.u32 %v2569_v21, %v2544_v13 }
 0x2b3   : > { %v2551_v44 = vmul.u32 %v2547_v40, %v2545_v30  ;;  %v2554_v32 = vshll.u32 %v2550_v60, 16  ;;  %vm2556_vm0 = vc.u32 %v2548_v37, %v2552_v29  ;;  %v2558_v17 = vadd.s32 %v2552_v29, %v2548_v37 }
 0x2b4   : > { %v2453_v26 = vor.u32 %v2452_v59, %v2451_v3  ;;  %v2456_v27 = vshll.u32 %v2455_v19, 23  ;;  %v2557_v57 = vsel %vm2556_vm0, 1, %v3625_v54  ;;  %v2574_v25 = vshll.u32 %v2571_v41, 16 }
 0x2b5   : > { %v2553_v35 = vshrl.u32 %v2549_v63, 16  ;;  %v2559_v8 = vadd.s32 %v2557_v57, %v2551_v44  ;;  %vm2560_vm14 = vc.u32 %v2558_v17, %v2554_v32  ;;  %v2573_v22 = vmul.u32 %v2569_v21, %v2545_v30 }
 0x2b6   : > { %v2457_v50 = vor.u32 4788187, %v2456_v27  ;;  %v2561_v4 = vsel %vm2560_vm14, 1, %v3625_v54  ;;  %v2576_v20 = vshll.u32 %v2572_v15, 16  ;;  %vm2578_vm15 = vc.u32 %v2570_v28, %v2574_v25 }
 0x2b7   : > { %v2563_v45 = vadd.s32 %v2561_v4, %v2559_v8  ;;  %v2579_v48 = vsel %vm2578_vm15, 1, %v3625_v54  ;;  %v2580_v43 = vadd.s32 %v2574_v25, %v2570_v28  ;;  %v3447_v13 = vadd.s32 4294967169, %v2654_v31 }
 0x2b8   : > { %v2458_v6 = vand.u32 2147483647, %v2457_v50  ;;  %v2460_v7 = vcvt.s32.f32 %v2453_v26  ;;  %v2467_v53 = vsel %vm5457_vm13, 0, %v2465_v18  ;;  %v2581_v33 = vadd.s32 %v2579_v48, %v2573_v22 }
 0x2b9   : > { %v2533_v30 = vsel %vm2529_vm9, %v5398_v24, %v2532_v62  ;;  %v2564_v40 = vadd.s32 %v2563_v45, %v2553_v35  ;;  %vm2582_vm1 = vc.u32 %v2580_v43, %v2576_v20  ;;  %v2660_v36 = vadd.s32 1, %v3447_v13 }
 0x2ba   : > { %v2461_v47 = vmul.f32 %v2460_v7, %v2458_v6  ;;  %v2555_v10 = vshrl.u32 %v2550_v60, 16  ;;  %v2583_v21 = vsel %vm2582_vm1, 1, %v3625_v54  ;;  %v2650_v56 = vand.u32 2147483647, %v3777_v5 }
 0x2bb   : > { %v2484_v31 = vadd.s32 3, %v2467_v53  ;;  %v2575_v2 = vshrl.u32 %v2571_v41, 16  ;;  %v2585_v63 = vadd.s32 %v2583_v21, %v2581_v33  ;;  %vm2661_vm2 = vcmp.gt.s32.totalorder %v2660_v36, 0 }
 0x2bc   : > { %v2462_v12 = vxor.u32 2147483648, %v2461_v47  ;;  %v2534_v23 = vsel %vm2528_vm12, %v5445_v16, %v2533_v30  ;;  %v5482_v1 = vadd.s32 %v2564_v40, %v2555_v10  ;;  %v2662_v24 = vsel %vm2661_vm2, %v2660_v36, 0 }
 0x2bd   : > { %v2577_v62 = vshrl.u32 %v2572_v15, 16  ;;  %v2586_v18 = vadd.s32 %v2585_v63, %v2575_v2  ;;  %v5486_v37 = vadd.s32 %v2580_v43, %v2576_v20  ;;  %v2657_v29 = vand.u32 8388607, %v2650_v56 }
 0x2be   : > { %v2463_v60 = vsel %vm2342_vm7, %v2462_v12, %v2461_v47  ;;  %v2664_v28 = vand.u32 31, %v2662_v24  ;;  %v5493_v39 = vand.u32 3, %v2484_v31  ;;  %v2588_v59 = vmul.u32 %v5423_v14, %v2534_v23 }
 0x2bf   : > { %v2466_v3 = vsel %vm5457_vm13, %v5167_v52, %v2463_v60  ;;  %v2587_v16 = vadd.s32 %v2586_v18, %v2577_v62  ;;  %vm2590_vm4 = vc.u32 %v5482_v1, %v5486_v37  ;;  %v5498_v19 = vshrl.u32 %v2662_v24, 5 }
 0x2c0   : > { %v2468_v15 = vmul.f32 %v2466_v3, %v2466_v3  ;;  %v5500_v41 = vsub.s32 32, %v2664_v28  ;;  %v2667_v32 = vshll.u32 %v3619_v49, %v2664_v28  ;;  %v2670_v17 = vshll.u32 %v3620_v51, %v2664_v28 }
 0x2c1   : > { %v2591_v44 = vadd.s32 1, %v2587_v16  ;;  %v2673_v9 = vshll.u32 %v3621_v55, %v2664_v28  ;;  %v2676_v57 = vshll.u32 %v3622_v58, %v2664_v28  ;;  %v2679_v45 = vshll.u32 %v3623_v61, %v2664_v28 }
 0x2c2   : > { %v2469_v26 = vmul.f32 -0.001358992, %v2468_v15  ;;  %v2476_v27 = vmul.f32 -0.00019511016, %v2468_v15  ;;  %v2668_v14 = vshrl.u32 %v3620_v51, %v5500_v41  ;;  %v2671_v35 = vshrl.u32 %v3621_v55, %v5500_v41 }
 0x2c3   : > { %v2592_v25 = vsel %vm2590_vm4, %v2591_v44, %v2587_v16  ;;  %v2674_v8 = vshrl.u32 %v3622_v58, %v5500_v41  ;;  %v2677_v22 = vshrl.u32 %v3623_v61, %v5500_v41  ;;  %v2680_v6 = vshrl.u32 %v3624_v0, %v5500_v41 }
 0x2c4   : > { %v2470_v50 = vadd.f32 0.041655596, %v2469_v26  ;;  %v2477_v4 = vadd.f32 0.008332121, %v2476_v27  ;;  %v2593_v20 = vadd.s32 %v2592_v25, %v2588_v59  ;;  %v5515_v48 = vor.u32 %v2668_v14, %v2667_v32 }
 0x2c5   : > { %v5517_v43 = vor.u32 %v2671_v35, %v2670_v17  ;;  %v2678_v13 = vor.u32 %v2677_v22, %v2676_v57  ;;  %v2675_v30 = vor.u32 %v2674_v8, %v2673_v9  ;;  %v2658_v40 = vor.u32 8388608, %v2657_v29 }
 0x2c6   : > { %v2471_v7 = vmul.f32 %v2470_v50, %v2468_v15  ;;  %v2478_v53 = vmul.f32 %v2477_v4, %v2468_v15  ;;  %v2594_v33 = vadd.s32 536870912, %v2593_v20  ;;  %v2681_v36 = vor.u32 %v2680_v6, %v2679_v45 }
 0x2c7   : > { %vm2682_vm3 = vcmp.lt.s32.totalorder %v5498_v19, 1  ;;  %vm2685_vm5 = vcmp.lt.s32.totalorder %v5498_v19, 4  ;;  %vm2684_vm8 = vcmp.lt.s32.totalorder %v5498_v19, 3  ;;  %vm2486_vm9 = vcmp.lt.s32.totalorder %v5493_v39, 2 }
 0x2c8   : > { %v2472_v47 = vadd.f32 -0.4999988, %v2471_v7  ;;  %v2479_v10 = vadd.f32 -0.16666654, %v2478_v53  ;;  %v5522_v21 = vshrl.u32 %v2594_v33, 30  ;;  %v2690_v31 = vsel %vm2682_vm3, %v5515_v48, %v5517_v43 }
 0x2c9   : > { %v2691_v2 = vsel %vm2685_vm5, %v2678_v13, 920167782  ;;  %v2695_v63 = vsel %vm2685_vm5, %v2681_v36, 1326507024  ;;  %v2694_v62 = vsel %vm2682_vm3, %v5517_v43, %v2675_v30  ;;  %vm2483_vm6 = vweird.f32 %v5167_v52 }
 0x2ca   : > { %v2473_v12 = vmul.f32 %v2472_v47, %v2468_v15  ;;  %v2480_v23 = vmul.f32 %v2479_v10, %v2468_v15  ;;  %v2596_v24 = vshll.u32 %v5522_v21, 30  ;;  %v2692_v18 = vsel %vm2684_vm8, %v2675_v30, %v2691_v2 }
 0x2cb   : > { %v2696_v60 = vsel %vm2684_vm8, %v2678_v13, %v2695_v63  ;;  %v5544_v29 = vshll.u32 %v2658_v40, 8  ;;  %v2808_v28 = vand.u32 2139095040, %v3805_v34  ;;  %vm2683_vm7 = vcmp.lt.s32.totalorder %v5498_v19, 2 }
 0x2cc   : > { %v2474_v16 = vadd.f32 1.0, %v2473_v12  ;;  %v2481_v59 = vadd.f32 1.0, %v2480_v23  ;;  %v2597_v15 = vsub.s32 %v2593_v20, %v2596_v24  ;;  %vm2487_vm11 = vcmp.eq.s32.totalorder %v5493_v39, 0 }
 0x2cd   : > { %vm2490_vm12 = vcmp.eq.s32.totalorder %v5493_v39, 2  ;;  %v2693_v44 = vsel %vm2683_vm7, %v2690_v31, %v2692_v18  ;;  %v2697_v32 = vsel %vm2683_vm7, %v2694_v62, %v2696_v60  ;;  %v2699_v27 = vand.u32 65535, %v5544_v29 }
 0x2ce   : > { %v2482_v17 = vmul.f32 %v2481_v59, %v2466_v3  ;;  %v2491_v9 = vxor.u32 2147483648, %v2474_v16  ;;  %vm2598_vm10 = vcmp.lt.s32.totalorder %v2597_v15, 0  ;;  %v2599_v26 = vsub.s32 0, %v2597_v15 }
 0x2cf   : > { %v2700_v14 = vshrl.u32 %v5544_v29, 16  ;;  %v2701_v57 = vand.u32 65535, %v2697_v32  ;;  %v2702_v25 = vshrl.u32 %v2697_v32, 16  ;;  %v2589_v8 = vadd.s32 %v5486_v37, %v5482_v1 }
 0x2d0   : > { %v2488_v35 = vxor.u32 2147483648, %v2482_v17  ;;  %v2600_v22 = vsel %vm2598_vm10, %v2599_v26, %v2597_v15  ;;  %v2809_v50 = vshrl.u32 %v2808_v28, 23  ;;  %v2666_v20 = vshrl.u32 %v3619_v49, %v5500_v41 }
 0x2d1   : > { %v2601_v4 = vclz %v2600_v22  ;;  %v2704_v3 = vmul.u32 %v2702_v25, %v2699_v27  ;;  %v2724_v45 = vshrl.u32 %v2693_v44, 16  ;;  %v2492_v6 = vsel %vm2490_vm12, %v2491_v9, %v2482_v17 }
 0x2d2   : > { %v2489_v13 = vsel %vm2487_vm11, %v2474_v16, %v2488_v35  ;;  %v2705_v7 = vmul.u32 %v2701_v57, %v2700_v14  ;;  %v2723_v53 = vand.u32 65535, %v2693_v44  ;;  %v2619_v33 = vsub.s32 4, %v5522_v21 }
 0x2d3   : > { %v2493_v1 = vsel %vm2486_vm9, %v2489_v13, %v2492_v6  ;;  %v3445_v37 = vadd.s32 4294967294, %v2601_v4  ;;  %v2687_v41 = vsel %vm2685_vm5, %v2675_v30, 2102212464  ;;  %v2703_v36 = vmul.u32 %v2701_v57, %v2699_v27 }
 0x2d4   : > { %v2494_v40 = vsel %vm2483_vm6, nan, %v2493_v1  ;;  %v2707_v47 = vshll.u32 %v2704_v3, 16  ;;  %v3450_v10 = vadd.s32 4294967169, %v2809_v50  ;;  %v2706_v31 = vmul.u32 %v2702_v25, %v2700_v14 }
 0x2d5   : > { %vm3446_vm13 = vcmp.lt.s32.totalorder %v3445_v37, 0  ;;  %v2709_v2 = vshll.u32 %v2705_v7, 16  ;;  %v2726_v63 = vmul.u32 %v2724_v45, %v2699_v27  ;;  %3283 = vst [vmem:[%s4036_s18 + $0x68] sm:$0xff] %v2494_v40  ;;  %v2727_v23 = vmul.u32 %v2723_v53, %v2700_v14 }
 0x2d6   : > { %v2604_v12 = vsel %vm3446_vm13, 0, %v3445_v37  ;;  %vm2711_vm0 = vc.u32 %v2703_v36, %v2707_v47  ;;  %v2713_v39 = vadd.s32 %v2707_v47, %v2703_v36  ;;  %vm5574_vm14 = vcmp.le.f32.partialorder %v2495_v38, 0.7853982 }
 0x2d7   : > { %v2605_v52 = vsub.s32 32, %v2604_v12  ;;  %v2609_v30 = vsub.s32 4294967266, %v2604_v12  ;;  %v2712_v62 = vsel %vm2711_vm0, 1, %v3625_v54  ;;  %v2725_v18 = vmul.u32 %v2723_v53, %v2699_v27 }
 0x2d8   : > { %v2708_v60 = vshrl.u32 %v2704_v3, 16  ;;  %v2714_v28 = vadd.s32 %v2712_v62, %v2706_v31  ;;  %vm2715_vm15 = vc.u32 %v2713_v39, %v2709_v2  ;;  %v2729_v16 = vshll.u32 %v2726_v63, 16 }
 0x2d9   : > { %v2606_v59 = vshll.u32 %v2597_v15, %v2604_v12  ;;  %v2607_v44 = vshrl.u32 %v2589_v8, %v2605_v52  ;;  %v2610_v32 = vadd.s32 127, %v2609_v30  ;;  %v2716_v17 = vsel %vm2715_vm15, 1, %v3625_v54 }
 0x2da   : > { %v2718_v9 = vadd.s32 %v2716_v17, %v2714_v28  ;;  %v2728_v26 = vmul.u32 %v2724_v45, %v2700_v14  ;;  %v2731_v38 = vshll.u32 %v2727_v23, 16  ;;  %vm2733_vm1 = vc.u32 %v2725_v18, %v2729_v16 }
 0x2db   : > { %v2608_v57 = vor.u32 %v2607_v44, %v2606_v59  ;;  %v2611_v25 = vshll.u32 %v2610_v32, 23  ;;  %v2734_v35 = vsel %vm2733_vm1, 1, %v3625_v54  ;;  %v2735_v22 = vadd.s32 %v2729_v16, %v2725_v18 }
 0x2dc   : > { %vm2497_vm2 = vcmp.lt.s32.totalorder %v3758_v42, 0  ;;  %v2686_v27 = vsel %vm2682_vm3, %v2666_v20, %v5515_v48  ;;  %v2719_v15 = vadd.s32 %v2718_v9, %v2708_v60  ;;  %v2736_v8 = vadd.s32 %v2734_v35, %v2728_v26 }
 0x2dd   : > { %v2612_v50 = vor.u32 4788187, %v2611_v25  ;;  %v2620_v14 = vsel %vm2497_vm2, %v2619_v33, %v5522_v21  ;;  %v2688_v4 = vsel %vm2684_vm8, %v5517_v43, %v2687_v41  ;;  %vm2737_vm4 = vc.u32 %v2735_v22, %v2731_v38 }
 0x2de   : > { %v2710_v3 = vshrl.u32 %v2705_v7, 16  ;;  %v2738_v45 = vsel %vm2737_vm4, 1, %v3625_v54  ;;  %v2805_v13 = vand.u32 2147483647, %v3805_v34  ;;  %v2815_v6 = vadd.s32 1, %v3450_v10 }
 0x2df   : > { %v2613_v53 = vand.u32 2147483647, %v2612_v50  ;;  %v2615_v48 = vcvt.s32.f32 %v2608_v57  ;;  %v2730_v20 = vshrl.u32 %v2726_v63, 16  ;;  %v2740_v1 = vadd.s32 %v2738_v45, %v2736_v8 }
 0x2e0   : > { %v2622_v37 = vsel %vm5574_vm14, 0, %v2620_v14  ;;  %v2689_v21 = vsel %vm2683_vm7, %v2686_v27, %v2688_v4  ;;  %v5597_v33 = vadd.s32 %v2719_v15, %v2710_v3  ;;  %vm2816_vm3 = vcmp.gt.s32.totalorder %v2815_v6, 0 }
 0x2e1   : > { %v2616_v43 = vmul.f32 %v2615_v48, %v2613_v53  ;;  %v2732_v7 = vshrl.u32 %v2727_v23, 16  ;;  %v2741_v41 = vadd.s32 %v2740_v1, %v2730_v20  ;;  %v2817_v40 = vsel %vm2816_vm3, %v2815_v6, 0 }
 0x2e2   : > { %v5599_v36 = vadd.s32 %v2735_v22, %v2731_v38  ;;  %v2819_v47 = vand.u32 31, %v2817_v40  ;;  %v2639_v31 = vadd.s32 3, %v2622_v37  ;;  %v2743_v63 = vmul.u32 %v5544_v29, %v2689_v21 }
 0x2e3   : > { %v2617_v10 = vxor.u32 2147483648, %v2616_v43  ;;  %v2742_v2 = vadd.s32 %v2741_v41, %v2732_v7  ;;  %v2812_v19 = vand.u32 8388607, %v2805_v13  ;;  %v5625_v9 = vshrl.u32 %v2817_v40, 5 }
 0x2e4   : > { %vm2745_vm5 = vc.u32 %v5597_v33, %v5599_v36  ;;  %v5606_v12 = vsub.s32 32, %v2819_v47  ;;  %v2822_v39 = vshll.u32 %v3619_v49, %v2819_v47  ;;  %v2825_v30 = vshll.u32 %v3620_v51, %v2819_v47 }
 0x2e5   : > { %v2618_v23 = vsel %vm2497_vm2, %v2617_v10, %v2616_v43  ;;  %v2746_v52 = vadd.s32 1, %v2742_v2  ;;  %v2831_v62 = vshll.u32 %v3622_v58, %v2819_v47  ;;  %v2828_v28 = vshll.u32 %v3621_v55, %v2819_v47 }
 0x2e6   : > { %v2621_v29 = vsel %vm5574_vm14, %v3758_v42, %v2618_v23  ;;  %v2823_v18 = vshrl.u32 %v3620_v51, %v5606_v12  ;;  %v2826_v60 = vshrl.u32 %v3621_v55, %v5606_v12  ;;  %v2829_v44 = vshrl.u32 %v3622_v58, %v5606_v12 }
 0x2e7   : > { %v2623_v16 = vmul.f32 %v2621_v29, %v2621_v29  ;;  %v2747_v59 = vsel %vm2745_vm5, %v2746_v52, %v2742_v2  ;;  %v2832_v32 = vshrl.u32 %v3623_v61, %v5606_v12  ;;  %v2834_v24 = vshll.u32 %v3623_v61, %v2819_v47 }
 0x2e8   : > { %v2748_v17 = vadd.s32 %v2747_v59, %v2743_v63  ;;  %v2835_v26 = vshrl.u32 %v3624_v0, %v5606_v12  ;;  %v5630_v22 = vor.u32 %v2823_v18, %v2822_v39  ;;  %v5632_v27 = vor.u32 %v2826_v60, %v2825_v30 }
 0x2e9   : > { %v2624_v38 = vmul.f32 -0.001358992, %v2623_v16  ;;  %v2631_v57 = vmul.f32 -0.00019511016, %v2623_v16  ;;  %v2833_v25 = vor.u32 %v2832_v32, %v2831_v62  ;;  %v2640_v50 = vand.u32 3, %v2639_v31 }
 0x2ea   : > { %v2749_v35 = vadd.s32 536870912, %v2748_v17  ;;  %v5634_v14 = vor.u32 %v2829_v44, %v2828_v28  ;;  %v2813_v3 = vor.u32 8388608, %v2812_v19  ;;  %v2836_v45 = vor.u32 %v2835_v26, %v2834_v24 }
 0x2eb   : > { %v2625_v15 = vadd.f32 0.041655596, %v2624_v38  ;;  %v2632_v8 = vadd.f32 0.008332121, %v2631_v57  ;;  %vm2840_vm8 = vcmp.lt.s32.totalorder %v5625_v9, 4  ;;  %vm2837_vm9 = vcmp.lt.s32.totalorder %v5625_v9, 1 }
 0x2ec   : > { %v5636_v4 = vshrl.u32 %v2749_v35, 30  ;;  %v2846_v48 = vsel %vm2840_vm8, %v2833_v25, 920167782  ;;  %vm2839_vm6 = vcmp.lt.s32.totalorder %v5625_v9, 3  ;;  %v2845_v1 = vsel %vm2837_vm9, %v5630_v22, %v5632_v27 }
 0x2ed   : > { %v2626_v6 = vmul.f32 %v2625_v15, %v2623_v16  ;;  %v2633_v53 = vmul.f32 %v2632_v8, %v2623_v16  ;;  %v2847_v43 = vsel %vm2839_vm6, %v5634_v14, %v2846_v48  ;;  %v2849_v7 = vsel %vm2837_vm9, %v5632_v27, %v5634_v14 }
 0x2ee   : > { %v2751_v20 = vshll.u32 %v5636_v4, 30  ;;  %v2850_v40 = vsel %vm2840_vm8, %v2836_v45, 1326507024  ;;  %v5659_v47 = vshll.u32 %v2813_v3, 8  ;;  %vm2641_vm7 = vcmp.lt.s32.totalorder %v2640_v50, 2 }
 0x2ef   : > { %v2627_v37 = vadd.f32 -0.4999988, %v2626_v6  ;;  %v2634_v21 = vadd.f32 -0.16666654, %v2633_v53  ;;  %vm2838_vm11 = vcmp.lt.s32.totalorder %v5625_v9, 2  ;;  %v2851_v2 = vsel %vm2839_vm6, %v2833_v25, %v2850_v40 }
 0x2f0   : > { %v5655_v41 = vsub.s32 %v2748_v17, %v2751_v20  ;;  %vm2638_vm12 = vweird.f32 %v3758_v42  ;;  %v2848_v19 = vsel %vm2838_vm11, %v2845_v1, %v2847_v43  ;;  %v2852_v39 = vsel %vm2838_vm11, %v2849_v7, %v2851_v2 }
 0x2f1   : > { %v2628_v10 = vmul.f32 %v2627_v37, %v2623_v16  ;;  %v2635_v31 = vmul.f32 %v2634_v21, %v2623_v16  ;;  %v2856_v30 = vand.u32 65535, %v2852_v39  ;;  %v2857_v62 = vshrl.u32 %v2852_v39, 16 }
 0x2f2   : > { %vm2753_vm10 = vcmp.lt.s32.totalorder %v5655_v41, 0  ;;  %v2754_v63 = vsub.s32 0, %v5655_v41  ;;  %vm2642_vm13 = vcmp.eq.s32.totalorder %v2640_v50, 0  ;;  %v2854_v60 = vand.u32 65535, %v5659_v47 }
 0x2f3   : > { %v2629_v23 = vadd.f32 1.0, %v2628_v10  ;;  %v2636_v52 = vadd.f32 1.0, %v2635_v31  ;;  %v2855_v28 = vshrl.u32 %v5659_v47, 16  ;;  %v2879_v32 = vshrl.u32 %v2848_v19, 16 }
 0x2f4   : > { %v2755_v18 = vsel %vm2753_vm10, %v2754_v63, %v5655_v41  ;;  %vm2645_vm0 = vcmp.eq.s32.totalorder %v2640_v50, 2  ;;  %v2744_v17 = vadd.s32 %v5599_v36, %v5597_v33  ;;  %v2859_v24 = vmul.u32 %v2857_v62, %v2854_v60 }
 0x2f5   : > { %v2637_v16 = vmul.f32 %v2636_v52, %v2621_v29  ;;  %v2646_v59 = vxor.u32 2147483648, %v2629_v23  ;;  %v2756_v44 = vclz %v2755_v18  ;;  %v2960_v26 = vand.u32 2147483647, %v3822_v11 }
 0x2f6   : > { %v2860_v25 = vmul.u32 %v2856_v30, %v2855_v28  ;;  %v2963_v35 = vand.u32 2139095040, %v3822_v11  ;;  %v2858_v8 = vmul.u32 %v2856_v30, %v2854_v60  ;;  %v2862_v3 = vshll.u32 %v2859_v24, 16 }
 0x2f7   : > { %v2643_v38 = vxor.u32 2147483648, %v2637_v16  ;;  %v3448_v57 = vadd.s32 4294967294, %v2756_v44  ;;  %v2647_v15 = vsel %vm2645_vm0, %v2646_v59, %v2637_v16  ;;  %v2878_v45 = vand.u32 65535, %v2848_v19 }
 0x2f8   : > { %v2864_v6 = vshll.u32 %v2860_v25, 16  ;;  %v2881_v53 = vmul.u32 %v2879_v32, %v2854_v60  ;;  %vm2866_vm15 = vc.u32 %v2858_v8, %v2862_v3  ;;  %v2868_v48 = vadd.s32 %v2862_v3, %v2858_v8 }
 0x2f9   : > { %v2644_v29 = vsel %vm2642_vm13, %v2629_v23, %v2643_v38  ;;  %vm3449_vm14 = vcmp.lt.s32.totalorder %v3448_v57, 0  ;;  %v2861_v21 = vmul.u32 %v2857_v62, %v2855_v28  ;;  %vm2652_vm1 = vcmp.lt.s32.totalorder %v3777_v5, 0 }
 0x2fa   : > { %v2648_v33 = vsel %vm2641_vm7, %v2644_v29, %v2647_v15  ;;  %v2759_v36 = vsel %vm3449_vm14, 0, %v3448_v57  ;;  %v2867_v7 = vsel %vm2866_vm15, 1, %v3625_v54  ;;  %vm2870_vm2 = vc.u32 %v2868_v48, %v2864_v6 }
 0x2fb   : > { %v2649_v20 = vsel %vm2638_vm12, nan, %v2648_v33  ;;  %v2760_v1 = vsub.s32 32, %v2759_v36  ;;  %v2764_v37 = vsub.s32 4294967266, %v2759_v36  ;;  %v2761_v43 = vshll.u32 %v5655_v41, %v2759_v36 }
 0x2fc   : > { %v2882_v40 = vmul.u32 %v2878_v45, %v2855_v28  ;;  %3284 = vst [vmem:[%s4036_s18 + $0x70] sm:$0xff] %v2649_v20  ;;  %v2869_v31 = vadd.s32 %v2867_v7, %v2861_v21  ;;  %v2871_v2 = vsel %vm2870_vm2, 1, %v3625_v54  ;;  %v2821_v42 = vshrl.u32 %v3619_v49, %v5606_v12 }
 0x2fd   : > { %v2762_v50 = vshrl.u32 %v2744_v17, %v2760_v1  ;;  %v2765_v10 = vadd.s32 127, %v2764_v37  ;;  %v2863_v63 = vshrl.u32 %v2859_v24, 16  ;;  %v2880_v19 = vmul.u32 %v2878_v45, %v2854_v60 }
 0x2fe   : > { %v2884_v39 = vshll.u32 %v2881_v53, 16  ;;  %v2873_v30 = vadd.s32 %v2871_v2, %v2869_v31  ;;  %v2883_v41 = vmul.u32 %v2879_v32, %v2855_v28  ;;  %v2886_v62 = vshll.u32 %v2882_v40, 16 }
 0x2ff   : > { %v2763_v23 = vor.u32 %v2762_v50, %v2761_v43  ;;  %v2766_v52 = vshll.u32 %v2765_v10, 23  ;;  %v2964_v16 = vshrl.u32 %v2963_v35, 23  ;;  %v2774_v44 = vsub.s32 4, %v5636_v4 }
 0x300   : > { %vm2888_vm4 = vc.u32 %v2880_v19, %v2884_v39  ;;  %v2890_v18 = vadd.s32 %v2884_v39, %v2880_v19  ;;  %v2874_v17 = vadd.s32 %v2873_v30, %v2863_v63  ;;  %v2842_v12 = vsel %vm2840_vm8, %v5634_v14, 2102212464 }
 0x301   : > { %v2767_v59 = vor.u32 4788187, %v2766_v52  ;;  %v2889_v38 = vsel %vm2888_vm4, 1, %v3625_v54  ;;  %v3453_v24 = vadd.s32 4294967169, %v2964_v16  ;;  %v2770_v15 = vcvt.s32.f32 %v2763_v23 }
 0x302   : > { %v2891_v60 = vadd.s32 %v2889_v38, %v2883_v41  ;;  %vm2892_vm3 = vc.u32 %v2890_v18, %v2886_v62  ;;  %v2865_v28 = vshrl.u32 %v2860_v25, 16  ;;  %v2841_v35 = vsel %vm2837_vm9, %v2821_v42, %v5630_v22 }
 0x303   : > { %v2768_v57 = vand.u32 2147483647, %v2767_v59  ;;  %v2893_v32 = vsel %vm2892_vm3, 1, %v3625_v54  ;;  %v2885_v8 = vshrl.u32 %v2881_v53, 16  ;;  %v2970_v45 = vadd.s32 1, %v3453_v24 }
 0x304   : > { %v2895_v3 = vadd.s32 %v2893_v32, %v2891_v60  ;;  %v2775_v14 = vsel %vm2652_vm1, %v2774_v44, %v5636_v4  ;;  %v2843_v6 = vsel %vm2839_vm6, %v5632_v27, %v2842_v12  ;;  %v5704_v33 = vadd.s32 %v2874_v17, %v2865_v28 }
 0x305   : > { %v2771_v29 = vmul.f32 %v2770_v15, %v2768_v57  ;;  %vm5708_vm5 = vcmp.le.f32.partialorder %v2650_v56, 0.7853982  ;;  %v2887_v22 = vshrl.u32 %v2882_v40, 16  ;;  %vm2971_vm8 = vcmp.gt.s32.totalorder %v2970_v45, 0 }
 0x306   : > { %v2896_v53 = vadd.s32 %v2895_v3, %v2885_v8  ;;  %v5712_v48 = vadd.s32 %v2890_v18, %v2886_v62  ;;  %v2967_v4 = vand.u32 8388607, %v2960_v26  ;;  %v2972_v20 = vsel %vm2971_vm8, %v2970_v45, 0 }
 0x307   : > { %v2772_v36 = vxor.u32 2147483648, %v2771_v29  ;;  %v2777_v27 = vsel %vm5708_vm5, 0, %v2775_v14  ;;  %v2844_v1 = vsel %vm2838_vm11, %v2841_v35, %v2843_v6  ;;  %v2974_v37 = vand.u32 31, %v2972_v20 }
 0x308   : > { %v2897_v56 = vadd.s32 %v2896_v53, %v2887_v22  ;;  %vm2900_vm9 = vc.u32 %v5704_v33, %v5712_v48  ;;  %v2794_v10 = vadd.s32 3, %v2777_v27  ;;  %v2898_v9 = vmul.u32 %v5659_v47, %v2844_v1 }
 0x309   : > { %v2773_v21 = vsel %vm2652_vm1, %v2772_v36, %v2771_v29  ;;  %v5727_v40 = vsub.s32 32, %v2974_v37  ;;  %v2968_v31 = vor.u32 8388608, %v2967_v4  ;;  %v5730_v42 = vshrl.u32 %v2972_v20, 5 }
 0x30a   : > { %v2776_v43 = vsel %vm5708_vm5, %v3777_v5, %v2773_v21  ;;  %v2901_v7 = vadd.s32 1, %v2897_v56  ;;  %v2977_v63 = vshll.u32 %v3619_v49, %v2974_v37  ;;  %v2980_v47 = vshll.u32 %v3620_v51, %v2974_v37 }
 0x30b   : > { %v2778_v50 = vmul.f32 %v2776_v43, %v2776_v43  ;;  %v2981_v19 = vshrl.u32 %v3621_v55, %v5727_v40  ;;  %v2984_v30 = vshrl.u32 %v3622_v58, %v5727_v40  ;;  %v2978_v41 = vshrl.u32 %v3620_v51, %v5727_v40 }
 0x30c   : > { %v2902_v2 = vsel %vm2900_vm9, %v2901_v7, %v2897_v56  ;;  %v2986_v62 = vshll.u32 %v3622_v58, %v2974_v37  ;;  %v2987_v18 = vshrl.u32 %v3623_v61, %v5727_v40  ;;  %v2983_v17 = vshll.u32 %v3621_v55, %v2974_v37 }
 0x30d   : > { %v2779_v39 = vmul.f32 -0.001358992, %v2778_v50  ;;  %v2786_v23 = vmul.f32 -0.00019511016, %v2778_v50  ;;  %v2903_v52 = vadd.s32 %v2902_v2, %v2898_v9  ;;  %v5744_v38 = vor.u32 %v2981_v19, %v2980_v47 }
 0x30e   : > { %v2988_v12 = vor.u32 %v2987_v18, %v2986_v62  ;;  %v2989_v60 = vshll.u32 %v3623_v61, %v2974_v37  ;;  %v2990_v24 = vshrl.u32 %v3624_v0, %v5727_v40  ;;  %v5751_v32 = vor.u32 %v2984_v30, %v2983_v17 }
 0x30f   : > { %v2780_v16 = vadd.f32 0.041655596, %v2779_v39  ;;  %v2787_v59 = vadd.f32 0.008332121, %v2786_v23  ;;  %v2904_v44 = vadd.s32 536870912, %v2903_v52  ;;  %v2795_v35 = vand.u32 3, %v2794_v10 }
 0x310   : > { %v5753_v8 = vor.u32 %v2978_v41, %v2977_v63  ;;  %v2991_v3 = vor.u32 %v2990_v24, %v2989_v60  ;;  %v5755_v45 = vshll.u32 %v2968_v31, 8  ;;  %vm2995_vm6 = vcmp.lt.s32.totalorder %v5730_v42, 4 }
 0x311   : > { %v2781_v57 = vmul.f32 %v2780_v16, %v2778_v50  ;;  %v2788_v15 = vmul.f32 %v2787_v59, %v2778_v50  ;;  %v5749_v28 = vshrl.u32 %v2904_v44, 30  ;;  %vm2992_vm7 = vcmp.lt.s32.totalorder %v5730_v42, 1 }
 0x312   : > { %vm2994_vm11 = vcmp.lt.s32.totalorder %v5730_v42, 3  ;;  %v3001_v25 = vsel %vm2995_vm6, %v2988_v12, 920167782  ;;  %v3005_v22 = vsel %vm2995_vm6, %v2991_v3, 1326507024  ;;  %v3004_v20 = vsel %vm2992_vm7, %v5744_v38, %v5751_v32 }
 0x313   : > { %v2782_v29 = vadd.f32 -0.4999988, %v2781_v57  ;;  %v2789_v14 = vadd.f32 -0.16666654, %v2788_v15  ;;  %v2906_v6 = vshll.u32 %v5749_v28, 30  ;;  %vm2993_vm12 = vcmp.lt.s32.totalorder %v5730_v42, 2 }
 0x314   : > { %v3000_v27 = vsel %vm2992_vm7, %v5753_v8, %v5744_v38  ;;  %v3002_v1 = vsel %vm2994_vm11, %v5751_v32, %v3001_v25  ;;  %v3006_v56 = vsel %vm2994_vm11, %v2988_v12, %v3005_v22  ;;  %vm2793_vm13 = vweird.f32 %v3777_v5 }
 0x315   : > { %v2783_v53 = vmul.f32 %v2782_v29, %v2778_v50  ;;  %v2790_v36 = vmul.f32 %v2789_v14, %v2778_v50  ;;  %v2907_v4 = vsub.s32 %v2903_v52, %v2906_v6  ;;  %vm2796_vm0 = vcmp.lt.s32.totalorder %v2795_v35, 2 }
 0x316   : > { %v3007_v50 = vsel %vm2993_vm12, %v3004_v20, %v3006_v56  ;;  %v3003_v19 = vsel %vm2993_vm12, %v3000_v27, %v3002_v1  ;;  %v3010_v39 = vshrl.u32 %v5755_v45, 16  ;;  %vm2797_vm14 = vcmp.eq.s32.totalorder %v2795_v35, 0 }
 0x317   : > { %v2784_v37 = vadd.f32 1.0, %v2783_v53  ;;  %v2791_v21 = vadd.f32 1.0, %v2790_v36  ;;  %vm2908_vm10 = vcmp.lt.s32.totalorder %v2907_v4, 0  ;;  %v2909_v7 = vsub.s32 0, %v2907_v4 }
 0x318   : > { %v3011_v2 = vand.u32 65535, %v3007_v50  ;;  %v3012_v23 = vshrl.u32 %v3007_v50, 16  ;;  %vm2800_vm15 = vcmp.eq.s32.totalorder %v2795_v35, 2  ;;  %v3009_v30 = vand.u32 65535, %v5755_v45 }
 0x319   : > { %v2792_v10 = vmul.f32 %v2791_v21, %v2776_v43  ;;  %v2801_v9 = vxor.u32 2147483648, %v2784_v37  ;;  %v2910_v31 = vsel %vm2908_vm10, %v2909_v7, %v2907_v4  ;;  %v2899_v41 = vadd.s32 %v5712_v48, %v5704_v33 }
 0x31a   : > { %v2911_v63 = vclz %v2910_v31  ;;  %v3015_v43 = vmul.u32 %v3011_v2, %v3010_v39  ;;  %v3118_v62 = vand.u32 2139095040, %v3850_v46  ;;  %v3014_v59 = vmul.u32 %v3012_v23, %v3009_v30 }
 0x31b   : > { %v2798_v52 = vxor.u32 2147483648, %v2792_v10  ;;  %v2802_v16 = vsel %vm2800_vm15, %v2801_v9, %v2792_v10  ;;  %v3033_v44 = vand.u32 65535, %v3003_v19  ;;  %v3013_v12 = vmul.u32 %v3011_v2, %v3009_v30 }
 0x31c   : > { %v3451_v47 = vadd.s32 4294967294, %v2911_v63  ;;  %v3034_v60 = vshrl.u32 %v3003_v19, 16  ;;  %v3016_v15 = vmul.u32 %v3012_v23, %v3010_v39  ;;  %v3017_v33 = vshll.u32 %v3014_v59, 16 }
 0x31d   : > { %v2799_v18 = vsel %vm2797_vm14, %v2784_v37, %v2798_v52  ;;  %v3018_v29 = vshrl.u32 %v3014_v59, 16  ;;  %v3019_v14 = vshll.u32 %v3015_v43, 16  ;;  %v3037_v22 = vmul.u32 %v3033_v44, %v3010_v39 }
 0x31e   : > { %v2803_v17 = vsel %vm2796_vm0, %v2799_v18, %v2802_v16  ;;  %vm3452_vm1 = vcmp.lt.s32.totalorder %v3451_v47, 0  ;;  %vm3021_vm2 = vc.u32 %v3013_v12, %v3017_v33  ;;  %v3023_v6 = vadd.s32 %v3017_v33, %v3013_v12 }
 0x31f   : > { %v2804_v24 = vsel %vm2793_vm13, nan, %v2803_v17  ;;  %v2914_v57 = vsel %vm3452_vm1, 0, %v3451_v47  ;;  %v3036_v25 = vmul.u32 %v3034_v60, %v3009_v30  ;;  %v3022_v20 = vsel %vm3021_vm2, 1, %v3625_v54 }
 0x320   : > { %v2915_v48 = vsub.s32 32, %v2914_v57  ;;  %v2919_v3 = vsub.s32 4294967266, %v2914_v57  ;;  %3285 = vst [vmem:[%s4036_s18 + $0x78] sm:$0xff] %v2804_v24  ;;  %v2916_v35 = vshll.u32 %v2907_v4, %v2914_v57  ;;  %v3024_v27 = vadd.s32 %v3022_v20, %v3016_v15 }
 0x321   : > { %vm3025_vm4 = vc.u32 %v3023_v6, %v3019_v14  ;;  %v3035_v5 = vmul.u32 %v3033_v44, %v3009_v30  ;;  %v3039_v1 = vshll.u32 %v3036_v25, 16  ;;  %v3038_v7 = vmul.u32 %v3034_v60, %v3010_v39 }
 0x322   : > { %v2917_v53 = vshrl.u32 %v2899_v41, %v2915_v48  ;;  %v2920_v36 = vadd.s32 127, %v2919_v3  ;;  %v3026_v21 = vsel %vm3025_vm4, 1, %v3625_v54  ;;  %v3041_v10 = vshll.u32 %v3037_v22, 16 }
 0x323   : > { %v3028_v50 = vadd.s32 %v3026_v21, %v3024_v27  ;;  %vm3043_vm3 = vc.u32 %v3035_v5, %v3039_v1  ;;  %v3045_v9 = vadd.s32 %v3039_v1, %v3035_v5  ;;  %v2976_v4 = vshrl.u32 %v3619_v49, %v5727_v40 }
 0x324   : > { %v2918_v56 = vor.u32 %v2917_v53, %v2916_v35  ;;  %v2921_v37 = vshll.u32 %v2920_v36, 23  ;;  %v2997_v2 = vsel %vm2995_vm6, %v5751_v32, 2102212464  ;;  %v3044_v63 = vsel %vm3043_vm3, 1, %v3625_v54 }
 0x325   : > { %v3020_v19 = vshrl.u32 %v3015_v43, 16  ;;  %v3029_v23 = vadd.s32 %v3028_v50, %v3018_v29  ;;  %v3046_v52 = vadd.s32 %v3044_v63, %v3038_v7  ;;  %vm3047_vm5 = vc.u32 %v3045_v9, %v3041_v10 }
 0x326   : > { %v2922_v31 = vor.u32 4788187, %v2921_v37  ;;  %v2925_v39 = vcvt.s32.f32 %v2918_v56  ;;  %v3048_v41 = vsel %vm3047_vm5, 1, %v3625_v54  ;;  %v3119_v47 = vshrl.u32 %v3118_v62, 23 }
 0x327   : > { %v2929_v18 = vsub.s32 4, %v5749_v28  ;;  %v2996_v40 = vsel %vm2992_vm7, %v2976_v4, %v5753_v8  ;;  %v3040_v16 = vshrl.u32 %v3036_v25, 16  ;;  %v3050_v59 = vadd.s32 %v3048_v41, %v3046_v52 }
 0x328   : > { %v2923_v30 = vand.u32 2147483647, %v2922_v31  ;;  %v2998_v43 = vsel %vm2994_vm11, %v5744_v38, %v2997_v2  ;;  %v5809_v44 = vadd.s32 %v3029_v23, %v3020_v19  ;;  %v3456_v17 = vadd.s32 4294967169, %v3119_v47 }
 0x329   : > { %v3042_v12 = vshrl.u32 %v3037_v22, 16  ;;  %v3051_v60 = vadd.s32 %v3050_v59, %v3040_v16  ;;  %vm2807_vm8 = vcmp.lt.s32.totalorder %v3805_v34, 0  ;;  %v5812_v24 = vadd.s32 %v3045_v9, %v3041_v10 }
 0x32a   : > { %v2926_v32 = vmul.f32 %v2925_v39, %v2923_v30  ;;  %v3125_v57 = vadd.s32 1, %v3456_v17  ;;  %v2930_v8 = vsel %vm2807_vm8, %v2929_v18, %v5749_v28  ;;  %v2999_v15 = vsel %vm2993_vm12, %v2996_v40, %v2998_v43 }
 0x32b   : > { %v3052_v33 = vadd.s32 %v3051_v60, %v3042_v12  ;;  %vm5819_vm9 = vcmp.le.f32.partialorder %v2805_v13, 0.7853982  ;;  %vm3055_vm6 = vc.u32 %v5809_v44, %v5812_v24  ;;  %v3053_v13 = vmul.u32 %v5755_v45, %v2999_v15 }
 0x32c   : > { %v2927_v62 = vxor.u32 2147483648, %v2926_v32  ;;  %vm3126_vm7 = vcmp.gt.s32.totalorder %v3125_v57, 0  ;;  %v2932_v42 = vsel %vm5819_vm9, 0, %v2930_v8  ;;  %v3115_v27 = vand.u32 2147483647, %v3850_v46 }
 0x32d   : > { %v3056_v28 = vadd.s32 1, %v3052_v33  ;;  %v3127_v29 = vsel %vm3126_vm7, %v3125_v57, 0  ;;  %v2949_v20 = vadd.s32 3, %v2932_v42  ;;  %vm2948_vm13 = vweird.f32 %v3805_v34 }
 0x32e   : > { %v2928_v48 = vsel %vm2807_vm8, %v2927_v62, %v2926_v32  ;;  %v3129_v6 = vand.u32 31, %v3127_v29  ;;  %v3122_v2 = vand.u32 8388607, %v3115_v27  ;;  %v5847_v63 = vshrl.u32 %v3127_v29, 5 }
 0x32f   : > { %v2931_v3 = vsel %vm5819_vm9, %v3805_v34, %v2928_v48  ;;  %v3057_v25 = vsel %vm3055_vm6, %v3056_v28, %v3052_v33  ;;  %v2950_v30 = vand.u32 3, %v2949_v20  ;;  %vm2962_vm6 = vcmp.lt.s32.totalorder %v3822_v11, 0 }
 0x330   : > { %v2933_v14 = vmul.f32 %v2931_v3, %v2931_v3  ;;  %v3058_v53 = vadd.s32 %v3057_v25, %v3053_v13  ;;  %v5831_v36 = vsub.s32 32, %v3129_v6  ;;  %v3132_v5 = vshll.u32 %v3619_v49, %v3129_v6 }
 0x331   : > { %v3135_v21 = vshll.u32 %v3620_v51, %v3129_v6  ;;  %v3141_v50 = vshll.u32 %v3622_v58, %v3129_v6  ;;  %v3138_v19 = vshll.u32 %v3621_v55, %v3129_v6  ;;  %v3144_v40 = vshll.u32 %v3623_v61, %v3129_v6 }
 0x332   : > { %v2934_v22 = vmul.f32 -0.001358992, %v2933_v14  ;;  %v2941_v35 = vmul.f32 -0.00019511016, %v2933_v14  ;;  %v3059_v37 = vadd.s32 536870912, %v3058_v53  ;;  %v3133_v45 = vshrl.u32 %v3620_v51, %v5831_v36 }
 0x333   : > { %v3136_v7 = vshrl.u32 %v3621_v55, %v5831_v36  ;;  %v3142_v10 = vshrl.u32 %v3623_v61, %v5831_v36  ;;  %v3139_v51 = vshrl.u32 %v3622_v58, %v5831_v36  ;;  %v3145_v55 = vshrl.u32 %v3624_v0, %v5831_v36 }
 0x334   : > { %v2935_v1 = vadd.f32 0.041655596, %v2934_v22  ;;  %v2942_v56 = vadd.f32 0.008332121, %v2941_v35  ;;  %v5843_v4 = vshrl.u32 %v3059_v37, 30  ;;  %v5853_v41 = vor.u32 %v3133_v45, %v3132_v5 }
 0x335   : > { %v5855_v47 = vor.u32 %v3136_v7, %v3135_v21  ;;  %v3143_v18 = vor.u32 %v3142_v10, %v3141_v50  ;;  %v3123_v43 = vor.u32 8388608, %v3122_v2  ;;  %v3140_v58 = vor.u32 %v3139_v51, %v3138_v19 }
 0x336   : > { %v2936_v9 = vmul.f32 %v2935_v1, %v2933_v14  ;;  %v2943_v31 = vmul.f32 %v2942_v56, %v2933_v14  ;;  %v3061_v39 = vshll.u32 %v5843_v4, 30  ;;  %vm3147_vm11 = vcmp.lt.s32.totalorder %v5847_v63, 1 }
 0x337   : > { %vm3150_vm12 = vcmp.lt.s32.totalorder %v5847_v63, 4  ;;  %vm3149_vm0 = vcmp.lt.s32.totalorder %v5847_v63, 3  ;;  %v3155_v61 = vsel %vm3147_vm11, %v5853_v41, %v5855_v47  ;;  %v3146_v15 = vor.u32 %v3145_v55, %v3144_v40 }
 0x338   : > { %v2937_v23 = vadd.f32 -0.4999988, %v2936_v9  ;;  %v2944_v52 = vadd.f32 -0.16666654, %v2943_v31  ;;  %v3062_v32 = vsub.s32 %v3058_v53, %v3061_v39  ;;  %v3156_v0 = vsel %vm3150_vm12, %v3143_v18, 920167782 }
 0x339   : > { %vm2951_vm14 = vcmp.lt.s32.totalorder %v2950_v30, 2  ;;  %vm3148_vm15 = vcmp.lt.s32.totalorder %v5847_v63, 2  ;;  %v3157_v38 = vsel %vm3149_vm0, %v3140_v58, %v3156_v0  ;;  %vm2952_vm1 = vcmp.eq.s32.totalorder %v2950_v30, 0 }
 0x33a   : > { %v2938_v16 = vmul.f32 %v2937_v23, %v2933_v14  ;;  %v2945_v59 = vmul.f32 %v2944_v52, %v2933_v14  ;;  %vm3063_vm10 = vcmp.lt.s32.totalorder %v3062_v32, 0  ;;  %v3064_v60 = vsub.s32 0, %v3062_v32 }
 0x33b   : > { %v3158_v28 = vsel %vm3148_vm15, %v3155_v61, %v3157_v38  ;;  %v5875_v29 = vshll.u32 %v3123_v43, 8  ;;  %vm2955_vm2 = vcmp.eq.s32.totalorder %v2950_v30, 2  ;;  %v3159_v14 = vsel %vm3147_vm11, %v5855_v47, %v3140_v58 }
 0x33c   : > { %v2939_v17 = vadd.f32 1.0, %v2938_v16  ;;  %v2946_v12 = vadd.f32 1.0, %v2945_v59  ;;  %v3065_v8 = vsel %vm3063_vm10, %v3064_v60, %v3062_v32  ;;  %v3160_v25 = vsel %vm3150_vm12, %v3146_v15, 1326507024 }
 0x33d   : > { %v3066_v33 = vclz %v3065_v8  ;;  %v3189_v22 = vshrl.u32 %v3158_v28, 16  ;;  %v3161_v53 = vsel %vm3149_vm0, %v3143_v18, %v3160_v25  ;;  %v3188_v20 = vand.u32 65535, %v3158_v28 }
 0x33e   : > { %v2947_v62 = vmul.f32 %v2946_v12, %v2931_v3  ;;  %v2956_v57 = vxor.u32 2147483648, %v2939_v17  ;;  %v3054_v3 = vadd.s32 %v5812_v24, %v5809_v44  ;;  %v3162_v5 = vsel %vm3148_vm15, %v3159_v14, %v3161_v53 }
 0x33f   : > { %v3454_v42 = vadd.s32 4294967294, %v3066_v33  ;;  %v3164_v1 = vand.u32 65535, %v5875_v29  ;;  %v3165_v21 = vshrl.u32 %v5875_v29, 16  ;;  %v3166_v45 = vand.u32 65535, %v3162_v5 }
 0x340   : > { %v2953_v48 = vxor.u32 2147483648, %v2947_v62  ;;  %v2957_v6 = vsel %vm2955_vm2, %v2956_v57, %v2947_v62  ;;  %v3167_v50 = vshrl.u32 %v3162_v5, 16  ;;  %v3131_v19 = vshrl.u32 %v3619_v49, %v5831_v36 }
 0x341   : > { %vm3455_vm4 = vcmp.lt.s32.totalorder %v3454_v42, 0  ;;  %v3191_v10 = vmul.u32 %v3189_v22, %v3164_v1  ;;  %v3170_v2 = vmul.u32 %v3166_v45, %v3165_v21  ;;  %v3192_v34 = vmul.u32 %v3188_v20, %v3165_v21 }
 0x342   : > { %v2954_v13 = vsel %vm2952_vm1, %v2939_v17, %v2953_v48  ;;  %v3069_v24 = vsel %vm3455_vm4, 0, %v3454_v42  ;;  %v3152_v51 = vsel %vm3150_vm12, %v3140_v58, 2102212464  ;;  %v3169_v23 = vmul.u32 %v3167_v50, %v3164_v1 }
 0x343   : > { %v2958_v35 = vsel %vm2951_vm14, %v2954_v13, %v2957_v6  ;;  %v3070_v56 = vsub.s32 32, %v3069_v24  ;;  %v3074_v37 = vsub.s32 4294967266, %v3069_v24  ;;  %v3071_v7 = vshll.u32 %v3062_v32, %v3069_v24 }
 0x344   : > { %v2959_v44 = vsel %vm2948_vm13, nan, %v2958_v35  ;;  %v3194_v52 = vshll.u32 %v3191_v10, 16  ;;  %v3190_v18 = vmul.u32 %v3188_v20, %v3164_v1  ;;  %v3193_v40 = vmul.u32 %v3189_v22, %v3165_v21 }
 0x345   : > { %3286 = vst [vmem:[%s4036_s18 + $0x80] sm:$0xff] %v2959_v44  ;;  %v3072_v9 = vshrl.u32 %v3054_v3, %v3070_v56  ;;  %v3075_v31 = vadd.s32 127, %v3074_v37  ;;  %v3168_v16 = vmul.u32 %v3166_v45, %v3164_v1  ;;  %v3171_v59 = vmul.u32 %v3167_v50, %v3165_v21 }
 0x346   : > { %v3172_v32 = vshll.u32 %v3169_v23, 16  ;;  %v3174_v55 = vshll.u32 %v3170_v2, 16  ;;  %v3196_v17 = vshll.u32 %v3192_v34, 16  ;;  %vm3198_vm3 = vc.u32 %v3190_v18, %v3194_v52 }
 0x347   : > { %v3073_v30 = vor.u32 %v3072_v9, %v3071_v7  ;;  %v3076_v39 = vshll.u32 %v3075_v31, 23  ;;  %v3200_v12 = vadd.s32 %v3194_v52, %v3190_v18  ;;  %v3199_v36 = vsel %vm3198_vm3, 1, %v3625_v54 }
 0x348   : > { %vm3176_vm5 = vc.u32 %v3168_v16, %v3172_v32  ;;  %v3178_v49 = vadd.s32 %v3172_v32, %v3168_v16  ;;  %v3201_v0 = vadd.s32 %v3199_v36, %v3193_v40  ;;  %v3195_v33 = vshrl.u32 %v3191_v10, 16 }
 0x349   : > { %v3077_v43 = vor.u32 4788187, %v3076_v39  ;;  %v3080_v60 = vcvt.s32.f32 %v3073_v30  ;;  %v3177_v61 = vsel %vm3176_vm5, 1, %v3625_v54  ;;  %vm3202_vm8 = vc.u32 %v3200_v12, %v3196_v17 }
 0x34a   : > { %v3179_v62 = vadd.s32 %v3177_v61, %v3171_v59  ;;  %vm3180_vm9 = vc.u32 %v3178_v49, %v3174_v55  ;;  %v3203_v57 = vsel %vm3202_vm8, 1, %v3625_v54  ;;  %v3151_v48 = vsel %vm3147_vm11, %v3131_v19, %v5853_v41 }
 0x34b   : > { %v3078_v58 = vand.u32 2147483647, %v3077_v43  ;;  %v3181_v15 = vsel %vm3180_vm9, 1, %v3625_v54  ;;  %v3205_v38 = vadd.s32 %v3203_v57, %v3201_v0  ;;  %v3153_v28 = vsel %vm3149_vm0, %v5855_v47, %v3152_v51 }
 0x34c   : > { %v3173_v3 = vshrl.u32 %v3169_v23, 16  ;;  %v3183_v42 = vadd.s32 %v3181_v15, %v3179_v62  ;;  %v3197_v13 = vshrl.u32 %v3192_v34, 16  ;;  %v3175_v25 = vshrl.u32 %v3170_v2, 16 }
 0x34d   : > { %v3081_v8 = vmul.f32 %v3080_v60, %v3078_v58  ;;  %v3206_v6 = vadd.s32 %v3205_v38, %v3195_v33  ;;  %vm5911_vm7 = vcmp.le.f32.partialorder %v2960_v26, 0.7853982  ;;  %v3154_v47 = vsel %vm3148_vm15, %v3151_v48, %v3153_v28 }
 0x34e   : > { %v3184_v22 = vadd.s32 %v3183_v42, %v3173_v3  ;;  %v3084_v53 = vsub.s32 4, %v5843_v4  ;;  %v3204_v24 = vadd.s32 %v3200_v12, %v3196_v17  ;;  %v3208_v1 = vmul.u32 %v5875_v29, %v3154_v47 }
 0x34f   : > { %v3082_v14 = vxor.u32 2147483648, %v3081_v8  ;;  %v3207_v35 = vadd.s32 %v3206_v6, %v3197_v13  ;;  %vm3103_vm14 = vweird.f32 %v3822_v11  ;;  %vm3117_vm1 = vcmp.lt.s32.totalorder %v3850_v46, 0 }
 0x350   : > { %v3185_v44 = vadd.s32 %v3184_v22, %v3175_v25  ;;  %v3085_v63 = vsel %vm2962_vm6, %v3084_v53, %v5843_v4  ;;  %vm3116_vm2 = vcmp.le.f32.partialorder %v3115_v27, 0.7853982  ;;  %vm3258_vm8 = vweird.f32 %v3850_v46 }
 0x351   : > { %v3083_v41 = vsel %vm2962_vm6, %v3082_v14, %v3081_v8  ;;  %v3211_v26 = vadd.s32 1, %v3207_v35  ;;  %v3087_v9 = vsel %vm5911_vm7, 0, %v3085_v63 }
 0x352   : > { %v3086_v20 = vsel %vm5911_vm7, %v3822_v11, %v3083_v41  ;;  %vm3210_vm11 = vc.u32 %v3185_v44, %v3204_v24  ;;  %v3104_v51 = vadd.s32 3, %v3087_v9  ;;  %v3209_v0 = vadd.s32 %v3204_v24, %v3185_v44 }
 0x353   : > { %v3088_v5 = vmul.f32 %v3086_v20, %v3086_v20  ;;  %v3212_v21 = vsel %vm3210_vm11, %v3211_v26, %v3207_v35 }
 0x354   : > { %v3213_v45 = vadd.s32 %v3212_v21, %v3208_v1  ;;  %v3105_v4 = vand.u32 3, %v3104_v51 }
 0x355   : > { %v3089_v56 = vmul.f32 -0.001358992, %v3088_v5  ;;  %v3096_v37 = vmul.f32 -0.00019511016, %v3088_v5 }
 0x356   : > { %v3214_v10 = vadd.s32 536870912, %v3213_v45  ;;  %vm3107_vm10 = vcmp.eq.s32.totalorder %v3105_v4, 0  ;;  %vm3110_vm13 = vcmp.eq.s32.totalorder %v3105_v4, 2  ;;  %vm3106_vm0 = vcmp.lt.s32.totalorder %v3105_v4, 2 }
 0x357   : > { %v3090_v7 = vadd.f32 0.041655596, %v3089_v56  ;;  %v3097_v50 = vadd.f32 0.008332121, %v3096_v37 }
 0x358   : > { %v3215_v34 = vshrl.u32 %v3214_v10, 30 }
 0x359   : > { %v3091_v31 = vmul.f32 %v3090_v7, %v3088_v5  ;;  %v3098_v2 = vmul.f32 %v3097_v50, %v3088_v5 }
 0x35a   : > { %v3216_v23 = vshll.u32 %v3215_v34, 30  ;;  %v3239_v6 = vsub.s32 4, %v3215_v34 }
 0x35b   : > { %v3092_v19 = vadd.f32 -0.4999988, %v3091_v31  ;;  %v3099_v29 = vadd.f32 -0.16666654, %v3098_v2 }
 0x35c   : > { %v3217_v39 = vsub.s32 %v3213_v45, %v3216_v23  ;;  %v3240_v47 = vsel %vm3117_vm1, %v3239_v6, %v3215_v34 }
 0x35d   : > { %v3093_v52 = vmul.f32 %v3092_v19, %v3088_v5  ;;  %v3100_v30 = vmul.f32 %v3099_v29, %v3088_v5 }
 0x35e   : > { %vm3218_vm12 = vcmp.lt.s32.totalorder %v3217_v39, 0  ;;  %v3219_v16 = vsub.s32 0, %v3217_v39 }
 0x35f   : > { %v3094_v18 = vadd.f32 1.0, %v3093_v52  ;;  %v3101_v40 = vadd.f32 1.0, %v3100_v30 }
 0x360   : > { %v3220_v55 = vsel %vm3218_vm12, %v3219_v16, %v3217_v39 }
 0x361   : > { %v3102_v59 = vmul.f32 %v3101_v40, %v3086_v20  ;;  %v3111_v32 = vxor.u32 2147483648, %v3094_v18  ;;  %v3221_v17 = vclz %v3220_v55  ;;  %v3242_v20 = vsel %vm3116_vm2, 0, %v3240_v47 }
 0x362   : > { %v3259_v1 = vadd.s32 3, %v3242_v20 }
 0x363   : > { %v3108_v43 = vxor.u32 2147483648, %v3102_v59  ;;  %v3112_v60 = vsel %vm3110_vm13, %v3111_v32, %v3102_v59  ;;  %v3457_v49 = vadd.s32 4294967294, %v3221_v17 }
 0x364   : > { %v3260_v63 = vand.u32 3, %v3259_v1 }
 0x365   : > { %v3109_v12 = vsel %vm3107_vm10, %v3094_v18, %v3108_v43  ;;  %vm3458_vm15 = vcmp.lt.s32.totalorder %v3457_v49, 0 }
 0x366   : > { %v3113_v36 = vsel %vm3106_vm0, %v3109_v12, %v3112_v60  ;;  %v3224_v61 = vsel %vm3458_vm15, 0, %v3457_v49  ;;  %vm3262_vm4 = vcmp.eq.s32.totalorder %v3260_v63, 0  ;;  %vm3265_vm3 = vcmp.eq.s32.totalorder %v3260_v63, 2 }
 0x367   : > { %v3114_v58 = vsel %vm3103_vm14, nan, %v3113_v36  ;;  %v3225_v62 = vsub.s32 32, %v3224_v61  ;;  %v3229_v57 = vsub.s32 4294967266, %v3224_v61  ;;  %v3226_v8 = vshll.u32 %v3217_v39, %v3224_v61 }
 0x368   : > { %3287 = vst [vmem:[%s4036_s18 + $0x88] sm:$0xff] %v3114_v58  ;;  %vm3261_vm5 = vcmp.lt.s32.totalorder %v3260_v63, 2 }
 0x369   : > { %v3227_v15 = vshrl.u32 %v3209_v0, %v3225_v62  ;;  %v3230_v33 = vadd.s32 127, %v3229_v57 }
 0x36b   : > { %v3228_v38 = vor.u32 %v3227_v15, %v3226_v8  ;;  %v3231_v48 = vshll.u32 %v3230_v33, 23 }
 0x36d   : > { %v3232_v28 = vor.u32 4788187, %v3231_v48  ;;  %v3235_v42 = vcvt.s32.f32 %v3228_v38 }
 0x36f   : > { %v3233_v3 = vand.u32 2147483647, %v3232_v28 }
 0x371   : > { %v3236_v14 = vmul.f32 %v3235_v42, %v3233_v3 }
 0x373   : > { %v3237_v13 = vxor.u32 2147483648, %v3236_v14 }
 0x375   : > { %v3238_v11 = vsel %vm3117_vm1, %v3237_v13, %v3236_v14 }
 0x376   : > { %v3241_v25 = vsel %vm3116_vm2, %v3850_v46, %v3238_v11 }
 0x377   : > { %v3243_v22 = vmul.f32 %v3241_v25, %v3241_v25 }
 0x379   : > { %v3244_v54 = vmul.f32 -0.001358992, %v3243_v22  ;;  %v3251_v41 = vmul.f32 -0.00019511016, %v3243_v22 }
 0x37b   : > { %v3245_v35 = vadd.f32 0.041655596, %v3244_v54  ;;  %v3252_v53 = vadd.f32 0.008332121, %v3251_v41 }
 0x37d   : > { %v3246_v44 = vmul.f32 %v3245_v35, %v3243_v22  ;;  %v3253_v24 = vmul.f32 %v3252_v53, %v3243_v22 }
 0x37f   : > { %v3247_v5 = vadd.f32 -0.4999988, %v3246_v44  ;;  %v3254_v26 = vadd.f32 -0.16666654, %v3253_v24 }
 0x381   : > { %v3248_v27 = vmul.f32 %v3247_v5, %v3243_v22  ;;  %v3255_v56 = vmul.f32 %v3254_v26, %v3243_v22 }
 0x383   : > { %v3249_v37 = vadd.f32 1.0, %v3248_v27  ;;  %v3256_v21 = vadd.f32 1.0, %v3255_v56 }
 0x385   : > { %v3257_v45 = vmul.f32 %v3256_v21, %v3241_v25  ;;  %v3266_v7 = vxor.u32 2147483648, %v3249_v37 }
 0x387   : > { %v3263_v50 = vxor.u32 2147483648, %v3257_v45  ;;  %v3267_v9 = vsel %vm3265_vm3, %v3266_v7, %v3257_v45 }
 0x389   : > { %v3264_v10 = vsel %vm3262_vm4, %v3249_v37, %v3263_v50 }
 0x38a   : > { %v3268_v31 = vsel %vm3261_vm5, %v3264_v10, %v3267_v9 }
 0x38b   : > { %v3269_v2 = vsel %vm3258_vm8, nan, %v3268_v31 }
 0x38c   : > { %3288 = vst [vmem:[%s4036_s18 + $0x90] sm:$0xff] %v3269_v2 }
 0x38d   : > { %3566 = shalt.err (!%p3563_p5)
}
 0x38e   : > { %s3626_s10 = smov 128   ;;  %s3627_s18 = smov 8  }
 0x38f   : > { %3472 = dma.vmem_to_hbm [thread:$0]  (%p3688_p4), %s3304_s4, 2432, %s3306_s5, %s3290_s15, %s3626_s10, %s3626_s10, %s3627_s18  }
 0x390 PF: > { %p3478_p6 = scmp.ge.s32.totalorder %s3617_s17, 2  ;;  %s3320_s23 = sand.u32 1, %s3597_s12  }
 0x391   : > { %s3321_s26 = scalar_lea.sflag [#allocation3], %s3320_s23 }
 0x392   : > { %p3475_p7 = pnand %p3478_p6, %p3695_p8 }
 0x394   : > { %p3476_p9 = pneg %p3475_p7 }
 0x396   : > { %3592 = dma.done.wait (%p3476_p9), %s3321_s26, 2432  }
 0x397   : > { %3594 = vsyncadd (%p3476_p9), %s3321_s26, 4294964864  ;;  %s16_s17 = sadd.s32 1, %s3617_s17   ;;  %s6018_s12 = smov %s3601_s13 }
 0x398   : > { %p13_p10 = scmp.ge.s32.totalorder %s16_s17, 4   ;;  %s6019_s13 = smov %s3605_s14 }
 0x399   : > { %s6020_s14 = smov %s3701_s25  ;;  %s6021_s15 = smov %s3613_s16 }
 0x39a   : > { %s6022_s16 = smov %s6024_s20  ;;  %15 = sbr.rel (!%p13_p10) target bundleno = 4 (0x4), region = 67 }
 0x39f   :  { %3327 = vsyncpa [#allocation3], 1 }
 0x3a0   :  { %3329 = vsyncpa [#allocation3 + $0x1], 1 }

</bundles_post_ra>
